<compile_context>
chip_gen: v7x
topology: tpu7x:2x2x1
jax: 0.10.0
libtpu: 0.0.40
codegen_flags: <defaults>
</compile_context>

<pallas_src>
import math

import numpy as np

import jax
import jax.numpy as jnp
from jax.experimental import pallas as pl
from jax.experimental.pallas import tpu as pltpu

BN_EPS = 1e-5
NEG_SLOPE = 0.2


def _row_tile(m, target=1024):
    """Largest row tile: full array if small, else a multiple-of-8 divisor <= target."""
    if m <= target:
        return m
    t = (target // 8) * 8
    while t >= 8:
        if m % t == 0:
            return t
        t -= 8
    return m


# ----------------------------------------------------------------------------
# Fused direct 3x3x3 conv kernel (+ bias + LeakyReLU + partial BN statistics)
# Used twice: (a) phase-expanded ConvTranspose3d (trunk+shortcut fused),
#             (b) the trunk Conv3d(3, padding=1).
# ----------------------------------------------------------------------------
def _make_conv_kernel(Hp, Wp, Ci, Co):
    Ho, Wo = Hp - 2, Wp - 2
    R = Ho * Wo

    def kernel(x0_ref, x1_ref, x2_ref, w_ref, b_ref, y_ref, sum_ref, sq_ref):
        planes = (x0_ref, x1_ref, x2_ref)
        acc = jnp.zeros((R, Co), jnp.float32)
        t = 0
        for kd in range(3):
            p = planes[kd][0, 0]                       # (Hp, Wp, Ci) halo'd plane in VMEM
            for kh in range(3):
                for kw in range(3):
                    win = p[kh:kh + Ho, kw:kw + Wo, :].reshape(R, Ci)   # bf16 window
                    acc = acc + jnp.dot(win, w_ref[t],
                                        preferred_element_type=jnp.float32)
                    t += 1
        y = acc + b_ref[...]
        y = jnp.where(y >= 0.0, y, NEG_SLOPE * y)       # LeakyReLU(0.2)
        y_ref[...] = y[None, None]                      # (1, 1, R, Co)
        # fused, parallel-safe partial BN statistics (finished in JAX)
        sum_ref[...] = jnp.sum(y, axis=0)[None, None, None]
        sq_ref[...] = jnp.sum(y * y, axis=0)[None, None, None]

    return kernel


def conv3x3x3_fused(xp, w, b):
    """Direct 'valid' 3x3x3 conv over an already (+1)-padded input.

    xp: [N, Dp, Hp, Wp, Ci]  (bf16, spatially padded by 1)
    w : [27, Ci, Co]         (bf16, taps ordered (kd, kh, kw))
    b : [1, Co]              (f32)
    Returns: y [N, Dp-2, (Hp-2)*(Wp-2), Co] (f32, post-LeakyReLU),
             partial per-(n,d) sums and sums-of-squares [N, Dp-2, 1, Co].
    """
    N, Dp, Hp, Wp, Ci = xp.shape
    Do, Ho, Wo = Dp - 2, Hp - 2, Wp - 2
    Co = w.shape[-1]
    R = Ho * Wo
    kernel = _make_conv_kernel(Hp, Wp, Ci, Co)

    def plane_spec(kd):
        # d-block size is 1, so the block index along d is the element offset:
        # grid step (n, d) reads halo planes d, d+1, d+2 of the padded input.
        return pl.BlockSpec((1, 1, Hp, Wp, Ci), lambda n, d: (n, d + kd, 0, 0, 0))

    stat_spec = pl.BlockSpec((1, 1, 1, Co), lambda n, d: (n, d, 0, 0))

    return pl.pallas_call(
        kernel,
        out_shape=(jax.ShapeDtypeStruct((N, Do, R, Co), jnp.float32),
                   jax.ShapeDtypeStruct((N, Do, 1, Co), jnp.float32),
                   jax.ShapeDtypeStruct((N, Do, 1, Co), jnp.float32)),
        grid_spec=pltpu.PrefetchScalarGridSpec(
            num_scalar_prefetch=0,
            grid=(N, Do),
            in_specs=[plane_spec(0), plane_spec(1), plane_spec(2),
                      pl.BlockSpec((27, Ci, Co), lambda n, d: (0, 0, 0)),
                      pl.BlockSpec((1, Co), lambda n, d: (0, 0))],
            out_specs=(pl.BlockSpec((1, 1, R, Co), lambda n, d: (n, d, 0, 0)),
                       stat_spec, stat_spec),
        ),
        compiler_params=pltpu.CompilerParams(
            dimension_semantics=("parallel", "parallel")),
    )(xp, xp, xp, w, b)


# ----------------------------------------------------------------------------
# Lane-dense elementwise kernels: BN apply (y*scale+shift), optionally + residual
# ----------------------------------------------------------------------------
def _scale_shift_kernel(y_ref, sc_ref, sh_ref, o_ref):
    o_ref[...] = y_ref[...] * sc_ref[...] + sh_ref[...]


def _scale_shift_add_kernel(y_ref, sc_ref, sh_ref, r_ref, o_ref):
    o_ref[...] = y_ref[...] * sc_ref[...] + sh_ref[...] + r_ref[...]


def scale_shift(y, scale, shift, add=None):
    M, L = y.shape
    tm = _row_tile(M)
    row_spec = pl.BlockSpec((tm, L), lambda i: (i, 0))
    vec_spec = pl.BlockSpec((1, L), lambda i: (0, 0))
    if add is None:
        kernel = _scale_shift_kernel
        operands = (y, scale, shift)
        in_specs = [row_spec, vec_spec, vec_spec]
    else:
        kernel = _scale_shift_add_kernel
        operands = (y, scale, shift, add)
        in_specs = [row_spec, vec_spec, vec_spec, row_spec]
    return pl.pallas_call(
        kernel,
        out_shape=jax.ShapeDtypeStruct((M, L), jnp.float32),
        grid_spec=pltpu.PrefetchScalarGridSpec(
            num_scalar_prefetch=0,
            grid=(M // tm,),
            in_specs=in_specs,
            out_specs=row_spec,
        ),
        compiler_params=pltpu.CompilerParams(dimension_semantics=("parallel",)),
    )(*operands)


# ----------------------------------------------------------------------------
# BN helpers (tiny reductions on the fused partial stats; plain JAX)
# ----------------------------------------------------------------------------
def _finalize_bn(s, sq, count):
    mean = s / count
    # biased variance (PyTorch training-mode normalization); clamp tiny negatives
    var = jnp.maximum(sq / count - mean * mean, 0.0)
    invstd = jax.lax.rsqrt(var + BN_EPS)
    return mean, invstd


# ----------------------------------------------------------------------------
# Parameter preparation (done once, plain JAX)
# ----------------------------------------------------------------------------
def prepare_params(p):
    """Builds the phase-expanded ConvT weight (trunk + shortcut fused along the
    output-column axis) and the 3x3x3 conv weight in tap-major layout."""
    Cin, Cout = p["wT1"].shape[0], p["wT1"].shape[1]

    # Per-axis phase selection: S[s, r, k] = 1 iff the 4-tap transpose-conv
    # kernel index k feeds coarse window offset s for output phase r
    # (k = 3 + r - 2*s with s - r in {0, 1}).
    S = np.zeros((3, 2, 4), np.float32)
    for r in range(2):
        for t in range(2):
            S[r + t, r, 3 - r - 2 * t] = 1.0
    S = jnp.asarray(S)

    wcat = jnp.stack([p["wT1"], p["wTs"]], axis=0)          # [br, Cin, Cout, 4,4,4]
    # rows: (sd, sh, sw, ci)   cols: (rd, rh, rw, branch, co)
    wbig = jnp.einsum("adk,bel,cfm,gioklm->abcidefgo", S, S, S, wcat)
    wbig = wbig.reshape(27, Cin, 16 * Cout)
    bbig = jnp.broadcast_to(jnp.stack([p["bT1"], p["bTs"]], 0),
                            (8, 2, Cout)).reshape(1, 16 * Cout)

    # Conv3d weight [Cout, Cin, 3,3,3] -> [27 (kd,kh,kw), Cin, Cout]
    w2m = jnp.transpose(p["w2"], (2, 3, 4, 1, 0)).reshape(27, Cout, Cout)

    out = dict(p)
    out.update(
        wbig=wbig.astype(jnp.bfloat16),
        bbig=bbig.astype(jnp.float32),
        w2m=w2m.astype(jnp.bfloat16),
        b2m=p["b2"].reshape(1, Cout).astype(jnp.float32),
    )
    return out


# ----------------------------------------------------------------------------
# ResBlockUp forward
# ----------------------------------------------------------------------------
def resblock_up(x, pp):
    # x: [N, Cin, D, H, W] (NCDHW) -> [N, Cout, 2D, 2H, 2W]
    N, Cin, D, H, W = x.shape
    Cout = pp["g1"].shape[0]
    OD, OH, OW = 2 * D, 2 * H, 2 * W
    M0 = N * D * H * W                 # coarse-grid rows
    Mf = N * OD * OH * OW              # fine-grid elements per channel (BN count)

    # ---- Stage 1: trunk + shortcut ConvTranspose3d, fused, phase-expanded ----
    xl = jnp.transpose(x, (0, 2, 3, 4, 1)).astype(jnp.bfloat16)       # NDHWC, bf16
    xpad = jnp.pad(xl, ((0, 0), (1, 1), (1, 1), (1, 1), (0, 0)))
    # y1: [N, D, H*W, 16*Cout]  columns = (phase rd,rh,rw) x (trunk|shortcut) x Cout
    y1, s1, q1 = conv3x3x3_fused(xpad, pp["wbig"], pp["bbig"])

    # BN statistics for BN1 (trunk) and BN_s (shortcut): pool over rows + phases
    s1 = jnp.sum(s1, axis=(0, 1, 2)).reshape(8, 2, Cout).sum(0)       # [2, Cout]
    q1 = jnp.sum(q1, axis=(0, 1, 2)).reshape(8, 2, Cout).sum(0)
    mean1, inv1 = _finalize_bn(s1, q1, Mf)
    gam = jnp.stack([pp["g1"], pp["gs"]], 0)
    bet = jnp.stack([pp["be1"], pp["bes"]], 0)
    sc = gam * inv1
    sh = bet - mean1 * sc
    sc_all = jnp.broadcast_to(sc, (8, 2, Cout)).reshape(1, 16 * Cout)
    sh_all = jnp.broadcast_to(sh, (8, 2, Cout)).reshape(1, 16 * Cout)

    # ---- Stage 2: BN apply for both branches in one lane-dense pass ----
    z_all = scale_shift(y1.reshape(M0, 16 * Cout), sc_all, sh_all)

    # phase-grouped -> fine NDHWC grid (layout plumbing in JAX)
    z9 = z_all.reshape(N, D, H, W, 2, 2, 2, 2, Cout)

    def to_fine(t):  # t: (N, D, H, W, rd, rh, rw, C)
        return jnp.transpose(t, (0, 1, 4, 2, 5, 3, 6, 7)).reshape(N, OD, OH, OW, Cout)

    z1_fine = to_fine(z9[..., 0, :])       # trunk, feeds Conv3d
    res_fine = to_fine(z9[..., 1, :])      # shortcut residual

    # ---- Stage 3: Conv3d(3, padding=1), direct halo'd kernel (no im2col) ----
    zp = jnp.pad(z1_fine.astype(jnp.bfloat16),
                 ((0, 0), (1, 1), (1, 1), (1, 1), (0, 0)))
    y2, s2, q2 = conv3x3x3_fused(zp, pp["w2m"], pp["b2m"])            # [N, OD, OH*OW, Cout]
    mean2, inv2 = _finalize_bn(jnp.sum(s2, axis=(0, 1, 2)),
                               jnp.sum(q2, axis=(0, 1, 2)), Mf)
    sc2 = pp["g2"] * inv2
    sh2 = pp["be2"] - mean2 * sc2

    # ---- Stage 4: BN2 apply + residual add (lane-dense: OH*OW*Cout lanes) ----
    L = OH * OW * Cout
    sc2v = jnp.tile(sc2, OH * OW).reshape(1, L)
    sh2v = jnp.tile(sh2, OH * OW).reshape(1, L)
    out2d = scale_shift(y2.reshape(N * OD, L), sc2v, sh2v,
                        add=res_fine.reshape(N * OD, L))

    out = out2d.reshape(N, OD, OH, OW, Cout)
    return jnp.transpose(out, (0, 4, 1, 2, 3))                        # back to NCDHW


# TODO(synk): BatchNorm running_mean/running_var momentum buffer updates are not
# modeled (they do not affect this training-mode forward output).
def init_params(key, Cin, Cout):
    ks = jax.random.split(key, 6)

    def u(k, shape, fan_in):
        bound = 1.0 / math.sqrt(fan_in)
        return jax.random.uniform(k, shape, jnp.float32, -bound, bound)

    return dict(
        # conv_relu_norm
        wT1=u(ks[0], (Cin, Cout, 4, 4, 4), Cout * 64),
        bT1=u(ks[1], (Cout,), Cout * 64),
        g1=jnp.ones((Cout,), jnp.float32),
        be1=jnp.zeros((Cout,), jnp.float32),
        w2=u(ks[2], (Cout, Cout, 3, 3, 3), Cout * 27),
        b2=u(ks[3], (Cout,), Cout * 27),
        g2=jnp.ones((Cout,), jnp.float32),
        be2=jnp.zeros((Cout,), jnp.float32),
        # shortcut
        wTs=u(ks[4], (Cin, Cout, 4, 4, 4), Cout * 64),
        bTs=u(ks[5], (Cout,), Cout * 64),
        gs=jnp.ones((Cout,), jnp.float32),
        bes=jnp.zeros((Cout,), jnp.float32),
    )


if __name__ == "__main__":
    key = jax.random.PRNGKey(0)
    k_x, k_p = jax.random.split(key)

    N, Cin, Cout, D, H, W = 2, 4, 8, 4, 4, 4        # output 8x8x8, 16*Cout = 128 lanes
    x = jax.random.normal(k_x, (N, Cin, D, H, W), jnp.float32)
    params = prepare_params(init_params(k_p, Cin, Cout))

    fwd = jax.jit(resblock_up)
    out = fwd(x, params)
    jax.block_until_ready(out)
    assert out.shape == (N, Cout, 2 * D, 2 * H, 2 * W)
    assert bool(jnp.all(jnp.isfinite(out)))
    print("KERNEL_OK")
</pallas_src>

<mosaic_0001>
module attributes {stable_mosaic.version = 11 : i64} {
  func.func @kernel(%arg0: i32, %arg1: i32, %arg2: memref<1x1x6x6x4xbf16, #tpu.memory_space<vmem>>, %arg3: memref<1x1x6x6x4xbf16, #tpu.memory_space<vmem>>, %arg4: memref<1x1x6x6x4xbf16, #tpu.memory_space<vmem>>, %arg5: memref<27x4x128xbf16, #tpu.memory_space<vmem>>, %arg6: memref<1x128xf32, #tpu.memory_space<vmem>>, %arg7: memref<1x1x16x128xf32, #tpu.memory_space<vmem>>, %arg8: memref<1x1x1x128xf32, #tpu.memory_space<vmem>>, %arg9: memref<1x1x1x128xf32, #tpu.memory_space<vmem>>) attributes {dimension_semantics = [#tpu.dimension_semantics<parallel>, #tpu.dimension_semantics<parallel>], iteration_bounds = array<i64: 2, 4>, scalar_prefetch = 0 : i64, scratch_operands = 0 : i64, tpu.core_type = #tpu.core_type<tc>, window_params = [{transform_indices = @transform_0, window_bounds = array<i64: 1, 1, 6, 6, 4>}, {transform_indices = @transform_1, window_bounds = array<i64: 1, 1, 6, 6, 4>}, {transform_indices = @transform_2, window_bounds = array<i64: 1, 1, 6, 6, 4>}, {pipeline_mode = #tpu.pipeline_mode<synchronous>, transform_indices = @transform_3, window_bounds = array<i64: 27, 4, 128>}, {pipeline_mode = #tpu.pipeline_mode<synchronous>, transform_indices = @transform_4, window_bounds = array<i64: 1, 128>}, {transform_indices = @transform_5, window_bounds = array<i64: 1, 1, 16, 128>}, {transform_indices = @transform_6, window_bounds = array<i64: 1, 1, 1, 128>}, {transform_indices = @transform_7, window_bounds = array<i64: 1, 1, 1, 128>}]} {
    %cst = arith.constant 0.000000e+00 : f32
    %0 = vector.broadcast %cst : f32 to vector<16x128xf32>
    %c0 = arith.constant 0 : index
    %c0_0 = arith.constant 0 : index
    %c0_1 = arith.constant 0 : index
    %c0_2 = arith.constant 0 : index
    %c0_3 = arith.constant 0 : index
    %1 = vector.load %arg2[%c0, %c0_0, %c0_1, %c0_2, %c0_3] : memref<1x1x6x6x4xbf16, #tpu.memory_space<vmem>>, vector<1x1x6x6x4xbf16>
    %2 = vector.shape_cast %1 : vector<1x1x6x6x4xbf16> to vector<6x6x4xbf16>
    %3 = vector.extract_strided_slice %2 {offsets = [0, 0, 0], sizes = [4, 4, 4], strides = [1, 1, 1]} : vector<6x6x4xbf16> to vector<4x4x4xbf16>
    %4 = vector.shape_cast %3 : vector<4x4x4xbf16> to vector<16x4xbf16>
    %c0_4 = arith.constant 0 : index
    %c0_5 = arith.constant 0 : index
    %c0_6 = arith.constant 0 : index
    %5 = vector.load %arg5[%c0_4, %c0_5, %c0_6] : memref<27x4x128xbf16, #tpu.memory_space<vmem>>, vector<1x4x128xbf16>
    %6 = vector.shape_cast %5 : vector<1x4x128xbf16> to vector<4x128xbf16>
    %cst_7 = arith.constant dense<0.000000e+00> : vector<16x128xf32>
    %7 = tpu.matmul %4, %6, %cst_7 {dimension_numbers = #tpu.dot_dimension_numbers<[1], [0], [0], [1], [0, 0, 1, 1], [], []>} : vector<16x4xbf16>, vector<4x128xbf16>, vector<16x128xf32> -> vector<16x128xf32>
    %8 = arith.addf %0, %7 : vector<16x128xf32>
    %9 = vector.extract_strided_slice %2 {offsets = [0, 1, 0], sizes = [4, 4, 4], strides = [1, 1, 1]} : vector<6x6x4xbf16> to vector<4x4x4xbf16>
    %10 = vector.shape_cast %9 : vector<4x4x4xbf16> to vector<16x4xbf16>
    %c1 = arith.constant 1 : index
    %c0_8 = arith.constant 0 : index
    %c0_9 = arith.constant 0 : index
    %11 = vector.load %arg5[%c1, %c0_8, %c0_9] : memref<27x4x128xbf16, #tpu.memory_space<vmem>>, vector<1x4x128xbf16>
    %12 = vector.shape_cast %11 : vector<1x4x128xbf16> to vector<4x128xbf16>
    %cst_10 = arith.constant dense<0.000000e+00> : vector<16x128xf32>
    %13 = tpu.matmul %10, %12, %cst_10 {dimension_numbers = #tpu.dot_dimension_numbers<[1], [0], [0], [1], [0, 0, 1, 1], [], []>} : vector<16x4xbf16>, vector<4x128xbf16>, vector<16x128xf32> -> vector<16x128xf32>
    %14 = arith.addf %8, %13 : vector<16x128xf32>
    %15 = vector.extract_strided_slice %2 {offsets = [0, 2, 0], sizes = [4, 4, 4], strides = [1, 1, 1]} : vector<6x6x4xbf16> to vector<4x4x4xbf16>
    %16 = vector.shape_cast %15 : vector<4x4x4xbf16> to vector<16x4xbf16>
    %c2 = arith.constant 2 : index
    %c0_11 = arith.constant 0 : index
    %c0_12 = arith.constant 0 : index
    %17 = vector.load %arg5[%c2, %c0_11, %c0_12] : memref<27x4x128xbf16, #tpu.memory_space<vmem>>, vector<1x4x128xbf16>
    %18 = vector.shape_cast %17 : vector<1x4x128xbf16> to vector<4x128xbf16>
    %cst_13 = arith.constant dense<0.000000e+00> : vector<16x128xf32>
    %19 = tpu.matmul %16, %18, %cst_13 {dimension_numbers = #tpu.dot_dimension_numbers<[1], [0], [0], [1], [0, 0, 1, 1], [], []>} : vector<16x4xbf16>, vector<4x128xbf16>, vector<16x128xf32> -> vector<16x128xf32>
    %20 = arith.addf %14, %19 : vector<16x128xf32>
    %21 = vector.extract_strided_slice %2 {offsets = [1, 0, 0], sizes = [4, 4, 4], strides = [1, 1, 1]} : vector<6x6x4xbf16> to vector<4x4x4xbf16>
    %22 = vector.shape_cast %21 : vector<4x4x4xbf16> to vector<16x4xbf16>
    %c3 = arith.constant 3 : index
    %c0_14 = arith.constant 0 : index
    %c0_15 = arith.constant 0 : index
    %23 = vector.load %arg5[%c3, %c0_14, %c0_15] : memref<27x4x128xbf16, #tpu.memory_space<vmem>>, vector<1x4x128xbf16>
    %24 = vector.shape_cast %23 : vector<1x4x128xbf16> to vector<4x128xbf16>
    %cst_16 = arith.constant dense<0.000000e+00> : vector<16x128xf32>
    %25 = tpu.matmul %22, %24, %cst_16 {dimension_numbers = #tpu.dot_dimension_numbers<[1], [0], [0], [1], [0, 0, 1, 1], [], []>} : vector<16x4xbf16>, vector<4x128xbf16>, vector<16x128xf32> -> vector<16x128xf32>
    %26 = arith.addf %20, %25 : vector<16x128xf32>
    %27 = vector.extract_strided_slice %2 {offsets = [1, 1, 0], sizes = [4, 4, 4], strides = [1, 1, 1]} : vector<6x6x4xbf16> to vector<4x4x4xbf16>
    %28 = vector.shape_cast %27 : vector<4x4x4xbf16> to vector<16x4xbf16>
    %c4 = arith.constant 4 : index
    %c0_17 = arith.constant 0 : index
    %c0_18 = arith.constant 0 : index
    %29 = vector.load %arg5[%c4, %c0_17, %c0_18] : memref<27x4x128xbf16, #tpu.memory_space<vmem>>, vector<1x4x128xbf16>
    %30 = vector.shape_cast %29 : vector<1x4x128xbf16> to vector<4x128xbf16>
    %cst_19 = arith.constant dense<0.000000e+00> : vector<16x128xf32>
    %31 = tpu.matmul %28, %30, %cst_19 {dimension_numbers = #tpu.dot_dimension_numbers<[1], [0], [0], [1], [0, 0, 1, 1], [], []>} : vector<16x4xbf16>, vector<4x128xbf16>, vector<16x128xf32> -> vector<16x128xf32>
    %32 = arith.addf %26, %31 : vector<16x128xf32>
    %33 = vector.extract_strided_slice %2 {offsets = [1, 2, 0], sizes = [4, 4, 4], strides = [1, 1, 1]} : vector<6x6x4xbf16> to vector<4x4x4xbf16>
    %34 = vector.shape_cast %33 : vector<4x4x4xbf16> to vector<16x4xbf16>
    %c5 = arith.constant 5 : index
    %c0_20 = arith.constant 0 : index
    %c0_21 = arith.constant 0 : index
    %35 = vector.load %arg5[%c5, %c0_20, %c0_21] : memref<27x4x128xbf16, #tpu.memory_space<vmem>>, vector<1x4x128xbf16>
    %36 = vector.shape_cast %35 : vector<1x4x128xbf16> to vector<4x128xbf16>
    %cst_22 = arith.constant dense<0.000000e+00> : vector<16x128xf32>
    %37 = tpu.matmul %34, %36, %cst_22 {dimension_numbers = #tpu.dot_dimension_numbers<[1], [0], [0], [1], [0, 0, 1, 1], [], []>} : vector<16x4xbf16>, vector<4x128xbf16>, vector<16x128xf32> -> vector<16x128xf32>
    %38 = arith.addf %32, %37 : vector<16x128xf32>
    %39 = vector.extract_strided_slice %2 {offsets = [2, 0, 0], sizes = [4, 4, 4], strides = [1, 1, 1]} : vector<6x6x4xbf16> to vector<4x4x4xbf16>
    %40 = vector.shape_cast %39 : vector<4x4x4xbf16> to vector<16x4xbf16>
    %c6 = arith.constant 6 : index
    %c0_23 = arith.constant 0 : index
    %c0_24 = arith.constant 0 : index
    %41 = vector.load %arg5[%c6, %c0_23, %c0_24] : memref<27x4x128xbf16, #tpu.memory_space<vmem>>, vector<1x4x128xbf16>
    %42 = vector.shape_cast %41 : vector<1x4x128xbf16> to vector<4x128xbf16>
    %cst_25 = arith.constant dense<0.000000e+00> : vector<16x128xf32>
    %43 = tpu.matmul %40, %42, %cst_25 {dimension_numbers = #tpu.dot_dimension_numbers<[1], [0], [0], [1], [0, 0, 1, 1], [], []>} : vector<16x4xbf16>, vector<4x128xbf16>, vector<16x128xf32> -> vector<16x128xf32>
    %44 = arith.addf %38, %43 : vector<16x128xf32>
    %45 = vector.extract_strided_slice %2 {offsets = [2, 1, 0], sizes = [4, 4, 4], strides = [1, 1, 1]} : vector<6x6x4xbf16> to vector<4x4x4xbf16>
    %46 = vector.shape_cast %45 : vector<4x4x4xbf16> to vector<16x4xbf16>
    %c7 = arith.constant 7 : index
    %c0_26 = arith.constant 0 : index
    %c0_27 = arith.constant 0 : index
    %47 = vector.load %arg5[%c7, %c0_26, %c0_27] : memref<27x4x128xbf16, #tpu.memory_space<vmem>>, vector<1x4x128xbf16>
    %48 = vector.shape_cast %47 : vector<1x4x128xbf16> to vector<4x128xbf16>
    %cst_28 = arith.constant dense<0.000000e+00> : vector<16x128xf32>
    %49 = tpu.matmul %46, %48, %cst_28 {dimension_numbers = #tpu.dot_dimension_numbers<[1], [0], [0], [1], [0, 0, 1, 1], [], []>} : vector<16x4xbf16>, vector<4x128xbf16>, vector<16x128xf32> -> vector<16x128xf32>
    %50 = arith.addf %44, %49 : vector<16x128xf32>
    %51 = vector.extract_strided_slice %2 {offsets = [2, 2, 0], sizes = [4, 4, 4], strides = [1, 1, 1]} : vector<6x6x4xbf16> to vector<4x4x4xbf16>
    %52 = vector.shape_cast %51 : vector<4x4x4xbf16> to vector<16x4xbf16>
    %c8 = arith.constant 8 : index
    %c0_29 = arith.constant 0 : index
    %c0_30 = arith.constant 0 : index
    %53 = vector.load %arg5[%c8, %c0_29, %c0_30] : memref<27x4x128xbf16, #tpu.memory_space<vmem>>, vector<1x4x128xbf16>
    %54 = vector.shape_cast %53 : vector<1x4x128xbf16> to vector<4x128xbf16>
    %cst_31 = arith.constant dense<0.000000e+00> : vector<16x128xf32>
    %55 = tpu.matmul %52, %54, %cst_31 {dimension_numbers = #tpu.dot_dimension_numbers<[1], [0], [0], [1], [0, 0, 1, 1], [], []>} : vector<16x4xbf16>, vector<4x128xbf16>, vector<16x128xf32> -> vector<16x128xf32>
    %56 = arith.addf %50, %55 : vector<16x128xf32>
    %c0_32 = arith.constant 0 : index
    %c0_33 = arith.constant 0 : index
    %c0_34 = arith.constant 0 : index
    %c0_35 = arith.constant 0 : index
    %c0_36 = arith.constant 0 : index
    %57 = vector.load %arg3[%c0_32, %c0_33, %c0_34, %c0_35, %c0_36] : memref<1x1x6x6x4xbf16, #tpu.memory_space<vmem>>, vector<1x1x6x6x4xbf16>
    %58 = vector.shape_cast %57 : vector<1x1x6x6x4xbf16> to vector<6x6x4xbf16>
    %59 = vector.extract_strided_slice %58 {offsets = [0, 0, 0], sizes = [4, 4, 4], strides = [1, 1, 1]} : vector<6x6x4xbf16> to vector<4x4x4xbf16>
    %60 = vector.shape_cast %59 : vector<4x4x4xbf16> to vector<16x4xbf16>
    %c9 = arith.constant 9 : index
    %c0_37 = arith.constant 0 : index
    %c0_38 = arith.constant 0 : index
    %61 = vector.load %arg5[%c9, %c0_37, %c0_38] : memref<27x4x128xbf16, #tpu.memory_space<vmem>>, vector<1x4x128xbf16>
    %62 = vector.shape_cast %61 : vector<1x4x128xbf16> to vector<4x128xbf16>
    %cst_39 = arith.constant dense<0.000000e+00> : vector<16x128xf32>
    %63 = tpu.matmul %60, %62, %cst_39 {dimension_numbers = #tpu.dot_dimension_numbers<[1], [0], [0], [1], [0, 0, 1, 1], [], []>} : vector<16x4xbf16>, vector<4x128xbf16>, vector<16x128xf32> -> vector<16x128xf32>
    %64 = arith.addf %56, %63 : vector<16x128xf32>
    %65 = vector.extract_strided_slice %58 {offsets = [0, 1, 0], sizes = [4, 4, 4], strides = [1, 1, 1]} : vector<6x6x4xbf16> to vector<4x4x4xbf16>
    %66 = vector.shape_cast %65 : vector<4x4x4xbf16> to vector<16x4xbf16>
    %c10 = arith.constant 10 : index
    %c0_40 = arith.constant 0 : index
    %c0_41 = arith.constant 0 : index
    %67 = vector.load %arg5[%c10, %c0_40, %c0_41] : memref<27x4x128xbf16, #tpu.memory_space<vmem>>, vector<1x4x128xbf16>
    %68 = vector.shape_cast %67 : vector<1x4x128xbf16> to vector<4x128xbf16>
    %cst_42 = arith.constant dense<0.000000e+00> : vector<16x128xf32>
    %69 = tpu.matmul %66, %68, %cst_42 {dimension_numbers = #tpu.dot_dimension_numbers<[1], [0], [0], [1], [0, 0, 1, 1], [], []>} : vector<16x4xbf16>, vector<4x128xbf16>, vector<16x128xf32> -> vector<16x128xf32>
    %70 = arith.addf %64, %69 : vector<16x128xf32>
    %71 = vector.extract_strided_slice %58 {offsets = [0, 2, 0], sizes = [4, 4, 4], strides = [1, 1, 1]} : vector<6x6x4xbf16> to vector<4x4x4xbf16>
    %72 = vector.shape_cast %71 : vector<4x4x4xbf16> to vector<16x4xbf16>
    %c11 = arith.constant 11 : index
    %c0_43 = arith.constant 0 : index
    %c0_44 = arith.constant 0 : index
    %73 = vector.load %arg5[%c11, %c0_43, %c0_44] : memref<27x4x128xbf16, #tpu.memory_space<vmem>>, vector<1x4x128xbf16>
    %74 = vector.shape_cast %73 : vector<1x4x128xbf16> to vector<4x128xbf16>
    %cst_45 = arith.constant dense<0.000000e+00> : vector<16x128xf32>
    %75 = tpu.matmul %72, %74, %cst_45 {dimension_numbers = #tpu.dot_dimension_numbers<[1], [0], [0], [1], [0, 0, 1, 1], [], []>} : vector<16x4xbf16>, vector<4x128xbf16>, vector<16x128xf32> -> vector<16x128xf32>
    %76 = arith.addf %70, %75 : vector<16x128xf32>
    %77 = vector.extract_strided_slice %58 {offsets = [1, 0, 0], sizes = [4, 4, 4], strides = [1, 1, 1]} : vector<6x6x4xbf16> to vector<4x4x4xbf16>
    %78 = vector.shape_cast %77 : vector<4x4x4xbf16> to vector<16x4xbf16>
    %c12 = arith.constant 12 : index
    %c0_46 = arith.constant 0 : index
    %c0_47 = arith.constant 0 : index
    %79 = vector.load %arg5[%c12, %c0_46, %c0_47] : memref<27x4x128xbf16, #tpu.memory_space<vmem>>, vector<1x4x128xbf16>
    %80 = vector.shape_cast %79 : vector<1x4x128xbf16> to vector<4x128xbf16>
    %cst_48 = arith.constant dense<0.000000e+00> : vector<16x128xf32>
    %81 = tpu.matmul %78, %80, %cst_48 {dimension_numbers = #tpu.dot_dimension_numbers<[1], [0], [0], [1], [0, 0, 1, 1], [], []>} : vector<16x4xbf16>, vector<4x128xbf16>, vector<16x128xf32> -> vector<16x128xf32>
    %82 = arith.addf %76, %81 : vector<16x128xf32>
    %83 = vector.extract_strided_slice %58 {offsets = [1, 1, 0], sizes = [4, 4, 4], strides = [1, 1, 1]} : vector<6x6x4xbf16> to vector<4x4x4xbf16>
    %84 = vector.shape_cast %83 : vector<4x4x4xbf16> to vector<16x4xbf16>
    %c13 = arith.constant 13 : index
    %c0_49 = arith.constant 0 : index
    %c0_50 = arith.constant 0 : index
    %85 = vector.load %arg5[%c13, %c0_49, %c0_50] : memref<27x4x128xbf16, #tpu.memory_space<vmem>>, vector<1x4x128xbf16>
    %86 = vector.shape_cast %85 : vector<1x4x128xbf16> to vector<4x128xbf16>
    %cst_51 = arith.constant dense<0.000000e+00> : vector<16x128xf32>
    %87 = tpu.matmul %84, %86, %cst_51 {dimension_numbers = #tpu.dot_dimension_numbers<[1], [0], [0], [1], [0, 0, 1, 1], [], []>} : vector<16x4xbf16>, vector<4x128xbf16>, vector<16x128xf32> -> vector<16x128xf32>
    %88 = arith.addf %82, %87 : vector<16x128xf32>
    %89 = vector.extract_strided_slice %58 {offsets = [1, 2, 0], sizes = [4, 4, 4], strides = [1, 1, 1]} : vector<6x6x4xbf16> to vector<4x4x4xbf16>
    %90 = vector.shape_cast %89 : vector<4x4x4xbf16> to vector<16x4xbf16>
    %c14 = arith.constant 14 : index
    %c0_52 = arith.constant 0 : index
    %c0_53 = arith.constant 0 : index
    %91 = vector.load %arg5[%c14, %c0_52, %c0_53] : memref<27x4x128xbf16, #tpu.memory_space<vmem>>, vector<1x4x128xbf16>
    %92 = vector.shape_cast %91 : vector<1x4x128xbf16> to vector<4x128xbf16>
    %cst_54 = arith.constant dense<0.000000e+00> : vector<16x128xf32>
    %93 = tpu.matmul %90, %92, %cst_54 {dimension_numbers = #tpu.dot_dimension_numbers<[1], [0], [0], [1], [0, 0, 1, 1], [], []>} : vector<16x4xbf16>, vector<4x128xbf16>, vector<16x128xf32> -> vector<16x128xf32>
    %94 = arith.addf %88, %93 : vector<16x128xf32>
    %95 = vector.extract_strided_slice %58 {offsets = [2, 0, 0], sizes = [4, 4, 4], strides = [1, 1, 1]} : vector<6x6x4xbf16> to vector<4x4x4xbf16>
    %96 = vector.shape_cast %95 : vector<4x4x4xbf16> to vector<16x4xbf16>
    %c15 = arith.constant 15 : index
    %c0_55 = arith.constant 0 : index
    %c0_56 = arith.constant 0 : index
    %97 = vector.load %arg5[%c15, %c0_55, %c0_56] : memref<27x4x128xbf16, #tpu.memory_space<vmem>>, vector<1x4x128xbf16>
    %98 = vector.shape_cast %97 : vector<1x4x128xbf16> to vector<4x128xbf16>
    %cst_57 = arith.constant dense<0.000000e+00> : vector<16x128xf32>
    %99 = tpu.matmul %96, %98, %cst_57 {dimension_numbers = #tpu.dot_dimension_numbers<[1], [0], [0], [1], [0, 0, 1, 1], [], []>} : vector<16x4xbf16>, vector<4x128xbf16>, vector<16x128xf32> -> vector<16x128xf32>
    %100 = arith.addf %94, %99 : vector<16x128xf32>
    %101 = vector.extract_strided_slice %58 {offsets = [2, 1, 0], sizes = [4, 4, 4], strides = [1, 1, 1]} : vector<6x6x4xbf16> to vector<4x4x4xbf16>
    %102 = vector.shape_cast %101 : vector<4x4x4xbf16> to vector<16x4xbf16>
    %c16 = arith.constant 16 : index
    %c0_58 = arith.constant 0 : index
    %c0_59 = arith.constant 0 : index
    %103 = vector.load %arg5[%c16, %c0_58, %c0_59] : memref<27x4x128xbf16, #tpu.memory_space<vmem>>, vector<1x4x128xbf16>
    %104 = vector.shape_cast %103 : vector<1x4x128xbf16> to vector<4x128xbf16>
    %cst_60 = arith.constant dense<0.000000e+00> : vector<16x128xf32>
    %105 = tpu.matmul %102, %104, %cst_60 {dimension_numbers = #tpu.dot_dimension_numbers<[1], [0], [0], [1], [0, 0, 1, 1], [], []>} : vector<16x4xbf16>, vector<4x128xbf16>, vector<16x128xf32> -> vector<16x128xf32>
    %106 = arith.addf %100, %105 : vector<16x128xf32>
    %107 = vector.extract_strided_slice %58 {offsets = [2, 2, 0], sizes = [4, 4, 4], strides = [1, 1, 1]} : vector<6x6x4xbf16> to vector<4x4x4xbf16>
    %108 = vector.shape_cast %107 : vector<4x4x4xbf16> to vector<16x4xbf16>
    %c17 = arith.constant 17 : index
    %c0_61 = arith.constant 0 : index
    %c0_62 = arith.constant 0 : index
    %109 = vector.load %arg5[%c17, %c0_61, %c0_62] : memref<27x4x128xbf16, #tpu.memory_space<vmem>>, vector<1x4x128xbf16>
    %110 = vector.shape_cast %109 : vector<1x4x128xbf16> to vector<4x128xbf16>
    %cst_63 = arith.constant dense<0.000000e+00> : vector<16x128xf32>
    %111 = tpu.matmul %108, %110, %cst_63 {dimension_numbers = #tpu.dot_dimension_numbers<[1], [0], [0], [1], [0, 0, 1, 1], [], []>} : vector<16x4xbf16>, vector<4x128xbf16>, vector<16x128xf32> -> vector<16x128xf32>
    %112 = arith.addf %106, %111 : vector<16x128xf32>
    %c0_64 = arith.constant 0 : index
    %c0_65 = arith.constant 0 : index
    %c0_66 = arith.constant 0 : index
    %c0_67 = arith.constant 0 : index
    %c0_68 = arith.constant 0 : index
    %113 = vector.load %arg4[%c0_64, %c0_65, %c0_66, %c0_67, %c0_68] : memref<1x1x6x6x4xbf16, #tpu.memory_space<vmem>>, vector<1x1x6x6x4xbf16>
    %114 = vector.shape_cast %113 : vector<1x1x6x6x4xbf16> to vector<6x6x4xbf16>
    %115 = vector.extract_strided_slice %114 {offsets = [0, 0, 0], sizes = [4, 4, 4], strides = [1, 1, 1]} : vector<6x6x4xbf16> to vector<4x4x4xbf16>
    %116 = vector.shape_cast %115 : vector<4x4x4xbf16> to vector<16x4xbf16>
    %c18 = arith.constant 18 : index
    %c0_69 = arith.constant 0 : index
    %c0_70 = arith.constant 0 : index
    %117 = vector.load %arg5[%c18, %c0_69, %c0_70] : memref<27x4x128xbf16, #tpu.memory_space<vmem>>, vector<1x4x128xbf16>
    %118 = vector.shape_cast %117 : vector<1x4x128xbf16> to vector<4x128xbf16>
    %cst_71 = arith.constant dense<0.000000e+00> : vector<16x128xf32>
    %119 = tpu.matmul %116, %118, %cst_71 {dimension_numbers = #tpu.dot_dimension_numbers<[1], [0], [0], [1], [0, 0, 1, 1], [], []>} : vector<16x4xbf16>, vector<4x128xbf16>, vector<16x128xf32> -> vector<16x128xf32>
    %120 = arith.addf %112, %119 : vector<16x128xf32>
    %121 = vector.extract_strided_slice %114 {offsets = [0, 1, 0], sizes = [4, 4, 4], strides = [1, 1, 1]} : vector<6x6x4xbf16> to vector<4x4x4xbf16>
    %122 = vector.shape_cast %121 : vector<4x4x4xbf16> to vector<16x4xbf16>
    %c19 = arith.constant 19 : index
    %c0_72 = arith.constant 0 : index
    %c0_73 = arith.constant 0 : index
    %123 = vector.load %arg5[%c19, %c0_72, %c0_73] : memref<27x4x128xbf16, #tpu.memory_space<vmem>>, vector<1x4x128xbf16>
    %124 = vector.shape_cast %123 : vector<1x4x128xbf16> to vector<4x128xbf16>
    %cst_74 = arith.constant dense<0.000000e+00> : vector<16x128xf32>
    %125 = tpu.matmul %122, %124, %cst_74 {dimension_numbers = #tpu.dot_dimension_numbers<[1], [0], [0], [1], [0, 0, 1, 1], [], []>} : vector<16x4xbf16>, vector<4x128xbf16>, vector<16x128xf32> -> vector<16x128xf32>
    %126 = arith.addf %120, %125 : vector<16x128xf32>
    %127 = vector.extract_strided_slice %114 {offsets = [0, 2, 0], sizes = [4, 4, 4], strides = [1, 1, 1]} : vector<6x6x4xbf16> to vector<4x4x4xbf16>
    %128 = vector.shape_cast %127 : vector<4x4x4xbf16> to vector<16x4xbf16>
    %c20 = arith.constant 20 : index
    %c0_75 = arith.constant 0 : index
    %c0_76 = arith.constant 0 : index
    %129 = vector.load %arg5[%c20, %c0_75, %c0_76] : memref<27x4x128xbf16, #tpu.memory_space<vmem>>, vector<1x4x128xbf16>
    %130 = vector.shape_cast %129 : vector<1x4x128xbf16> to vector<4x128xbf16>
    %cst_77 = arith.constant dense<0.000000e+00> : vector<16x128xf32>
    %131 = tpu.matmul %128, %130, %cst_77 {dimension_numbers = #tpu.dot_dimension_numbers<[1], [0], [0], [1], [0, 0, 1, 1], [], []>} : vector<16x4xbf16>, vector<4x128xbf16>, vector<16x128xf32> -> vector<16x128xf32>
    %132 = arith.addf %126, %131 : vector<16x128xf32>
    %133 = vector.extract_strided_slice %114 {offsets = [1, 0, 0], sizes = [4, 4, 4], strides = [1, 1, 1]} : vector<6x6x4xbf16> to vector<4x4x4xbf16>
    %134 = vector.shape_cast %133 : vector<4x4x4xbf16> to vector<16x4xbf16>
    %c21 = arith.constant 21 : index
    %c0_78 = arith.constant 0 : index
    %c0_79 = arith.constant 0 : index
    %135 = vector.load %arg5[%c21, %c0_78, %c0_79] : memref<27x4x128xbf16, #tpu.memory_space<vmem>>, vector<1x4x128xbf16>
    %136 = vector.shape_cast %135 : vector<1x4x128xbf16> to vector<4x128xbf16>
    %cst_80 = arith.constant dense<0.000000e+00> : vector<16x128xf32>
    %137 = tpu.matmul %134, %136, %cst_80 {dimension_numbers = #tpu.dot_dimension_numbers<[1], [0], [0], [1], [0, 0, 1, 1], [], []>} : vector<16x4xbf16>, vector<4x128xbf16>, vector<16x128xf32> -> vector<16x128xf32>
    %138 = arith.addf %132, %137 : vector<16x128xf32>
    %139 = vector.extract_strided_slice %114 {offsets = [1, 1, 0], sizes = [4, 4, 4], strides = [1, 1, 1]} : vector<6x6x4xbf16> to vector<4x4x4xbf16>
    %140 = vector.shape_cast %139 : vector<4x4x4xbf16> to vector<16x4xbf16>
    %c22 = arith.constant 22 : index
    %c0_81 = arith.constant 0 : index
    %c0_82 = arith.constant 0 : index
    %141 = vector.load %arg5[%c22, %c0_81, %c0_82] : memref<27x4x128xbf16, #tpu.memory_space<vmem>>, vector<1x4x128xbf16>
    %142 = vector.shape_cast %141 : vector<1x4x128xbf16> to vector<4x128xbf16>
    %cst_83 = arith.constant dense<0.000000e+00> : vector<16x128xf32>
    %143 = tpu.matmul %140, %142, %cst_83 {dimension_numbers = #tpu.dot_dimension_numbers<[1], [0], [0], [1], [0, 0, 1, 1], [], []>} : vector<16x4xbf16>, vector<4x128xbf16>, vector<16x128xf32> -> vector<16x128xf32>
    %144 = arith.addf %138, %143 : vector<16x128xf32>
    %145 = vector.extract_strided_slice %114 {offsets = [1, 2, 0], sizes = [4, 4, 4], strides = [1, 1, 1]} : vector<6x6x4xbf16> to vector<4x4x4xbf16>
    %146 = vector.shape_cast %145 : vector<4x4x4xbf16> to vector<16x4xbf16>
    %c23 = arith.constant 23 : index
    %c0_84 = arith.constant 0 : index
    %c0_85 = arith.constant 0 : index
    %147 = vector.load %arg5[%c23, %c0_84, %c0_85] : memref<27x4x128xbf16, #tpu.memory_space<vmem>>, vector<1x4x128xbf16>
    %148 = vector.shape_cast %147 : vector<1x4x128xbf16> to vector<4x128xbf16>
    %cst_86 = arith.constant dense<0.000000e+00> : vector<16x128xf32>
    %149 = tpu.matmul %146, %148, %cst_86 {dimension_numbers = #tpu.dot_dimension_numbers<[1], [0], [0], [1], [0, 0, 1, 1], [], []>} : vector<16x4xbf16>, vector<4x128xbf16>, vector<16x128xf32> -> vector<16x128xf32>
    %150 = arith.addf %144, %149 : vector<16x128xf32>
    %151 = vector.extract_strided_slice %114 {offsets = [2, 0, 0], sizes = [4, 4, 4], strides = [1, 1, 1]} : vector<6x6x4xbf16> to vector<4x4x4xbf16>
    %152 = vector.shape_cast %151 : vector<4x4x4xbf16> to vector<16x4xbf16>
    %c24 = arith.constant 24 : index
    %c0_87 = arith.constant 0 : index
    %c0_88 = arith.constant 0 : index
    %153 = vector.load %arg5[%c24, %c0_87, %c0_88] : memref<27x4x128xbf16, #tpu.memory_space<vmem>>, vector<1x4x128xbf16>
    %154 = vector.shape_cast %153 : vector<1x4x128xbf16> to vector<4x128xbf16>
    %cst_89 = arith.constant dense<0.000000e+00> : vector<16x128xf32>
    %155 = tpu.matmul %152, %154, %cst_89 {dimension_numbers = #tpu.dot_dimension_numbers<[1], [0], [0], [1], [0, 0, 1, 1], [], []>} : vector<16x4xbf16>, vector<4x128xbf16>, vector<16x128xf32> -> vector<16x128xf32>
    %156 = arith.addf %150, %155 : vector<16x128xf32>
    %157 = vector.extract_strided_slice %114 {offsets = [2, 1, 0], sizes = [4, 4, 4], strides = [1, 1, 1]} : vector<6x6x4xbf16> to vector<4x4x4xbf16>
    %158 = vector.shape_cast %157 : vector<4x4x4xbf16> to vector<16x4xbf16>
    %c25 = arith.constant 25 : index
    %c0_90 = arith.constant 0 : index
    %c0_91 = arith.constant 0 : index
    %159 = vector.load %arg5[%c25, %c0_90, %c0_91] : memref<27x4x128xbf16, #tpu.memory_space<vmem>>, vector<1x4x128xbf16>
    %160 = vector.shape_cast %159 : vector<1x4x128xbf16> to vector<4x128xbf16>
    %cst_92 = arith.constant dense<0.000000e+00> : vector<16x128xf32>
    %161 = tpu.matmul %158, %160, %cst_92 {dimension_numbers = #tpu.dot_dimension_numbers<[1], [0], [0], [1], [0, 0, 1, 1], [], []>} : vector<16x4xbf16>, vector<4x128xbf16>, vector<16x128xf32> -> vector<16x128xf32>
    %162 = arith.addf %156, %161 : vector<16x128xf32>
    %163 = vector.extract_strided_slice %114 {offsets = [2, 2, 0], sizes = [4, 4, 4], strides = [1, 1, 1]} : vector<6x6x4xbf16> to vector<4x4x4xbf16>
    %164 = vector.shape_cast %163 : vector<4x4x4xbf16> to vector<16x4xbf16>
    %c26 = arith.constant 26 : index
    %c0_93 = arith.constant 0 : index
    %c0_94 = arith.constant 0 : index
    %165 = vector.load %arg5[%c26, %c0_93, %c0_94] : memref<27x4x128xbf16, #tpu.memory_space<vmem>>, vector<1x4x128xbf16>
    %166 = vector.shape_cast %165 : vector<1x4x128xbf16> to vector<4x128xbf16>
    %cst_95 = arith.constant dense<0.000000e+00> : vector<16x128xf32>
    %167 = tpu.matmul %164, %166, %cst_95 {dimension_numbers = #tpu.dot_dimension_numbers<[1], [0], [0], [1], [0, 0, 1, 1], [], []>} : vector<16x4xbf16>, vector<4x128xbf16>, vector<16x128xf32> -> vector<16x128xf32>
    %168 = arith.addf %162, %167 : vector<16x128xf32>
    %c0_96 = arith.constant 0 : index
    %c0_97 = arith.constant 0 : index
    %169 = vector.load %arg6[%c0_96, %c0_97] : memref<1x128xf32, #tpu.memory_space<vmem>>, vector<1x128xf32>
    %170 = vector.broadcast %169 : vector<1x128xf32> to vector<16x128xf32>
    %171 = arith.addf %168, %170 : vector<16x128xf32>
    %cst_98 = arith.constant 0.000000e+00 : f32
    %172 = vector.broadcast %cst_98 : f32 to vector<16x128xf32>
    %173 = arith.cmpf oge, %171, %172 : vector<16x128xf32>
    %cst_99 = arith.constant 2.000000e-01 : f32
    %174 = vector.broadcast %cst_99 : f32 to vector<16x128xf32>
    %175 = arith.mulf %174, %171 : vector<16x128xf32>
    %176 = arith.select %173, %171, %175 : vector<16x128xi1>, vector<16x128xf32>
    %177 = vector.shape_cast %176 : vector<16x128xf32> to vector<1x1x16x128xf32>
    %c0_100 = arith.constant 0 : index
    %c0_101 = arith.constant 0 : index
    %c0_102 = arith.constant 0 : index
    %c0_103 = arith.constant 0 : index
    %178 = vector.load %arg7[%c0_100, %c0_101, %c0_102, %c0_103] : memref<1x1x16x128xf32, #tpu.memory_space<vmem>>, vector<1x1x16x128xf32>
    tpu.vector_store %arg7[%c0_100, %c0_101, %c0_102, %c0_103], %177 {strides = array<i32>} : memref<1x1x16x128xf32, #tpu.memory_space<vmem>>, vector<1x1x16x128xf32>,
    %cst_104 = arith.constant dense<0.000000e+00> : vector<128xf32>
    %179 = vector.multi_reduction <add>, %176, %cst_104 [0] : vector<16x128xf32> to vector<128xf32>
    %180 = vector.shape_cast %179 : vector<128xf32> to vector<1x1x1x128xf32>
    %c0_105 = arith.constant 0 : index
    %c0_106 = arith.constant 0 : index
    %c0_107 = arith.constant 0 : index
    %c0_108 = arith.constant 0 : index
    %181 = vector.load %arg8[%c0_105, %c0_106, %c0_107, %c0_108] : memref<1x1x1x128xf32, #tpu.memory_space<vmem>>, vector<1x1x1x128xf32>
    tpu.vector_store %arg8[%c0_105, %c0_106, %c0_107, %c0_108], %180 {strides = array<i32>} : memref<1x1x1x128xf32, #tpu.memory_space<vmem>>, vector<1x1x1x128xf32>,
    %182 = arith.mulf %176, %176 : vector<16x128xf32>
    %cst_109 = arith.constant dense<0.000000e+00> : vector<128xf32>
    %183 = vector.multi_reduction <add>, %182, %cst_109 [0] : vector<16x128xf32> to vector<128xf32>
    %184 = vector.shape_cast %183 : vector<128xf32> to vector<1x1x1x128xf32>
    %c0_110 = arith.constant 0 : index
    %c0_111 = arith.constant 0 : index
    %c0_112 = arith.constant 0 : index
    %c0_113 = arith.constant 0 : index
    %185 = vector.load %arg9[%c0_110, %c0_111, %c0_112, %c0_113] : memref<1x1x1x128xf32, #tpu.memory_space<vmem>>, vector<1x1x1x128xf32>
    tpu.vector_store %arg9[%c0_110, %c0_111, %c0_112, %c0_113], %184 {strides = array<i32>} : memref<1x1x1x128xf32, #tpu.memory_space<vmem>>, vector<1x1x1x128xf32>,
    return
  }
  func.func @transform_0(%arg0: i32, %arg1: i32) -> (i32, i32, i32, i32, i32) {
    %c0_i32 = arith.constant 0 : i32
    %0 = arith.addi %arg1, %c0_i32 : i32
    %c0_i32_0 = arith.constant 0 : i32
    %c0_i32_1 = arith.constant 0 : i32
    %c0_i32_2 = arith.constant 0 : i32
    %c0_i32_3 = arith.constant 0 : i32
    return %arg0, %0, %c0_i32_0, %c0_i32_1, %c0_i32_2 : i32, i32, i32, i32, i32
  }
  func.func @transform_1(%arg0: i32, %arg1: i32) -> (i32, i32, i32, i32, i32) {
    %c1_i32 = arith.constant 1 : i32
    %0 = arith.addi %arg1, %c1_i32 : i32
    %c0_i32 = arith.constant 0 : i32
    %c0_i32_0 = arith.constant 0 : i32
    %c0_i32_1 = arith.constant 0 : i32
    %c0_i32_2 = arith.constant 0 : i32
    return %arg0, %0, %c0_i32, %c0_i32_0, %c0_i32_1 : i32, i32, i32, i32, i32
  }
  func.func @transform_2(%arg0: i32, %arg1: i32) -> (i32, i32, i32, i32, i32) {
    %c2_i32 = arith.constant 2 : i32
    %0 = arith.addi %arg1, %c2_i32 : i32
    %c0_i32 = arith.constant 0 : i32
    %c0_i32_0 = arith.constant 0 : i32
    %c0_i32_1 = arith.constant 0 : i32
    %c0_i32_2 = arith.constant 0 : i32
    return %arg0, %0, %c0_i32, %c0_i32_0, %c0_i32_1 : i32, i32, i32, i32, i32
  }
  func.func @transform_3(%arg0: i32, %arg1: i32) -> (i32, i32, i32) {
    %c0_i32 = arith.constant 0 : i32
    %c0_i32_0 = arith.constant 0 : i32
    %c0_i32_1 = arith.constant 0 : i32
    %c0_i32_2 = arith.constant 0 : i32
    return %c0_i32, %c0_i32_0, %c0_i32_1 : i32, i32, i32
  }
  func.func @transform_4(%arg0: i32, %arg1: i32) -> (i32, i32) {
    %c0_i32 = arith.constant 0 : i32
    %c0_i32_0 = arith.constant 0 : i32
    %c0_i32_1 = arith.constant 0 : i32
    return %c0_i32, %c0_i32_0 : i32, i32
  }
  func.func @transform_5(%arg0: i32, %arg1: i32) -> (i32, i32, i32, i32) {
    %c0_i32 = arith.constant 0 : i32
    %c0_i32_0 = arith.constant 0 : i32
    %c0_i32_1 = arith.constant 0 : i32
    return %arg0, %arg1, %c0_i32, %c0_i32_0 : i32, i32, i32, i32
  }
  func.func @transform_6(%arg0: i32, %arg1: i32) -> (i32, i32, i32, i32) {
    %c0_i32 = arith.constant 0 : i32
    %c0_i32_0 = arith.constant 0 : i32
    %c0_i32_1 = arith.constant 0 : i32
    return %arg0, %arg1, %c0_i32, %c0_i32_0 : i32, i32, i32, i32
  }
  func.func @transform_7(%arg0: i32, %arg1: i32) -> (i32, i32, i32, i32) {
    %c0_i32 = arith.constant 0 : i32
    %c0_i32_0 = arith.constant 0 : i32
    %c0_i32_1 = arith.constant 0 : i32
    return %arg0, %arg1, %c0_i32, %c0_i32_0 : i32, i32, i32, i32
  }
}

module attributes {stable_mosaic.version = 11 : i64} {
  func.func @_scale_shift_kernel(%arg0: i32, %arg1: memref<128x128xf32, #tpu.memory_space<vmem>>, %arg2: memref<1x128xf32, #tpu.memory_space<vmem>>, %arg3: memref<1x128xf32, #tpu.memory_space<vmem>>, %arg4: memref<128x128xf32, #tpu.memory_space<vmem>>) attributes {dimension_semantics = [#tpu.dimension_semantics<parallel>], iteration_bounds = array<i64: 1>, scalar_prefetch = 0 : i64, scratch_operands = 0 : i64, tpu.core_type = #tpu.core_type<tc>, window_params = [{transform_indices = @transform_0, window_bounds = array<i64: 128, 128>}, {pipeline_mode = #tpu.pipeline_mode<synchronous>, transform_indices = @transform_1, window_bounds = array<i64: 1, 128>}, {pipeline_mode = #tpu.pipeline_mode<synchronous>, transform_indices = @transform_2, window_bounds = array<i64: 1, 128>}, {transform_indices = @transform_3, window_bounds = array<i64: 128, 128>}]} {
    %c0 = arith.constant 0 : index
    %c0_0 = arith.constant 0 : index
    %0 = vector.load %arg1[%c0, %c0_0] : memref<128x128xf32, #tpu.memory_space<vmem>>, vector<128x128xf32>
    %c0_1 = arith.constant 0 : index
    %c0_2 = arith.constant 0 : index
    %1 = vector.load %arg2[%c0_1, %c0_2] : memref<1x128xf32, #tpu.memory_space<vmem>>, vector<1x128xf32>
    %2 = vector.broadcast %1 : vector<1x128xf32> to vector<128x128xf32>
    %3 = arith.mulf %0, %2 : vector<128x128xf32>
    %c0_3 = arith.constant 0 : index
    %c0_4 = arith.constant 0 : index
    %4 = vector.load %arg3[%c0_3, %c0_4] : memref<1x128xf32, #tpu.memory_space<vmem>>, vector<1x128xf32>
    %5 = vector.broadcast %4 : vector<1x128xf32> to vector<128x128xf32>
    %6 = arith.addf %3, %5 : vector<128x128xf32>
    %c0_5 = arith.constant 0 : index
    %c0_6 = arith.constant 0 : index
    %7 = vector.load %arg4[%c0_5, %c0_6] : memref<128x128xf32, #tpu.memory_space<vmem>>, vector<128x128xf32>
    tpu.vector_store %arg4[%c0_5, %c0_6], %6 {strides = array<i32>} : memref<128x128xf32, #tpu.memory_space<vmem>>, vector<128x128xf32>,
    return
  }
  func.func @transform_0(%arg0: i32) -> (i32, i32) {
    %c0_i32 = arith.constant 0 : i32
    %c0_i32_0 = arith.constant 0 : i32
    return %arg0, %c0_i32 : i32, i32
  }
  func.func @transform_1(%arg0: i32) -> (i32, i32) {
    %c0_i32 = arith.constant 0 : i32
    %c0_i32_0 = arith.constant 0 : i32
    %c0_i32_1 = arith.constant 0 : i32
    return %c0_i32, %c0_i32_0 : i32, i32
  }
  func.func @transform_2(%arg0: i32) -> (i32, i32) {
    %c0_i32 = arith.constant 0 : i32
    %c0_i32_0 = arith.constant 0 : i32
    %c0_i32_1 = arith.constant 0 : i32
    return %c0_i32, %c0_i32_0 : i32, i32
  }
  func.func @transform_3(%arg0: i32) -> (i32, i32) {
    %c0_i32 = arith.constant 0 : i32
    %c0_i32_0 = arith.constant 0 : i32
    return %arg0, %c0_i32 : i32, i32
  }
}

module attributes {stable_mosaic.version = 11 : i64} {
  func.func @kernel(%arg0: i32, %arg1: i32, %arg2: memref<1x1x10x10x8xbf16, #tpu.memory_space<vmem>>, %arg3: memref<1x1x10x10x8xbf16, #tpu.memory_space<vmem>>, %arg4: memref<1x1x10x10x8xbf16, #tpu.memory_space<vmem>>, %arg5: memref<27x8x8xbf16, #tpu.memory_space<vmem>>, %arg6: memref<1x8xf32, #tpu.memory_space<vmem>>, %arg7: memref<1x1x64x8xf32, #tpu.memory_space<vmem>>, %arg8: memref<1x1x1x8xf32, #tpu.memory_space<vmem>>, %arg9: memref<1x1x1x8xf32, #tpu.memory_space<vmem>>) attributes {dimension_semantics = [#tpu.dimension_semantics<parallel>, #tpu.dimension_semantics<parallel>], iteration_bounds = array<i64: 2, 8>, scalar_prefetch = 0 : i64, scratch_operands = 0 : i64, tpu.core_type = #tpu.core_type<tc>, window_params = [{transform_indices = @transform_0, window_bounds = array<i64: 1, 1, 10, 10, 8>}, {transform_indices = @transform_1, window_bounds = array<i64: 1, 1, 10, 10, 8>}, {transform_indices = @transform_2, window_bounds = array<i64: 1, 1, 10, 10, 8>}, {pipeline_mode = #tpu.pipeline_mode<synchronous>, transform_indices = @transform_3, window_bounds = array<i64: 27, 8, 8>}, {pipeline_mode = #tpu.pipeline_mode<synchronous>, transform_indices = @transform_4, window_bounds = array<i64: 1, 8>}, {transform_indices = @transform_5, window_bounds = array<i64: 1, 1, 64, 8>}, {transform_indices = @transform_6, window_bounds = array<i64: 1, 1, 1, 8>}, {transform_indices = @transform_7, window_bounds = array<i64: 1, 1, 1, 8>}]} {
    %cst = arith.constant 0.000000e+00 : f32
    %0 = vector.broadcast %cst : f32 to vector<64x8xf32>
    %c0 = arith.constant 0 : index
    %c0_0 = arith.constant 0 : index
    %c0_1 = arith.constant 0 : index
    %c0_2 = arith.constant 0 : index
    %c0_3 = arith.constant 0 : index
    %1 = vector.load %arg2[%c0, %c0_0, %c0_1, %c0_2, %c0_3] : memref<1x1x10x10x8xbf16, #tpu.memory_space<vmem>>, vector<1x1x10x10x8xbf16>
    %2 = vector.shape_cast %1 : vector<1x1x10x10x8xbf16> to vector<10x10x8xbf16>
    %3 = vector.extract_strided_slice %2 {offsets = [0, 0, 0], sizes = [8, 8, 8], strides = [1, 1, 1]} : vector<10x10x8xbf16> to vector<8x8x8xbf16>
    %4 = vector.shape_cast %3 : vector<8x8x8xbf16> to vector<64x8xbf16>
    %c0_4 = arith.constant 0 : index
    %c0_5 = arith.constant 0 : index
    %c0_6 = arith.constant 0 : index
    %5 = vector.load %arg5[%c0_4, %c0_5, %c0_6] : memref<27x8x8xbf16, #tpu.memory_space<vmem>>, vector<1x8x8xbf16>
    %6 = vector.shape_cast %5 : vector<1x8x8xbf16> to vector<8x8xbf16>
    %cst_7 = arith.constant dense<0.000000e+00> : vector<64x8xf32>
    %7 = tpu.matmul %4, %6, %cst_7 {dimension_numbers = #tpu.dot_dimension_numbers<[1], [0], [0], [1], [0, 0, 1, 1], [], []>} : vector<64x8xbf16>, vector<8x8xbf16>, vector<64x8xf32> -> vector<64x8xf32>
    %8 = arith.addf %0, %7 : vector<64x8xf32>
    %9 = vector.extract_strided_slice %2 {offsets = [0, 1, 0], sizes = [8, 8, 8], strides = [1, 1, 1]} : vector<10x10x8xbf16> to vector<8x8x8xbf16>
    %10 = vector.shape_cast %9 : vector<8x8x8xbf16> to vector<64x8xbf16>
    %c1 = arith.constant 1 : index
    %c0_8 = arith.constant 0 : index
    %c0_9 = arith.constant 0 : index
    %11 = vector.load %arg5[%c1, %c0_8, %c0_9] : memref<27x8x8xbf16, #tpu.memory_space<vmem>>, vector<1x8x8xbf16>
    %12 = vector.shape_cast %11 : vector<1x8x8xbf16> to vector<8x8xbf16>
    %cst_10 = arith.constant dense<0.000000e+00> : vector<64x8xf32>
    %13 = tpu.matmul %10, %12, %cst_10 {dimension_numbers = #tpu.dot_dimension_numbers<[1], [0], [0], [1], [0, 0, 1, 1], [], []>} : vector<64x8xbf16>, vector<8x8xbf16>, vector<64x8xf32> -> vector<64x8xf32>
    %14 = arith.addf %8, %13 : vector<64x8xf32>
    %15 = vector.extract_strided_slice %2 {offsets = [0, 2, 0], sizes = [8, 8, 8], strides = [1, 1, 1]} : vector<10x10x8xbf16> to vector<8x8x8xbf16>
    %16 = vector.shape_cast %15 : vector<8x8x8xbf16> to vector<64x8xbf16>
    %c2 = arith.constant 2 : index
    %c0_11 = arith.constant 0 : index
    %c0_12 = arith.constant 0 : index
    %17 = vector.load %arg5[%c2, %c0_11, %c0_12] : memref<27x8x8xbf16, #tpu.memory_space<vmem>>, vector<1x8x8xbf16>
    %18 = vector.shape_cast %17 : vector<1x8x8xbf16> to vector<8x8xbf16>
    %cst_13 = arith.constant dense<0.000000e+00> : vector<64x8xf32>
    %19 = tpu.matmul %16, %18, %cst_13 {dimension_numbers = #tpu.dot_dimension_numbers<[1], [0], [0], [1], [0, 0, 1, 1], [], []>} : vector<64x8xbf16>, vector<8x8xbf16>, vector<64x8xf32> -> vector<64x8xf32>
    %20 = arith.addf %14, %19 : vector<64x8xf32>
    %21 = vector.extract_strided_slice %2 {offsets = [1, 0, 0], sizes = [8, 8, 8], strides = [1, 1, 1]} : vector<10x10x8xbf16> to vector<8x8x8xbf16>
    %22 = vector.shape_cast %21 : vector<8x8x8xbf16> to vector<64x8xbf16>
    %c3 = arith.constant 3 : index
    %c0_14 = arith.constant 0 : index
    %c0_15 = arith.constant 0 : index
    %23 = vector.load %arg5[%c3, %c0_14, %c0_15] : memref<27x8x8xbf16, #tpu.memory_space<vmem>>, vector<1x8x8xbf16>
    %24 = vector.shape_cast %23 : vector<1x8x8xbf16> to vector<8x8xbf16>
    %cst_16 = arith.constant dense<0.000000e+00> : vector<64x8xf32>
    %25 = tpu.matmul %22, %24, %cst_16 {dimension_numbers = #tpu.dot_dimension_numbers<[1], [0], [0], [1], [0, 0, 1, 1], [], []>} : vector<64x8xbf16>, vector<8x8xbf16>, vector<64x8xf32> -> vector<64x8xf32>
    %26 = arith.addf %20, %25 : vector<64x8xf32>
    %27 = vector.extract_strided_slice %2 {offsets = [1, 1, 0], sizes = [8, 8, 8], strides = [1, 1, 1]} : vector<10x10x8xbf16> to vector<8x8x8xbf16>
    %28 = vector.shape_cast %27 : vector<8x8x8xbf16> to vector<64x8xbf16>
    %c4 = arith.constant 4 : index
    %c0_17 = arith.constant 0 : index
    %c0_18 = arith.constant 0 : index
    %29 = vector.load %arg5[%c4, %c0_17, %c0_18] : memref<27x8x8xbf16, #tpu.memory_space<vmem>>, vector<1x8x8xbf16>
    %30 = vector.shape_cast %29 : vector<1x8x8xbf16> to vector<8x8xbf16>
    %cst_19 = arith.constant dense<0.000000e+00> : vector<64x8xf32>
    %31 = tpu.matmul %28, %30, %cst_19 {dimension_numbers = #tpu.dot_dimension_numbers<[1], [0], [0], [1], [0, 0, 1, 1], [], []>} : vector<64x8xbf16>, vector<8x8xbf16>, vector<64x8xf32> -> vector<64x8xf32>
    %32 = arith.addf %26, %31 : vector<64x8xf32>
    %33 = vector.extract_strided_slice %2 {offsets = [1, 2, 0], sizes = [8, 8, 8], strides = [1, 1, 1]} : vector<10x10x8xbf16> to vector<8x8x8xbf16>
    %34 = vector.shape_cast %33 : vector<8x8x8xbf16> to vector<64x8xbf16>
    %c5 = arith.constant 5 : index
    %c0_20 = arith.constant 0 : index
    %c0_21 = arith.constant 0 : index
    %35 = vector.load %arg5[%c5, %c0_20, %c0_21] : memref<27x8x8xbf16, #tpu.memory_space<vmem>>, vector<1x8x8xbf16>
    %36 = vector.shape_cast %35 : vector<1x8x8xbf16> to vector<8x8xbf16>
    %cst_22 = arith.constant dense<0.000000e+00> : vector<64x8xf32>
    %37 = tpu.matmul %34, %36, %cst_22 {dimension_numbers = #tpu.dot_dimension_numbers<[1], [0], [0], [1], [0, 0, 1, 1], [], []>} : vector<64x8xbf16>, vector<8x8xbf16>, vector<64x8xf32> -> vector<64x8xf32>
    %38 = arith.addf %32, %37 : vector<64x8xf32>
    %39 = vector.extract_strided_slice %2 {offsets = [2, 0, 0], sizes = [8, 8, 8], strides = [1, 1, 1]} : vector<10x10x8xbf16> to vector<8x8x8xbf16>
    %40 = vector.shape_cast %39 : vector<8x8x8xbf16> to vector<64x8xbf16>
    %c6 = arith.constant 6 : index
    %c0_23 = arith.constant 0 : index
    %c0_24 = arith.constant 0 : index
    %41 = vector.load %arg5[%c6, %c0_23, %c0_24] : memref<27x8x8xbf16, #tpu.memory_space<vmem>>, vector<1x8x8xbf16>
    %42 = vector.shape_cast %41 : vector<1x8x8xbf16> to vector<8x8xbf16>
    %cst_25 = arith.constant dense<0.000000e+00> : vector<64x8xf32>
    %43 = tpu.matmul %40, %42, %cst_25 {dimension_numbers = #tpu.dot_dimension_numbers<[1], [0], [0], [1], [0, 0, 1, 1], [], []>} : vector<64x8xbf16>, vector<8x8xbf16>, vector<64x8xf32> -> vector<64x8xf32>
    %44 = arith.addf %38, %43 : vector<64x8xf32>
    %45 = vector.extract_strided_slice %2 {offsets = [2, 1, 0], sizes = [8, 8, 8], strides = [1, 1, 1]} : vector<10x10x8xbf16> to vector<8x8x8xbf16>
    %46 = vector.shape_cast %45 : vector<8x8x8xbf16> to vector<64x8xbf16>
    %c7 = arith.constant 7 : index
    %c0_26 = arith.constant 0 : index
    %c0_27 = arith.constant 0 : index
    %47 = vector.load %arg5[%c7, %c0_26, %c0_27] : memref<27x8x8xbf16, #tpu.memory_space<vmem>>, vector<1x8x8xbf16>
    %48 = vector.shape_cast %47 : vector<1x8x8xbf16> to vector<8x8xbf16>
    %cst_28 = arith.constant dense<0.000000e+00> : vector<64x8xf32>
    %49 = tpu.matmul %46, %48, %cst_28 {dimension_numbers = #tpu.dot_dimension_numbers<[1], [0], [0], [1], [0, 0, 1, 1], [], []>} : vector<64x8xbf16>, vector<8x8xbf16>, vector<64x8xf32> -> vector<64x8xf32>
    %50 = arith.addf %44, %49 : vector<64x8xf32>
    %51 = vector.extract_strided_slice %2 {offsets = [2, 2, 0], sizes = [8, 8, 8], strides = [1, 1, 1]} : vector<10x10x8xbf16> to vector<8x8x8xbf16>
    %52 = vector.shape_cast %51 : vector<8x8x8xbf16> to vector<64x8xbf16>
    %c8 = arith.constant 8 : index
    %c0_29 = arith.constant 0 : index
    %c0_30 = arith.constant 0 : index
    %53 = vector.load %arg5[%c8, %c0_29, %c0_30] : memref<27x8x8xbf16, #tpu.memory_space<vmem>>, vector<1x8x8xbf16>
    %54 = vector.shape_cast %53 : vector<1x8x8xbf16> to vector<8x8xbf16>
    %cst_31 = arith.constant dense<0.000000e+00> : vector<64x8xf32>
    %55 = tpu.matmul %52, %54, %cst_31 {dimension_numbers = #tpu.dot_dimension_numbers<[1], [0], [0], [1], [0, 0, 1, 1], [], []>} : vector<64x8xbf16>, vector<8x8xbf16>, vector<64x8xf32> -> vector<64x8xf32>
    %56 = arith.addf %50, %55 : vector<64x8xf32>
    %c0_32 = arith.constant 0 : index
    %c0_33 = arith.constant 0 : index
    %c0_34 = arith.constant 0 : index
    %c0_35 = arith.constant 0 : index
    %c0_36 = arith.constant 0 : index
    %57 = vector.load %arg3[%c0_32, %c0_33, %c0_34, %c0_35, %c0_36] : memref<1x1x10x10x8xbf16, #tpu.memory_space<vmem>>, vector<1x1x10x10x8xbf16>
    %58 = vector.shape_cast %57 : vector<1x1x10x10x8xbf16> to vector<10x10x8xbf16>
    %59 = vector.extract_strided_slice %58 {offsets = [0, 0, 0], sizes = [8, 8, 8], strides = [1, 1, 1]} : vector<10x10x8xbf16> to vector<8x8x8xbf16>
    %60 = vector.shape_cast %59 : vector<8x8x8xbf16> to vector<64x8xbf16>
    %c9 = arith.constant 9 : index
    %c0_37 = arith.constant 0 : index
    %c0_38 = arith.constant 0 : index
    %61 = vector.load %arg5[%c9, %c0_37, %c0_38] : memref<27x8x8xbf16, #tpu.memory_space<vmem>>, vector<1x8x8xbf16>
    %62 = vector.shape_cast %61 : vector<1x8x8xbf16> to vector<8x8xbf16>
    %cst_39 = arith.constant dense<0.000000e+00> : vector<64x8xf32>
    %63 = tpu.matmul %60, %62, %cst_39 {dimension_numbers = #tpu.dot_dimension_numbers<[1], [0], [0], [1], [0, 0, 1, 1], [], []>} : vector<64x8xbf16>, vector<8x8xbf16>, vector<64x8xf32> -> vector<64x8xf32>
    %64 = arith.addf %56, %63 : vector<64x8xf32>
    %65 = vector.extract_strided_slice %58 {offsets = [0, 1, 0], sizes = [8, 8, 8], strides = [1, 1, 1]} : vector<10x10x8xbf16> to vector<8x8x8xbf16>
    %66 = vector.shape_cast %65 : vector<8x8x8xbf16> to vector<64x8xbf16>
    %c10 = arith.constant 10 : index
    %c0_40 = arith.constant 0 : index
    %c0_41 = arith.constant 0 : index
    %67 = vector.load %arg5[%c10, %c0_40, %c0_41] : memref<27x8x8xbf16, #tpu.memory_space<vmem>>, vector<1x8x8xbf16>
    %68 = vector.shape_cast %67 : vector<1x8x8xbf16> to vector<8x8xbf16>
    %cst_42 = arith.constant dense<0.000000e+00> : vector<64x8xf32>
    %69 = tpu.matmul %66, %68, %cst_42 {dimension_numbers = #tpu.dot_dimension_numbers<[1], [0], [0], [1], [0, 0, 1, 1], [], []>} : vector<64x8xbf16>, vector<8x8xbf16>, vector<64x8xf32> -> vector<64x8xf32>
    %70 = arith.addf %64, %69 : vector<64x8xf32>
    %71 = vector.extract_strided_slice %58 {offsets = [0, 2, 0], sizes = [8, 8, 8], strides = [1, 1, 1]} : vector<10x10x8xbf16> to vector<8x8x8xbf16>
    %72 = vector.shape_cast %71 : vector<8x8x8xbf16> to vector<64x8xbf16>
    %c11 = arith.constant 11 : index
    %c0_43 = arith.constant 0 : index
    %c0_44 = arith.constant 0 : index
    %73 = vector.load %arg5[%c11, %c0_43, %c0_44] : memref<27x8x8xbf16, #tpu.memory_space<vmem>>, vector<1x8x8xbf16>
    %74 = vector.shape_cast %73 : vector<1x8x8xbf16> to vector<8x8xbf16>
    %cst_45 = arith.constant dense<0.000000e+00> : vector<64x8xf32>
    %75 = tpu.matmul %72, %74, %cst_45 {dimension_numbers = #tpu.dot_dimension_numbers<[1], [0], [0], [1], [0, 0, 1, 1], [], []>} : vector<64x8xbf16>, vector<8x8xbf16>, vector<64x8xf32> -> vector<64x8xf32>
    %76 = arith.addf %70, %75 : vector<64x8xf32>
    %77 = vector.extract_strided_slice %58 {offsets = [1, 0, 0], sizes = [8, 8, 8], strides = [1, 1, 1]} : vector<10x10x8xbf16> to vector<8x8x8xbf16>
    %78 = vector.shape_cast %77 : vector<8x8x8xbf16> to vector<64x8xbf16>
    %c12 = arith.constant 12 : index
    %c0_46 = arith.constant 0 : index
    %c0_47 = arith.constant 0 : index
    %79 = vector.load %arg5[%c12, %c0_46, %c0_47] : memref<27x8x8xbf16, #tpu.memory_space<vmem>>, vector<1x8x8xbf16>
    %80 = vector.shape_cast %79 : vector<1x8x8xbf16> to vector<8x8xbf16>
    %cst_48 = arith.constant dense<0.000000e+00> : vector<64x8xf32>
    %81 = tpu.matmul %78, %80, %cst_48 {dimension_numbers = #tpu.dot_dimension_numbers<[1], [0], [0], [1], [0, 0, 1, 1], [], []>} : vector<64x8xbf16>, vector<8x8xbf16>, vector<64x8xf32> -> vector<64x8xf32>
    %82 = arith.addf %76, %81 : vector<64x8xf32>
    %83 = vector.extract_strided_slice %58 {offsets = [1, 1, 0], sizes = [8, 8, 8], strides = [1, 1, 1]} : vector<10x10x8xbf16> to vector<8x8x8xbf16>
    %84 = vector.shape_cast %83 : vector<8x8x8xbf16> to vector<64x8xbf16>
    %c13 = arith.constant 13 : index
    %c0_49 = arith.constant 0 : index
    %c0_50 = arith.constant 0 : index
    %85 = vector.load %arg5[%c13, %c0_49, %c0_50] : memref<27x8x8xbf16, #tpu.memory_space<vmem>>, vector<1x8x8xbf16>
    %86 = vector.shape_cast %85 : vector<1x8x8xbf16> to vector<8x8xbf16>
    %cst_51 = arith.constant dense<0.000000e+00> : vector<64x8xf32>
    %87 = tpu.matmul %84, %86, %cst_51 {dimension_numbers = #tpu.dot_dimension_numbers<[1], [0], [0], [1], [0, 0, 1, 1], [], []>} : vector<64x8xbf16>, vector<8x8xbf16>, vector<64x8xf32> -> vector<64x8xf32>
    %88 = arith.addf %82, %87 : vector<64x8xf32>
    %89 = vector.extract_strided_slice %58 {offsets = [1, 2, 0], sizes = [8, 8, 8], strides = [1, 1, 1]} : vector<10x10x8xbf16> to vector<8x8x8xbf16>
    %90 = vector.shape_cast %89 : vector<8x8x8xbf16> to vector<64x8xbf16>
    %c14 = arith.constant 14 : index
    %c0_52 = arith.constant 0 : index
    %c0_53 = arith.constant 0 : index
    %91 = vector.load %arg5[%c14, %c0_52, %c0_53] : memref<27x8x8xbf16, #tpu.memory_space<vmem>>, vector<1x8x8xbf16>
    %92 = vector.shape_cast %91 : vector<1x8x8xbf16> to vector<8x8xbf16>
    %cst_54 = arith.constant dense<0.000000e+00> : vector<64x8xf32>
    %93 = tpu.matmul %90, %92, %cst_54 {dimension_numbers = #tpu.dot_dimension_numbers<[1], [0], [0], [1], [0, 0, 1, 1], [], []>} : vector<64x8xbf16>, vector<8x8xbf16>, vector<64x8xf32> -> vector<64x8xf32>
    %94 = arith.addf %88, %93 : vector<64x8xf32>
    %95 = vector.extract_strided_slice %58 {offsets = [2, 0, 0], sizes = [8, 8, 8], strides = [1, 1, 1]} : vector<10x10x8xbf16> to vector<8x8x8xbf16>
    %96 = vector.shape_cast %95 : vector<8x8x8xbf16> to vector<64x8xbf16>
    %c15 = arith.constant 15 : index
    %c0_55 = arith.constant 0 : index
    %c0_56 = arith.constant 0 : index
    %97 = vector.load %arg5[%c15, %c0_55, %c0_56] : memref<27x8x8xbf16, #tpu.memory_space<vmem>>, vector<1x8x8xbf16>
    %98 = vector.shape_cast %97 : vector<1x8x8xbf16> to vector<8x8xbf16>
    %cst_57 = arith.constant dense<0.000000e+00> : vector<64x8xf32>
    %99 = tpu.matmul %96, %98, %cst_57 {dimension_numbers = #tpu.dot_dimension_numbers<[1], [0], [0], [1], [0, 0, 1, 1], [], []>} : vector<64x8xbf16>, vector<8x8xbf16>, vector<64x8xf32> -> vector<64x8xf32>
    %100 = arith.addf %94, %99 : vector<64x8xf32>
    %101 = vector.extract_strided_slice %58 {offsets = [2, 1, 0], sizes = [8, 8, 8], strides = [1, 1, 1]} : vector<10x10x8xbf16> to vector<8x8x8xbf16>
    %102 = vector.shape_cast %101 : vector<8x8x8xbf16> to vector<64x8xbf16>
    %c16 = arith.constant 16 : index
    %c0_58 = arith.constant 0 : index
    %c0_59 = arith.constant 0 : index
    %103 = vector.load %arg5[%c16, %c0_58, %c0_59] : memref<27x8x8xbf16, #tpu.memory_space<vmem>>, vector<1x8x8xbf16>
    %104 = vector.shape_cast %103 : vector<1x8x8xbf16> to vector<8x8xbf16>
    %cst_60 = arith.constant dense<0.000000e+00> : vector<64x8xf32>
    %105 = tpu.matmul %102, %104, %cst_60 {dimension_numbers = #tpu.dot_dimension_numbers<[1], [0], [0], [1], [0, 0, 1, 1], [], []>} : vector<64x8xbf16>, vector<8x8xbf16>, vector<64x8xf32> -> vector<64x8xf32>
    %106 = arith.addf %100, %105 : vector<64x8xf32>
    %107 = vector.extract_strided_slice %58 {offsets = [2, 2, 0], sizes = [8, 8, 8], strides = [1, 1, 1]} : vector<10x10x8xbf16> to vector<8x8x8xbf16>
    %108 = vector.shape_cast %107 : vector<8x8x8xbf16> to vector<64x8xbf16>
    %c17 = arith.constant 17 : index
    %c0_61 = arith.constant 0 : index
    %c0_62 = arith.constant 0 : index
    %109 = vector.load %arg5[%c17, %c0_61, %c0_62] : memref<27x8x8xbf16, #tpu.memory_space<vmem>>, vector<1x8x8xbf16>
    %110 = vector.shape_cast %109 : vector<1x8x8xbf16> to vector<8x8xbf16>
    %cst_63 = arith.constant dense<0.000000e+00> : vector<64x8xf32>
    %111 = tpu.matmul %108, %110, %cst_63 {dimension_numbers = #tpu.dot_dimension_numbers<[1], [0], [0], [1], [0, 0, 1, 1], [], []>} : vector<64x8xbf16>, vector<8x8xbf16>, vector<64x8xf32> -> vector<64x8xf32>
    %112 = arith.addf %106, %111 : vector<64x8xf32>
    %c0_64 = arith.constant 0 : index
    %c0_65 = arith.constant 0 : index
    %c0_66 = arith.constant 0 : index
    %c0_67 = arith.constant 0 : index
    %c0_68 = arith.constant 0 : index
    %113 = vector.load %arg4[%c0_64, %c0_65, %c0_66, %c0_67, %c0_68] : memref<1x1x10x10x8xbf16, #tpu.memory_space<vmem>>, vector<1x1x10x10x8xbf16>
    %114 = vector.shape_cast %113 : vector<1x1x10x10x8xbf16> to vector<10x10x8xbf16>
    %115 = vector.extract_strided_slice %114 {offsets = [0, 0, 0], sizes = [8, 8, 8], strides = [1, 1, 1]} : vector<10x10x8xbf16> to vector<8x8x8xbf16>
    %116 = vector.shape_cast %115 : vector<8x8x8xbf16> to vector<64x8xbf16>
    %c18 = arith.constant 18 : index
    %c0_69 = arith.constant 0 : index
    %c0_70 = arith.constant 0 : index
    %117 = vector.load %arg5[%c18, %c0_69, %c0_70] : memref<27x8x8xbf16, #tpu.memory_space<vmem>>, vector<1x8x8xbf16>
    %118 = vector.shape_cast %117 : vector<1x8x8xbf16> to vector<8x8xbf16>
    %cst_71 = arith.constant dense<0.000000e+00> : vector<64x8xf32>
    %119 = tpu.matmul %116, %118, %cst_71 {dimension_numbers = #tpu.dot_dimension_numbers<[1], [0], [0], [1], [0, 0, 1, 1], [], []>} : vector<64x8xbf16>, vector<8x8xbf16>, vector<64x8xf32> -> vector<64x8xf32>
    %120 = arith.addf %112, %119 : vector<64x8xf32>
    %121 = vector.extract_strided_slice %114 {offsets = [0, 1, 0], sizes = [8, 8, 8], strides = [1, 1, 1]} : vector<10x10x8xbf16> to vector<8x8x8xbf16>
    %122 = vector.shape_cast %121 : vector<8x8x8xbf16> to vector<64x8xbf16>
    %c19 = arith.constant 19 : index
    %c0_72 = arith.constant 0 : index
    %c0_73 = arith.constant 0 : index
    %123 = vector.load %arg5[%c19, %c0_72, %c0_73] : memref<27x8x8xbf16, #tpu.memory_space<vmem>>, vector<1x8x8xbf16>
    %124 = vector.shape_cast %123 : vector<1x8x8xbf16> to vector<8x8xbf16>
    %cst_74 = arith.constant dense<0.000000e+00> : vector<64x8xf32>
    %125 = tpu.matmul %122, %124, %cst_74 {dimension_numbers = #tpu.dot_dimension_numbers<[1], [0], [0], [1], [0, 0, 1, 1], [], []>} : vector<64x8xbf16>, vector<8x8xbf16>, vector<64x8xf32> -> vector<64x8xf32>
    %126 = arith.addf %120, %125 : vector<64x8xf32>
    %127 = vector.extract_strided_slice %114 {offsets = [0, 2, 0], sizes = [8, 8, 8], strides = [1, 1, 1]} : vector<10x10x8xbf16> to vector<8x8x8xbf16>
    %128 = vector.shape_cast %127 : vector<8x8x8xbf16> to vector<64x8xbf16>
    %c20 = arith.constant 20 : index
    %c0_75 = arith.constant 0 : index
    %c0_76 = arith.constant 0 : index
    %129 = vector.load %arg5[%c20, %c0_75, %c0_76] : memref<27x8x8xbf16, #tpu.memory_space<vmem>>, vector<1x8x8xbf16>
    %130 = vector.shape_cast %129 : vector<1x8x8xbf16> to vector<8x8xbf16>
    %cst_77 = arith.constant dense<0.000000e+00> : vector<64x8xf32>
    %131 = tpu.matmul %128, %130, %cst_77 {dimension_numbers = #tpu.dot_dimension_numbers<[1], [0], [0], [1], [0, 0, 1, 1], [], []>} : vector<64x8xbf16>, vector<8x8xbf16>, vector<64x8xf32> -> vector<64x8xf32>
    %132 = arith.addf %126, %131 : vector<64x8xf32>
    %133 = vector.extract_strided_slice %114 {offsets = [1, 0, 0], sizes = [8, 8, 8], strides = [1, 1, 1]} : vector<10x10x8xbf16> to vector<8x8x8xbf16>
    %134 = vector.shape_cast %133 : vector<8x8x8xbf16> to vector<64x8xbf16>
    %c21 = arith.constant 21 : index
    %c0_78 = arith.constant 0 : index
    %c0_79 = arith.constant 0 : index
    %135 = vector.load %arg5[%c21, %c0_78, %c0_79] : memref<27x8x8xbf16, #tpu.memory_space<vmem>>, vector<1x8x8xbf16>
    %136 = vector.shape_cast %135 : vector<1x8x8xbf16> to vector<8x8xbf16>
    %cst_80 = arith.constant dense<0.000000e+00> : vector<64x8xf32>
    %137 = tpu.matmul %134, %136, %cst_80 {dimension_numbers = #tpu.dot_dimension_numbers<[1], [0], [0], [1], [0, 0, 1, 1], [], []>} : vector<64x8xbf16>, vector<8x8xbf16>, vector<64x8xf32> -> vector<64x8xf32>
    %138 = arith.addf %132, %137 : vector<64x8xf32>
    %139 = vector.extract_strided_slice %114 {offsets = [1, 1, 0], sizes = [8, 8, 8], strides = [1, 1, 1]} : vector<10x10x8xbf16> to vector<8x8x8xbf16>
    %140 = vector.shape_cast %139 : vector<8x8x8xbf16> to vector<64x8xbf16>
    %c22 = arith.constant 22 : index
    %c0_81 = arith.constant 0 : index
    %c0_82 = arith.constant 0 : index
    %141 = vector.load %arg5[%c22, %c0_81, %c0_82] : memref<27x8x8xbf16, #tpu.memory_space<vmem>>, vector<1x8x8xbf16>
    %142 = vector.shape_cast %141 : vector<1x8x8xbf16> to vector<8x8xbf16>
    %cst_83 = arith.constant dense<0.000000e+00> : vector<64x8xf32>
    %143 = tpu.matmul %140, %142, %cst_83 {dimension_numbers = #tpu.dot_dimension_numbers<[1], [0], [0], [1], [0, 0, 1, 1], [], []>} : vector<64x8xbf16>, vector<8x8xbf16>, vector<64x8xf32> -> vector<64x8xf32>
    %144 = arith.addf %138, %143 : vector<64x8xf32>
    %145 = vector.extract_strided_slice %114 {offsets = [1, 2, 0], sizes = [8, 8, 8], strides = [1, 1, 1]} : vector<10x10x8xbf16> to vector<8x8x8xbf16>
    %146 = vector.shape_cast %145 : vector<8x8x8xbf16> to vector<64x8xbf16>
    %c23 = arith.constant 23 : index
    %c0_84 = arith.constant 0 : index
    %c0_85 = arith.constant 0 : index
    %147 = vector.load %arg5[%c23, %c0_84, %c0_85] : memref<27x8x8xbf16, #tpu.memory_space<vmem>>, vector<1x8x8xbf16>
    %148 = vector.shape_cast %147 : vector<1x8x8xbf16> to vector<8x8xbf16>
    %cst_86 = arith.constant dense<0.000000e+00> : vector<64x8xf32>
    %149 = tpu.matmul %146, %148, %cst_86 {dimension_numbers = #tpu.dot_dimension_numbers<[1], [0], [0], [1], [0, 0, 1, 1], [], []>} : vector<64x8xbf16>, vector<8x8xbf16>, vector<64x8xf32> -> vector<64x8xf32>
    %150 = arith.addf %144, %149 : vector<64x8xf32>
    %151 = vector.extract_strided_slice %114 {offsets = [2, 0, 0], sizes = [8, 8, 8], strides = [1, 1, 1]} : vector<10x10x8xbf16> to vector<8x8x8xbf16>
    %152 = vector.shape_cast %151 : vector<8x8x8xbf16> to vector<64x8xbf16>
    %c24 = arith.constant 24 : index
    %c0_87 = arith.constant 0 : index
    %c0_88 = arith.constant 0 : index
    %153 = vector.load %arg5[%c24, %c0_87, %c0_88] : memref<27x8x8xbf16, #tpu.memory_space<vmem>>, vector<1x8x8xbf16>
    %154 = vector.shape_cast %153 : vector<1x8x8xbf16> to vector<8x8xbf16>
    %cst_89 = arith.constant dense<0.000000e+00> : vector<64x8xf32>
    %155 = tpu.matmul %152, %154, %cst_89 {dimension_numbers = #tpu.dot_dimension_numbers<[1], [0], [0], [1], [0, 0, 1, 1], [], []>} : vector<64x8xbf16>, vector<8x8xbf16>, vector<64x8xf32> -> vector<64x8xf32>
    %156 = arith.addf %150, %155 : vector<64x8xf32>
    %157 = vector.extract_strided_slice %114 {offsets = [2, 1, 0], sizes = [8, 8, 8], strides = [1, 1, 1]} : vector<10x10x8xbf16> to vector<8x8x8xbf16>
    %158 = vector.shape_cast %157 : vector<8x8x8xbf16> to vector<64x8xbf16>
    %c25 = arith.constant 25 : index
    %c0_90 = arith.constant 0 : index
    %c0_91 = arith.constant 0 : index
    %159 = vector.load %arg5[%c25, %c0_90, %c0_91] : memref<27x8x8xbf16, #tpu.memory_space<vmem>>, vector<1x8x8xbf16>
    %160 = vector.shape_cast %159 : vector<1x8x8xbf16> to vector<8x8xbf16>
    %cst_92 = arith.constant dense<0.000000e+00> : vector<64x8xf32>
    %161 = tpu.matmul %158, %160, %cst_92 {dimension_numbers = #tpu.dot_dimension_numbers<[1], [0], [0], [1], [0, 0, 1, 1], [], []>} : vector<64x8xbf16>, vector<8x8xbf16>, vector<64x8xf32> -> vector<64x8xf32>
    %162 = arith.addf %156, %161 : vector<64x8xf32>
    %163 = vector.extract_strided_slice %114 {offsets = [2, 2, 0], sizes = [8, 8, 8], strides = [1, 1, 1]} : vector<10x10x8xbf16> to vector<8x8x8xbf16>
    %164 = vector.shape_cast %163 : vector<8x8x8xbf16> to vector<64x8xbf16>
    %c26 = arith.constant 26 : index
    %c0_93 = arith.constant 0 : index
    %c0_94 = arith.constant 0 : index
    %165 = vector.load %arg5[%c26, %c0_93, %c0_94] : memref<27x8x8xbf16, #tpu.memory_space<vmem>>, vector<1x8x8xbf16>
    %166 = vector.shape_cast %165 : vector<1x8x8xbf16> to vector<8x8xbf16>
    %cst_95 = arith.constant dense<0.000000e+00> : vector<64x8xf32>
    %167 = tpu.matmul %164, %166, %cst_95 {dimension_numbers = #tpu.dot_dimension_numbers<[1], [0], [0], [1], [0, 0, 1, 1], [], []>} : vector<64x8xbf16>, vector<8x8xbf16>, vector<64x8xf32> -> vector<64x8xf32>
    %168 = arith.addf %162, %167 : vector<64x8xf32>
    %c0_96 = arith.constant 0 : index
    %c0_97 = arith.constant 0 : index
    %169 = vector.load %arg6[%c0_96, %c0_97] : memref<1x8xf32, #tpu.memory_space<vmem>>, vector<1x8xf32>
    %170 = vector.broadcast %169 : vector<1x8xf32> to vector<64x8xf32>
    %171 = arith.addf %168, %170 : vector<64x8xf32>
    %cst_98 = arith.constant 0.000000e+00 : f32
    %172 = vector.broadcast %cst_98 : f32 to vector<64x8xf32>
    %173 = arith.cmpf oge, %171, %172 : vector<64x8xf32>
    %cst_99 = arith.constant 2.000000e-01 : f32
    %174 = vector.broadcast %cst_99 : f32 to vector<64x8xf32>
    %175 = arith.mulf %174, %171 : vector<64x8xf32>
    %176 = arith.select %173, %171, %175 : vector<64x8xi1>, vector<64x8xf32>
    %177 = vector.shape_cast %176 : vector<64x8xf32> to vector<1x1x64x8xf32>
    %c0_100 = arith.constant 0 : index
    %c0_101 = arith.constant 0 : index
    %c0_102 = arith.constant 0 : index
    %c0_103 = arith.constant 0 : index
    %178 = vector.load %arg7[%c0_100, %c0_101, %c0_102, %c0_103] : memref<1x1x64x8xf32, #tpu.memory_space<vmem>>, vector<1x1x64x8xf32>
    tpu.vector_store %arg7[%c0_100, %c0_101, %c0_102, %c0_103], %177 {strides = array<i32>} : memref<1x1x64x8xf32, #tpu.memory_space<vmem>>, vector<1x1x64x8xf32>,
    %cst_104 = arith.constant dense<0.000000e+00> : vector<8xf32>
    %179 = vector.multi_reduction <add>, %176, %cst_104 [0] : vector<64x8xf32> to vector<8xf32>
    %180 = vector.shape_cast %179 : vector<8xf32> to vector<1x1x1x8xf32>
    %c0_105 = arith.constant 0 : index
    %c0_106 = arith.constant 0 : index
    %c0_107 = arith.constant 0 : index
    %c0_108 = arith.constant 0 : index
    %181 = vector.load %arg8[%c0_105, %c0_106, %c0_107, %c0_108] : memref<1x1x1x8xf32, #tpu.memory_space<vmem>>, vector<1x1x1x8xf32>
    tpu.vector_store %arg8[%c0_105, %c0_106, %c0_107, %c0_108], %180 {strides = array<i32>} : memref<1x1x1x8xf32, #tpu.memory_space<vmem>>, vector<1x1x1x8xf32>,
    %182 = arith.mulf %176, %176 : vector<64x8xf32>
    %cst_109 = arith.constant dense<0.000000e+00> : vector<8xf32>
    %183 = vector.multi_reduction <add>, %182, %cst_109 [0] : vector<64x8xf32> to vector<8xf32>
    %184 = vector.shape_cast %183 : vector<8xf32> to vector<1x1x1x8xf32>
    %c0_110 = arith.constant 0 : index
    %c0_111 = arith.constant 0 : index
    %c0_112 = arith.constant 0 : index
    %c0_113 = arith.constant 0 : index
    %185 = vector.load %arg9[%c0_110, %c0_111, %c0_112, %c0_113] : memref<1x1x1x8xf32, #tpu.memory_space<vmem>>, vector<1x1x1x8xf32>
    tpu.vector_store %arg9[%c0_110, %c0_111, %c0_112, %c0_113], %184 {strides = array<i32>} : memref<1x1x1x8xf32, #tpu.memory_space<vmem>>, vector<1x1x1x8xf32>,
    return
  }
  func.func @transform_0(%arg0: i32, %arg1: i32) -> (i32, i32, i32, i32, i32) {
    %c0_i32 = arith.constant 0 : i32
    %0 = arith.addi %arg1, %c0_i32 : i32
    %c0_i32_0 = arith.constant 0 : i32
    %c0_i32_1 = arith.constant 0 : i32
    %c0_i32_2 = arith.constant 0 : i32
    %c0_i32_3 = arith.constant 0 : i32
    return %arg0, %0, %c0_i32_0, %c0_i32_1, %c0_i32_2 : i32, i32, i32, i32, i32
  }
  func.func @transform_1(%arg0: i32, %arg1: i32) -> (i32, i32, i32, i32, i32) {
    %c1_i32 = arith.constant 1 : i32
    %0 = arith.addi %arg1, %c1_i32 : i32
    %c0_i32 = arith.constant 0 : i32
    %c0_i32_0 = arith.constant 0 : i32
    %c0_i32_1 = arith.constant 0 : i32
    %c0_i32_2 = arith.constant 0 : i32
    return %arg0, %0, %c0_i32, %c0_i32_0, %c0_i32_1 : i32, i32, i32, i32, i32
  }
  func.func @transform_2(%arg0: i32, %arg1: i32) -> (i32, i32, i32, i32, i32) {
    %c2_i32 = arith.constant 2 : i32
    %0 = arith.addi %arg1, %c2_i32 : i32
    %c0_i32 = arith.constant 0 : i32
    %c0_i32_0 = arith.constant 0 : i32
    %c0_i32_1 = arith.constant 0 : i32
    %c0_i32_2 = arith.constant 0 : i32
    return %arg0, %0, %c0_i32, %c0_i32_0, %c0_i32_1 : i32, i32, i32, i32, i32
  }
  func.func @transform_3(%arg0: i32, %arg1: i32) -> (i32, i32, i32) {
    %c0_i32 = arith.constant 0 : i32
    %c0_i32_0 = arith.constant 0 : i32
    %c0_i32_1 = arith.constant 0 : i32
    %c0_i32_2 = arith.constant 0 : i32
    return %c0_i32, %c0_i32_0, %c0_i32_1 : i32, i32, i32
  }
  func.func @transform_4(%arg0: i32, %arg1: i32) -> (i32, i32) {
    %c0_i32 = arith.constant 0 : i32
    %c0_i32_0 = arith.constant 0 : i32
    %c0_i32_1 = arith.constant 0 : i32
    return %c0_i32, %c0_i32_0 : i32, i32
  }
  func.func @transform_5(%arg0: i32, %arg1: i32) -> (i32, i32, i32, i32) {
    %c0_i32 = arith.constant 0 : i32
    %c0_i32_0 = arith.constant 0 : i32
    %c0_i32_1 = arith.constant 0 : i32
    return %arg0, %arg1, %c0_i32, %c0_i32_0 : i32, i32, i32, i32
  }
  func.func @transform_6(%arg0: i32, %arg1: i32) -> (i32, i32, i32, i32) {
    %c0_i32 = arith.constant 0 : i32
    %c0_i32_0 = arith.constant 0 : i32
    %c0_i32_1 = arith.constant 0 : i32
    return %arg0, %arg1, %c0_i32, %c0_i32_0 : i32, i32, i32, i32
  }
  func.func @transform_7(%arg0: i32, %arg1: i32) -> (i32, i32, i32, i32) {
    %c0_i32 = arith.constant 0 : i32
    %c0_i32_0 = arith.constant 0 : i32
    %c0_i32_1 = arith.constant 0 : i32
    return %arg0, %arg1, %c0_i32, %c0_i32_0 : i32, i32, i32, i32
  }
}

module attributes {stable_mosaic.version = 11 : i64} {
  func.func @_scale_shift_add_kernel(%arg0: i32, %arg1: memref<16x512xf32, #tpu.memory_space<vmem>>, %arg2: memref<1x512xf32, #tpu.memory_space<vmem>>, %arg3: memref<1x512xf32, #tpu.memory_space<vmem>>, %arg4: memref<16x512xf32, #tpu.memory_space<vmem>>, %arg5: memref<16x512xf32, #tpu.memory_space<vmem>>) attributes {dimension_semantics = [#tpu.dimension_semantics<parallel>], iteration_bounds = array<i64: 1>, scalar_prefetch = 0 : i64, scratch_operands = 0 : i64, tpu.core_type = #tpu.core_type<tc>, window_params = [{transform_indices = @transform_0, window_bounds = array<i64: 16, 512>}, {pipeline_mode = #tpu.pipeline_mode<synchronous>, transform_indices = @transform_1, window_bounds = array<i64: 1, 512>}, {pipeline_mode = #tpu.pipeline_mode<synchronous>, transform_indices = @transform_2, window_bounds = array<i64: 1, 512>}, {transform_indices = @transform_3, window_bounds = array<i64: 16, 512>}, {transform_indices = @transform_4, window_bounds = array<i64: 16, 512>}]} {
    %c0 = arith.constant 0 : index
    %c0_0 = arith.constant 0 : index
    %0 = vector.load %arg1[%c0, %c0_0] : memref<16x512xf32, #tpu.memory_space<vmem>>, vector<16x512xf32>
    %c0_1 = arith.constant 0 : index
    %c0_2 = arith.constant 0 : index
    %1 = vector.load %arg2[%c0_1, %c0_2] : memref<1x512xf32, #tpu.memory_space<vmem>>, vector<1x512xf32>
    %2 = vector.broadcast %1 : vector<1x512xf32> to vector<16x512xf32>
    %3 = arith.mulf %0, %2 : vector<16x512xf32>
    %c0_3 = arith.constant 0 : index
    %c0_4 = arith.constant 0 : index
    %4 = vector.load %arg3[%c0_3, %c0_4] : memref<1x512xf32, #tpu.memory_space<vmem>>, vector<1x512xf32>
    %5 = vector.broadcast %4 : vector<1x512xf32> to vector<16x512xf32>
    %6 = arith.addf %3, %5 : vector<16x512xf32>
    %c0_5 = arith.constant 0 : index
    %c0_6 = arith.constant 0 : index
    %7 = vector.load %arg4[%c0_5, %c0_6] : memref<16x512xf32, #tpu.memory_space<vmem>>, vector<16x512xf32>
    %8 = arith.addf %6, %7 : vector<16x512xf32>
    %c0_7 = arith.constant 0 : index
    %c0_8 = arith.constant 0 : index
    %9 = vector.load %arg5[%c0_7, %c0_8] : memref<16x512xf32, #tpu.memory_space<vmem>>, vector<16x512xf32>
    tpu.vector_store %arg5[%c0_7, %c0_8], %8 {strides = array<i32>} : memref<16x512xf32, #tpu.memory_space<vmem>>, vector<16x512xf32>,
    return
  }
  func.func @transform_0(%arg0: i32) -> (i32, i32) {
    %c0_i32 = arith.constant 0 : i32
    %c0_i32_0 = arith.constant 0 : i32
    return %arg0, %c0_i32 : i32, i32
  }
  func.func @transform_1(%arg0: i32) -> (i32, i32) {
    %c0_i32 = arith.constant 0 : i32
    %c0_i32_0 = arith.constant 0 : i32
    %c0_i32_1 = arith.constant 0 : i32
    return %c0_i32, %c0_i32_0 : i32, i32
  }
  func.func @transform_2(%arg0: i32) -> (i32, i32) {
    %c0_i32 = arith.constant 0 : i32
    %c0_i32_0 = arith.constant 0 : i32
    %c0_i32_1 = arith.constant 0 : i32
    return %c0_i32, %c0_i32_0 : i32, i32
  }
  func.func @transform_3(%arg0: i32) -> (i32, i32) {
    %c0_i32 = arith.constant 0 : i32
    %c0_i32_0 = arith.constant 0 : i32
    return %arg0, %c0_i32 : i32, i32
  }
  func.func @transform_4(%arg0: i32) -> (i32, i32) {
    %c0_i32 = arith.constant 0 : i32
    %c0_i32_0 = arith.constant 0 : i32
    return %arg0, %c0_i32 : i32, i32
  }
}

</mosaic_0001>

<bundles_post_ra>
// kernel: resblock_up.5
= control target key start
LH: loop header
LB: loop body
LE: loop exit
PB: predicated region body
PF: predicated region fallthrough
CT: control target
= control target key end

     0   :  { %s220_s0 = inlined_call_operand.vmem [shape: f32[128,128], index: 0, kind: input, shape index: {}]   ;;  %s221_s1 = inlined_call_operand.vmem [shape: f32[1,128], index: 1, kind: input, shape index: {}]   ;;  %s222_s2 = inlined_call_operand.vmem [shape: f32[1,128], index: 2, kind: input, shape index: {}]   ;;  %s223_s3 = inlined_call_operand.vmem [shape: f32[128,128], index: 3, kind: output, shape index: {}]  }
   0x1   :  { %v14_v0 = vld [vmem:[%s220_s0] sm:$0xff]  ;;  %v15_v4 = vld [vmem:[%s220_s0 + $0x8] sm:$0xff]  ;;  %v16_v5 = vld [vmem:[%s220_s0 + $0x10] sm:$0xff] }
   0x2   :  { %v96_v1 = vld [vmem:[%s221_s1] ss:$0 sm:$0xff]  ;;  %v17_v6 = vld [vmem:[%s220_s0 + $0x18] sm:$0xff]  ;;  %v19_v11 = vld [vmem:[%s220_s0 + $0x28] sm:$0xff] }
   0x3   :  { %v97_v2 = vld [vmem:[%s222_s2] ss:$0 sm:$0xff]  ;;  %v37_v3 = vmul.f32 %v96_v1, %v14_v0  ;;  %v38_v7 = vmul.f32 %v96_v1, %v15_v4  ;;  %v39_v8 = vmul.f32 %v96_v1, %v16_v5  ;;  %v40_v9 = vmul.f32 %v96_v1, %v17_v6  ;;  %v20_v12 = vld [vmem:[%s220_s0 + $0x30] sm:$0xff]  ;;  %v21_v17 = vld [vmem:[%s220_s0 + $0x38] sm:$0xff] }
   0x4   :  { %v18_v10 = vld [vmem:[%s220_s0 + $0x20] sm:$0xff]  ;;  %v42_v15 = vmul.f32 %v96_v1, %v19_v11  ;;  %v43_v16 = vmul.f32 %v96_v1, %v20_v12  ;;  %v23_v19 = vld [vmem:[%s220_s0 + $0x48] sm:$0xff]  ;;  %v44_v23 = vmul.f32 %v96_v1, %v21_v17  ;;  %v24_v24 = vld [vmem:[%s220_s0 + $0x50] sm:$0xff] }
   0x5   :  { %v60_v13 = vadd.f32 %v97_v2, %v37_v3  ;;  %v41_v14 = vmul.f32 %v96_v1, %v18_v10  ;;  %v22_v18 = vld [vmem:[%s220_s0 + $0x40] sm:$0xff]  ;;  %v61_v20 = vadd.f32 %v97_v2, %v38_v7  ;;  %v62_v21 = vadd.f32 %v97_v2, %v39_v8  ;;  %v25_v25 = vld [vmem:[%s220_s0 + $0x58] sm:$0xff]  ;;  %v27_v31 = vld [vmem:[%s220_s0 + $0x68] sm:$0xff] }
   0x6   :  { %v63_v22 = vadd.f32 %v97_v2, %v40_v9  ;;  %v26_v26 = vld [vmem:[%s220_s0 + $0x60] sm:$0xff]  ;;  %v65_v28 = vadd.f32 %v97_v2, %v42_v15  ;;  %v66_v29 = vadd.f32 %v97_v2, %v43_v16  ;;  %v45_v30 = vmul.f32 %v96_v1, %v22_v18  ;;  %v28_v32 = vld [vmem:[%s220_s0 + $0x70] sm:$0xff]  ;;  %v29_v33 = vld [vmem:[%s220_s0 + $0x78] sm:$0xff] }
   0x7   :  { %76 = vst [vmem:[%s223_s3] sm:$0xff] %v60_v13  ;;  %v64_v27 = vadd.f32 %v97_v2, %v41_v14  ;;  %77 = vst [vmem:[%s223_s3 + $0x8] sm:$0xff] %v61_v20  ;;  %v67_v34 = vadd.f32 %v97_v2, %v44_v23  ;;  %v46_v35 = vmul.f32 %v96_v1, %v23_v19 }
   0x8   :  { %78 = vst [vmem:[%s223_s3 + $0x10] sm:$0xff] %v62_v21  ;;  %79 = vst [vmem:[%s223_s3 + $0x18] sm:$0xff] %v63_v22  ;;  %v47_v36 = vmul.f32 %v96_v1, %v24_v24  ;;  %v48_v37 = vmul.f32 %v96_v1, %v25_v25  ;;  %v68_v38 = vadd.f32 %v97_v2, %v45_v30 }
   0x9   :  { %80 = vst [vmem:[%s223_s3 + $0x20] sm:$0xff] %v64_v27  ;;  %81 = vst [vmem:[%s223_s3 + $0x28] sm:$0xff] %v65_v28  ;;  %v49_v39 = vmul.f32 %v96_v1, %v26_v26  ;;  %v50_v40 = vmul.f32 %v96_v1, %v27_v31  ;;  %v51_v41 = vmul.f32 %v96_v1, %v28_v32 }
   0xa   :  { %82 = vst [vmem:[%s223_s3 + $0x30] sm:$0xff] %v66_v29  ;;  %83 = vst [vmem:[%s223_s3 + $0x38] sm:$0xff] %v67_v34  ;;  %v69_v42 = vadd.f32 %v97_v2, %v46_v35  ;;  %v70_v43 = vadd.f32 %v97_v2, %v47_v36  ;;  %v71_v44 = vadd.f32 %v97_v2, %v48_v37 }
   0xb   :  { %v52_v45 = vmul.f32 %v96_v1, %v29_v33  ;;  %84 = vst [vmem:[%s223_s3 + $0x40] sm:$0xff] %v68_v38  ;;  %v72_v46 = vadd.f32 %v97_v2, %v49_v39  ;;  %v73_v47 = vadd.f32 %v97_v2, %v50_v40  ;;  %v74_v48 = vadd.f32 %v97_v2, %v51_v41 }
   0xc   :  { %85 = vst [vmem:[%s223_s3 + $0x48] sm:$0xff] %v69_v42  ;;  %86 = vst [vmem:[%s223_s3 + $0x50] sm:$0xff] %v70_v43 }
   0xd   :  { %87 = vst [vmem:[%s223_s3 + $0x58] sm:$0xff] %v71_v44  ;;  %v75_v49 = vadd.f32 %v97_v2, %v52_v45  ;;  %88 = vst [vmem:[%s223_s3 + $0x60] sm:$0xff] %v72_v46 }
   0xe   :  { %89 = vst [vmem:[%s223_s3 + $0x68] sm:$0xff] %v73_v47  ;;  %90 = vst [vmem:[%s223_s3 + $0x70] sm:$0xff] %v74_v48 }
   0xf   :  { %91 = vst [vmem:[%s223_s3 + $0x78] sm:$0xff] %v75_v49 }

// kernel: resblock_up.4
= control target key start
LH: loop header
LB: loop body
LE: loop exit
PB: predicated region body
PF: predicated region fallthrough
CT: control target
= control target key end

     0   :  { %s3416_s24 = smov 0   ;;  %s3418_s25 = smov 0   ;;  %s4322_s0 = inlined_call_operand.vmem [shape: bf16[2,6,6,6,4], index: 0, kind: input, shape index: {}, may-alias: {0,1,2}]   ;;  %s4323_s1 = inlined_call_operand.vmem [shape: bf16[2,6,6,6,4], index: 1, kind: input, shape index: {}, may-alias: {0,1,2}]   ;;  %s4324_s2 = inlined_call_operand.vmem [shape: bf16[2,6,6,6,4], index: 2, kind: input, shape index: {}, may-alias: {0,1,2}]   ;;  %s4325_s3 = inlined_call_operand.vmem [shape: bf16[27,4,128], index: 3, kind: input, shape index: {}]   ;;  %s4326_s4 = inlined_call_operand.vmem [shape: f32[1,128], index: 4, kind: input, shape index: {}]   ;;  %s4327_s5 = inlined_call_operand.vmem [shape: f32[2,4,16,128], index: 5, kind: output, shape index: {0}]   ;;  %s4328_s6 = inlined_call_operand.vmem [shape: f32[2,4,1,128], index: 6, kind: output, shape index: {1}]   ;;  %s4329_s7 = inlined_call_operand.vmem [shape: f32[2,4,1,128], index: 7, kind: output, shape index: {2}]  }
   0x1   :  { %s3420_s26 = smov 0   ;;  %s3422_s27 = smov 0  }
   0x2   :  { %s3424_s28 = smov 0  }
   0x3 LB: > { %s27_s29 = sadd.s32 1, %s3363_s26  ;;  %s30_s30 = sadd.s32 1, %s3367_s27  ;;  %s3371_s28 = sphi %s3424_s28, %s18_s28   ;;  %s3367_s27 = sphi %s3422_s27, %s4343_s27   ;;  %s3363_s26 = sphi %s3420_s26, %s4342_s26   ;;  %s3359_s25 = sphi %s3418_s25, %s4341_s25   ;;  %s3355_s24 = sphi %s3416_s24, %s4340_s24  }
   0x4   : > { %p28_p0 = scmp.ge.s32.totalorder %s27_s29, 4  ;;  %p2972_p1 = scmp.ge.s32.totalorder %s3371_s28, 1 }
   0x5   : > { %p306_p2 = scmp.lt.s32.totalorder %s3371_s28, 9 }
   0x6   : > { %s4345_s29 = smov (%p28_p0, %s27_s29), 0  ;;  %s4347_s30 = smov (!%p28_p0, %s30_s30), %s3367_s27 }
   0x7   : > { %p307_p3 = pnand %p2972_p1, %p306_p2  ;;  %p32_p4 = scmp.ge.s32.totalorder %s4347_s30, 2 }
   0x8   : > { %v2981_v0 = vld [vmem:[%s4325_s3 + $0x2] sm:$0x3] (!%p307_p3)  ;;  %vm564_vm0 = vcmask (!%p307_p3), 1041408   ;;  %v441_v1 = vld [vmem:[%s4325_s3] sm:$0x3] (!%p307_p3)  ;;  %v449_v2 = vlaneseq (!%p307_p3)  ;;  %v3373_v3 = vmov (!%p307_p3), 0.0  }
   0x9   : > { %s4349_s30 = smov (%p32_p4, %s4347_s30), 0  ;;  %310 = sbr.rel (%p307_p3) target bundleno = 390 (0x186), region = 40 }
   0xa   : > { %3109 = vmatprep.subr.bf16.mxu0 (!%p307_p3), %v3373_v3  ;;  %v566_v4 = vsel (!%p307_p3), %vm564_vm0, %v2981_v0, 0  ;;  %3115 = vmatprep.subr.bf16.mxu1 (!%p307_p3), %v3373_v3  ;;  %v630_v5 = vsel (!%p307_p3), %vm564_vm0, %v441_v1, 0  ;;  %p380_p5 = scmp.lt.s32.totalorder (!%p307_p3), %s3359_s25, 1  ;;  %p382_p6 = scmp.lt.s32.totalorder (!%p307_p3), %s3355_s24, 5  ;;  %vm3374_vm1 = vmmov (!%p307_p3), 0   ;;  %v450_v8 = vshrl.u32 (!%p307_p3), %v449_v2, 7 }
   0xb   : > { %3110 = vmatpush3.bf16.msra.mxu0 (!%p307_p3), %v566_v4  ;;  %3116 = vmatpush3.bf16.msra.mxu1 (!%p307_p3), %v630_v5  ;;  %v3375_v6 = vmov (!%p307_p3), 1983009808   ;;  %v2988_v10 = vld [vmem:[%s4325_s3 + $0x4] sm:$0x3] (!%p307_p3)  ;;  %vm478_vm2 = vsmask.f32 (!%p307_p3), 1280 }
   0xc   : > { %3111 = vmatprep.mubr.msk.bf16.mxu0 (!%p307_p3), %vm3374_vm1, %v3373_v3  ;;  %3117 = vmatprep.mubr.msk.bf16.mxu1 (!%p307_p3), %vm3374_vm1, %v3373_v3  ;;  %v447_v7 = vunpack.c.l.s4 (!%p307_p3), %v3375_v6  ;;  %vm479_vm3 = vsmask.f32 (!%p307_p3), 3336  ;;  %vm481_vm4 = vsmask.f32 (!%p307_p3), 5392  ;;  %vm483_vm5 = vsmask.f32 (!%p307_p3), 7448 }
   0xd   : > { %3121 = vmatprep.subr.bf16.mxu0 (!%p307_p3), %v3373_v3  ;;  %3127 = vmatprep.subr.bf16.mxu1 (!%p307_p3), %v3373_v3  ;;  %v3485_v12 = vsel (!%p307_p3), %vm564_vm0, %v2988_v10, 0  ;;  %vm673_vm6 = vcmask (!%p307_p3), 1040384   ;;  %vm674_vm7 = vcmask (!%p307_p3), 1042434   ;;  %vm480_vm8 = vmor (!%p307_p3), %vm478_vm2, %vm479_vm3  ;;  %vm676_vm9 = vcmask (!%p307_p3), 1044484   ;;  %s389_s22 = sadd.s32 (!%p307_p3), 1, %s3355_s24  ;;  %p413_p9 = scmp.lt.s32.totalorder (!%p307_p3), %s3355_s24, 3 }
   0xe   : > { %v448_v9 = vunpack.c.0.s8 (!%p307_p3), %v447_v7  ;;  %vm3552_vm10 = vmor (!%p307_p3), %vm480_vm8, %vm481_vm4  ;;  %vm678_vm11 = vcmask (!%p307_p3), 1046534   ;;  %p3560_p7 = scmp.lt.s32.totalorder (!%p307_p3), %s389_s22, 5  ;;  %vm560_vm13 = vcmask (!%p307_p3), 31744   ;;  %v2990_v60 = vld [vmem:[%s4325_s3 + $0x6] sm:$0x3] (!%p307_p3) }
   0xf   : > { %vm3568_vm12 = vmor (!%p307_p3), %vm3552_vm10, %vm483_vm5  ;;  %v2992_v6 = vld [vmem:[%s4325_s3 + $0x8] sm:$0x3] (!%p307_p3) }
  0x10   : > { %s4351_s25 = smov (!%p380_p5, %s3359_s25), 1  ;;  %v3479_v11 = vsub.s32 %v448_v9, %v450_v8  ;;  %s4353_s22 = smov (!%p3560_p7, %s389_s22), 5  ;;  %vm675_vm14 = vmor %vm673_vm6, %vm674_vm7  ;;  %v3620_v38 = vsel %vm564_vm0, %v2992_v6, 0 }
  0x11   : > { %s383_s12 = scalar_select %p382_p6, %s3355_s24, 5  ;;  %vm3615_vm15 = vmor %vm675_vm14, %vm676_vm9 }
  0x12   : > { %s3473_s13 = smul.u32 36, %s4351_s25  ;;  %vm3645_vm2 = vmor %vm3615_vm15, %vm678_vm11  ;;  %s2977_s8 = sshll.u32 %s4351_s25, 3 }
  0x13   : > { %s3271_s14 = smul.u32 6, %s383_s12 }
  0x14   : > { %s3273_s12 = smul.u32 6, %s4353_s22 }
  0x15   : > { %s386_s17 = sadd.s32 %s3473_s13, %s3271_s14  ;;  %s400_s14 = sadd.s32 2, %s3355_s24 }
  0x16   : > { %s2973_s18 = sshll.u32 %s386_s17, 2  ;;  %s3658_s16 = sadd.s32 %s3273_s12, %s3473_s13 }
  0x17   : > { %s388_s21 = scalar_lea.vmem %s4322_s0, %s2973_s18  ;;  %s2974_s17 = sshll.u32 %s3658_s16, 2 }
  0x18   : > { %v3487_v13 = vld [vmem:[%s388_s21] sm:$0x7]  ;;  %v3489_v14 = vld [vmem:[%s388_s21 + $0x4] sm:$0x7]  ;;  %v3491_v15 = vld [vmem:[%s388_s21 + $0x8] sm:$0x7]  ;;  %s3706_s22 = scalar_lea.vmem %s4323_s1, %s2974_s17 }
  0x19   : > { %v3493_v16 = vld [vmem:[%s388_s21 + $0xc] sm:$0x7]  ;;  %v3495_v17 = vld [vmem:[%s388_s21 + $0x10] sm:$0x7]  ;;  %v3497_v18 = vld [vmem:[%s388_s21 + $0x14] sm:$0x7]  ;;  %v3501_v19 = vrot.slane %v3487_v13, %v3479_v11  ;;  %v3505_v20 = vrot.slane %v3489_v14, %v3479_v11  ;;  %v3509_v21 = vrot.slane %v3491_v15, %v3479_v11  ;;  %v609_v25 = vcombine.low %v3487_v13, %v3489_v14 }
  0x1a   : > { %v3513_v22 = vrot.slane %v3493_v16, %v3479_v11  ;;  %v3517_v23 = vrot.slane %v3495_v17, %v3479_v11  ;;  %v3521_v24 = vrot.slane %v3497_v18, %v3479_v11  ;;  %v610_v55 = vcombine.low %v3491_v15, %v3493_v16  ;;  %p3825_p8 = scmp.lt.s32.totalorder %s400_s14, 5  ;;  %s4357_s24 = smov (!%p413_p9, %s3355_s24), 3 }
  0x1b   : > { %v3527_v26 = vcombine.high %v3501_v19, %v3501_v19  ;;  %v3531_v27 = vcombine.high %v3505_v20, %v3505_v20  ;;  %v3535_v28 = vcombine.high %v3509_v21, %v3509_v21  ;;  %v486_v29 = vshrl.u32 %v3501_v19, 16  ;;  %s2976_s23 = sshll.u32 %s4357_s24, 1  ;;  %s2979_s17 = sshll.u32 %s4351_s25, 2 }
  0x1c   : > { %v3542_v30 = vcombine.high %v3513_v22, %v3513_v22  ;;  %v489_v31 = vshll.u32 %v3501_v19, 16  ;;  %v500_v32 = vshrl.u32 %v3505_v20, 16  ;;  %v503_v33 = vshll.u32 %v3505_v20, 16  ;;  %s4355_s14 = smov (!%p3825_p8, %s400_s14), 5  ;;  %s417_s9 = sadd.s32 %s2977_s8, %s2976_s23 }
  0x1d   : > { %v488_v34 = vrot.slane %v486_v29, 6  ;;  %v495_v35 = vshll.u32 %v3527_v26, 16  ;;  %v509_v36 = vshll.u32 %v3531_v27, 16  ;;  %v514_v37 = vshrl.u32 %v3509_v21, 16  ;;  %s3274_s16 = smul.u32 6, %s4355_s14  ;;  %s425_s18 = sadd.s32 %s2979_s17, %s4357_s24 }
  0x1e   : > { %v491_v39 = vrot.slane %v489_v31, 7  ;;  %v502_v40 = vrot.slane %v500_v32, 6  ;;  %v505_v41 = vrot.slane %v503_v33, 7  ;;  %v517_v42 = vshll.u32 %v3509_v21, 16  ;;  %s433_s23 = scalar_lea.vmem %s4329_s7, %s425_s18 }
  0x1f   : > { %v497_v43 = vrot.slane %v495_v35, 7  ;;  %v511_v44 = vrot.slane %v509_v36, 7  ;;  %v516_v45 = vrot.slane %v514_v37, 6  ;;  %v523_v46 = vshll.u32 %v3535_v28, 16  ;;  %s3916_s21 = sadd.s32 %s3274_s16, %s3473_s13 }
  0x20   : > { %v492_v47 = vor.u32 %v491_v39, %v488_v34  ;;  %v506_v48 = vor.u32 %v505_v41, %v502_v40  ;;  %v519_v49 = vrot.slane %v517_v42, 7  ;;  %v528_v50 = vshrl.u32 %v3513_v22, 16  ;;  %s2975_s13 = sshll.u32 %s3916_s21, 2  ;;  %s426_s21 = scalar_lea.vmem %s4328_s6, %s425_s18 }
  0x21   : > { %v531_v52 = vshll.u32 %v3513_v22, 16  ;;  %v537_v53 = vshll.u32 %v3542_v30, 16  ;;  %v3576_v54 = vcombine.high %v3517_v23, %v3517_v23  ;;  %v525_v61 = vrot.slane %v523_v46, 7  ;;  %s3960_s12 = scalar_lea.vmem %s4324_s2, %s2975_s13 }
  0x22   : > { %v493_v56 = vrot.slane %v492_v47, 2  ;;  %v507_v57 = vrot.slane %v506_v48, 2  ;;  %v520_v58 = vor.u32 %v519_v49, %v516_v45  ;;  %v530_v59 = vrot.slane %v528_v50, 6 }
  0x23   : > { %v533_v62 = vrot.slane %v531_v52, 7  ;;  %v842_v63 = vshrl.u32 %v3517_v23, 16  ;;  %v845_v0 = vshll.u32 %v3517_v23, 16  ;;  %v539_v5 = vrot.slane %v537_v53, 7 }
  0x24   : > { %v498_v1 = vsel %vm3568_vm12, %v493_v56, %v497_v43  ;;  %v3595_v2 = vsel %vm3568_vm12, %v507_v57, %v511_v44  ;;  %v521_v4 = vrot.slane %v520_v58, 2  ;;  %v851_v10 = vshll.u32 %v3576_v54, 16  ;;  %v2995_v43 = vld [vmem:[%s4325_s3 + $0xa] sm:$0x3] }
  0x25   : > { %v534_v7 = vor.u32 %v533_v62, %v530_v59  ;;  %v844_v8 = vrot.slane %v842_v63, 6  ;;  %v847_v9 = vrot.slane %v845_v0, 7  ;;  %v543_v29 = vcombine.low %v498_v1, %v3595_v2 }
  0x26   : > { %v3606_v31 = vcombine.high %v3521_v24, %v3521_v24  ;;  %v1065_v32 = vshrl.u32 %v3521_v24, 16  ;;  %v788_v33 = vsel %vm564_vm0, %v2990_v60, 0  ;;  %v3612_v34 = vsel %vm3568_vm12, %v521_v4, %v525_v61 }
  0x27   : > { %v535_v35 = vrot.slane %v534_v7, 2  ;;  %v848_v36 = vor.u32 %v847_v9, %v844_v8  ;;  %v1068_v40 = vshll.u32 %v3521_v24, 16  ;;  %v617_v42 = vrot.slane %v609_v25, %v3479_v11  ;;  %v2999_v9 = vld [vmem:[%s4325_s3 + $0xe] sm:$0x3] }
  0x28   : > { %v1067_v39 = vrot.slane %v1065_v32, 6  ;;  %v1074_v41 = vshll.u32 %v3606_v31, 16  ;;  %v853_v46 = vrot.slane %v851_v10, 7  ;;  %v3637_v47 = vrot.slane %v610_v55, %v3479_v11 }
  0x29   : > { %v3634_v44 = vsel %vm3568_vm12, %v535_v35, %v539_v5  ;;  %v849_v45 = vrot.slane %v848_v36, 2  ;;  %v551_v13 = vrot.slane %v543_v29, %v3479_v11  ;;  %v1070_v49 = vrot.slane %v1068_v40, 7  ;;  %v3002_v36 = vld [vmem:[%s4325_s3 + $0x10] sm:$0x3] }
  0x2a   : > { %v544_v48 = vcombine.low %v3612_v34, %v3634_v44  ;;  %v2984_v50 = vrot.slane %v3501_v19, 9  ;;  %v857_v52 = vcombine.low %v3595_v2, %v3612_v34  ;;  %v625_v53 = vcombine.low %v617_v42, %v3637_v47  ;;  %v3004_v42 = vld [vmem:[%s4325_s3 + $0x12] sm:$0x3] }
  0x2b   : > { %v682_v55 = vrot.slane %v3527_v26, 7  ;;  %v3655_v56 = vsel %vm564_vm0, %v2995_v43, 0  ;;  %v1071_v58 = vor.u32 %v1070_v49, %v1067_v39  ;;  %v1076_v59 = vrot.slane %v1074_v41, 7  ;;  %v1202_v39 = vld [vmem:[%s3706_s22] sm:$0x7] }
  0x2c   : > { %v3661_v57 = vrot.slane %v544_v48, %v3479_v11  ;;  %v2985_v19 = vrot.slane %v3505_v20, 9  ;;  %v854_v60 = vsel %vm3568_vm12, %v849_v45, %v853_v46  ;;  %3118 = vmatmul.mubr.msk.bf16.vlgmr.msra.gmra.mrb[0].mxu1 %vm560_vm13, %v625_v53  ;;  %v686_v61 = vrot.slane %v3531_v27, 7  ;;  %v3741_v43 = vld [vmem:[%s3706_s22 + $0x4] sm:$0x7]  ;;  %v3749_v48 = vld [vmem:[%s3706_s22 + $0x8] sm:$0x7] }
  0x2d   : > { %v683_v26 = vsel %vm3645_vm2, %v2984_v50, %v682_v55  ;;  %v2986_v62 = vrot.slane %v3509_v21, 9  ;;  %v1072_v0 = vrot.slane %v1071_v58, 2  ;;  %3128 = vmatpush3.bf16.msra.mxu1 %v788_v33  ;;  %v690_v1 = vrot.slane %v3535_v28, 7  ;;  %3129 = vmatprep.mubr.msk.bf16.mxu1 %vm3374_vm1, %v3373_v3  ;;  %v3772_v58 = vld [vmem:[%s3706_s22 + $0xc] sm:$0x7] }
  0x2e   : > { %v559_v63 = vcombine.low %v551_v13, %v3661_v57  ;;  %v2987_v20 = vrot.slane %v3513_v22, 9  ;;  %v687_v2 = vsel %vm3645_vm2, %v2985_v19, %v686_v61  ;;  %v694_v4 = vrot.slane %v3542_v30, 7  ;;  %3139 = vmatprep.subr.bf16.mxu1 %v3373_v3 }
  0x2f   : > { %v767_v21 = vcombine.low %v3489_v14, %v3491_v15  ;;  %v768_v27 = vcombine.low %v3493_v16, %v3495_v17  ;;  %v1077_v22 = vsel %vm3568_vm12, %v1072_v0, %v1076_v59  ;;  %v998_v28 = vcombine.low %v3495_v17, %v3497_v18  ;;  %v2997_v14 = vld [vmem:[%s4325_s3 + $0xc] sm:$0x3] }
  0x30   : > { %3112 = vmatmul.mubr.msk.bf16.vlgmr.msra.gmra.mrb[0].mxu0 %vm560_vm13, %v559_v63  ;;  %v691_v5 = vsel %vm3645_vm2, %v2986_v62, %v690_v1  ;;  %v698_v30 = vcombine.low %v683_v26, %v687_v2  ;;  %v858_v15 = vcombine.low %v3634_v44, %v854_v60  ;;  %v695_v16 = vsel %vm3645_vm2, %v2987_v20, %v694_v4 }
  0x31   : > { %3122 = vmatpush3.bf16.msra.mxu0 %v3485_v12  ;;  %3123 = vmatprep.mubr.msk.bf16.mxu0 %vm3374_vm1, %v3373_v3  ;;  %v775_v17 = vrot.slane %v767_v21, %v3479_v11  ;;  %v2994_v18 = vrot.slane %v3517_v23, 9  ;;  %v1080_v6 = vcombine.low %v854_v60, %v1077_v22  ;;  %v699_v12 = vcombine.low %v691_v5, %v695_v16 }
  0x32   : > { %3133 = vmatprep.subr.bf16.mxu0 %v3373_v3  ;;  %v706_v7 = vrot.slane %v698_v30, %v3479_v11  ;;  %v782_v8 = vrot.slane %v768_v27, %v3479_v11  ;;  %v3715_v23 = vsel %vm564_vm0, %v2997_v14, 0  ;;  %v925_v10 = vrot.slane %v3576_v54, 7 }
  0x33   : > { %v929_v29 = vcombine.low %v687_v2, %v691_v5  ;;  %v3001_v32 = vrot.slane %v3521_v24, 9  ;;  %v3720_v33 = vrot.slane %v998_v28, %v3479_v11  ;;  %v3723_v34 = vrot.slane %v699_v12, %v3479_v11 }
  0x34   : > { %v783_v35 = vcombine.low %v775_v17, %v782_v8  ;;  %v1140_v37 = vrot.slane %v3606_v31, 7  ;;  %v865_v54 = vrot.slane %v857_v52, %v3479_v11  ;;  %v872_v40 = vrot.slane %v858_v15, %v3479_v11 }
  0x35   : > { %v3734_v24 = vsel %vm3645_vm2, %v2994_v18, %v925_v10  ;;  %v1093_v41 = vsel %vm564_vm0, %v2999_v9, 0  ;;  %v1087_v44 = vrot.slane %v1080_v6, %v3479_v11  ;;  %v714_v31 = vcombine.low %v706_v7, %v3723_v34 }
  0x36   : > { %3130 = vmatmul.mubr.msk.bf16.vlgmr.msra.gmra.mrb[4].mxu1 %vm560_vm13, %v783_v35  ;;  %v930_v45 = vcombine.low %v695_v16, %v3734_v24  ;;  %v937_v46 = vrot.slane %v929_v29, %v3479_v11  ;;  %v3755_v13 = vsel %vm564_vm0, %v3002_v36, 0  ;;  %v1141_v49 = vsel %vm3645_vm2, %v3001_v32, %v1140_v37 }
  0x37   : > { %3140 = vmatpush3.bf16.msra.mxu1 %v3655_v56  ;;  %3141 = vmatprep.mubr.msk.bf16.mxu1 %vm3374_vm1, %v3373_v3  ;;  %v1214_v50 = vcombine.low %v1202_v39, %v3741_v43  ;;  %v3761_v52 = vrot.slane %v1202_v39, %v3479_v11  ;;  %v1006_v53 = vcombine.low %v3637_v47, %v3720_v33  ;;  %v3769_v56 = vsel %vm564_vm0, %v3004_v42, 0 }
  0x38   : > { %3124 = vmatmul.mubr.msk.bf16.vlgmr.msra.gmra.mrb[4].mxu0 %vm560_vm13, %v714_v31  ;;  %v944_v55 = vrot.slane %v930_v45, %v3479_v11  ;;  %3151 = vmatprep.subr.bf16.mxu1 %v3373_v3  ;;  %v3776_v59 = vrot.slane %v3741_v43, %v3479_v11  ;;  %v873_v19 = vcombine.low %v865_v54, %v872_v40 }
  0x39   : > { %3134 = vmatpush3.bf16.msra.mxu0 %v3620_v38  ;;  %3135 = vmatprep.mubr.msk.bf16.mxu0 %vm3374_vm1, %v3373_v3  ;;  %v1215_v60 = vcombine.low %v3749_v48, %v3772_v58  ;;  %v3785_v26 = vrot.slane %v3749_v48, %v3479_v11  ;;  %v1313_v61 = vshrl.u32 %v3761_v52, 16  ;;  %v1088_v62 = vcombine.low %v3661_v57, %v1087_v44 }
  0x3a   : > { %3145 = vmatprep.subr.bf16.mxu0 %v3373_v3  ;;  %v945_v63 = vcombine.low %v937_v46, %v944_v55  ;;  %v1144_v38 = vcombine.low %v3734_v24, %v1141_v49  ;;  %v1287_v0 = vcombine.high %v3761_v52, %v3761_v52  ;;  %v3794_v1 = vrot.slane %v1214_v50, %v3479_v11 }
  0x3b   : > { %v3798_v20 = vrot.slane %v3772_v58, %v3479_v11  ;;  %v1295_v2 = vcombine.high %v3776_v59, %v3776_v59  ;;  %v3804_v57 = vcombine.high %v3785_v26, %v3785_v26  ;;  %v1315_v4 = vrot.slane %v1313_v61, 6 }
  0x3c   : > { %v1316_v21 = vshll.u32 %v3761_v52, 16  ;;  %v1327_v27 = vshrl.u32 %v3776_v59, 16  ;;  %v1330_v22 = vshll.u32 %v3776_v59, 16  ;;  %v3811_v28 = vrot.slane %v1215_v60, %v3479_v11 }
  0x3d   : > { %v3815_v5 = vcombine.high %v3798_v20, %v3798_v20  ;;  %v1341_v30 = vshrl.u32 %v3785_v26, 16  ;;  %v1344_v14 = vshll.u32 %v3785_v26, 16  ;;  %v1322_v16 = vshll.u32 %v1287_v0, 16 }
  0x3e   : > { %3142 = vmatmul.mubr.msk.bf16.vlgmr.msra.gmra.mrb[8].mxu1 %vm560_vm13, %v945_v63  ;;  %v1318_v15 = vrot.slane %v1316_v21, 7  ;;  %v1329_v17 = vrot.slane %v1327_v27, 6  ;;  %v1332_v18 = vrot.slane %v1330_v22, 7  ;;  %v1336_v6 = vshll.u32 %v1295_v2, 16 }
  0x3f   : > { %3152 = vmatpush3.bf16.msra.mxu1 %v1093_v41  ;;  %3153 = vmatprep.mubr.msk.bf16.mxu1 %vm3374_vm1, %v3373_v3  ;;  %v1343_v12 = vrot.slane %v1341_v30, 6  ;;  %v1346_v7 = vrot.slane %v1344_v14, 7  ;;  %v1350_v8 = vshll.u32 %v3804_v57, 16  ;;  %v1355_v29 = vshrl.u32 %v3798_v20, 16 }
  0x40   : > { %3136 = vmatmul.mubr.msk.bf16.vlgmr.msra.gmra.mrb[8].mxu0 %vm560_vm13, %v873_v19  ;;  %3163 = vmatprep.subr.bf16.mxu1 %v3373_v3  ;;  %v1319_v9 = vor.u32 %v1318_v15, %v1315_v4  ;;  %v1333_v10 = vor.u32 %v1332_v18, %v1329_v17  ;;  %v1358_v32 = vshll.u32 %v3798_v20, 16  ;;  %v1364_v36 = vshll.u32 %v3815_v5, 16  ;;  %v3006_v4 = vld [vmem:[%s4325_s3 + $0x14] sm:$0x3] }
  0x41   : > { %3146 = vmatpush3.bf16.msra.mxu0 %v3715_v23  ;;  %3147 = vmatprep.mubr.msk.bf16.mxu0 %vm3374_vm1, %v3373_v3  ;;  %v1347_v35 = vor.u32 %v1346_v7, %v1343_v12  ;;  %v3008_v37 = vrot.slane %v3761_v52, 9  ;;  %v1438_v39 = vrot.slane %v1287_v0, 7  ;;  %v3840_v54 = vrot.slane %v1144_v38, %v3479_v11 }
  0x42   : > { %3157 = vmatprep.subr.bf16.mxu0 %v3373_v3  ;;  %v1324_v40 = vrot.slane %v1322_v16, 7  ;;  %v1357_v24 = vrot.slane %v1355_v29, 6  ;;  %v1360_v41 = vrot.slane %v1358_v32, 7  ;;  %v1320_v42 = vrot.slane %v1319_v9, 2 }
  0x43   : > { %v1334_v44 = vrot.slane %v1333_v10, 2  ;;  %v1338_v23 = vrot.slane %v1336_v6, 7  ;;  %v3009_v31 = vrot.slane %v3776_v59, 9  ;;  %v1348_v45 = vrot.slane %v1347_v35, 2  ;;  %v3014_v35 = vld [vmem:[%s4325_s3 + $0x18] sm:$0x3] }
  0x44   : > { %v1352_v46 = vrot.slane %v1350_v8, 7  ;;  %v1361_v49 = vor.u32 %v1360_v41, %v1357_v24  ;;  %v1442_v50 = vrot.slane %v1295_v2, 7  ;;  %v1366_v52 = vrot.slane %v1364_v36, 7  ;;  %v3874_v2 = vld [vmem:[%s3706_s22 + $0x10] sm:$0x7] }
  0x45   : > { %v1439_v55 = vsel %vm3645_vm2, %v3008_v37, %v1438_v39  ;;  %v3010_v19 = vrot.slane %v3785_v26, 9  ;;  %v1446_v60 = vrot.slane %v3804_v57, 7  ;;  %v3011_v63 = vrot.slane %v3798_v20, 9 }
  0x46   : > { %3154 = vmatmul.mubr.msk.bf16.vlgmr.msra.gmra.mrb[12].mxu1 %vm560_vm13, %v1088_v62  ;;  %v1362_v59 = vrot.slane %v1361_v49, 2  ;;  %v3856_v61 = vsel %vm3645_vm2, %v3009_v31, %v1442_v50  ;;  %v1450_v38 = vrot.slane %v3815_v5, 7  ;;  %v1325_v26 = vsel %vm3568_vm12, %v1320_v42, %v1324_v40 }
  0x47   : > { %3164 = vmatpush3.bf16.msra.mxu1 %v3769_v56  ;;  %3165 = vmatprep.mubr.msk.bf16.mxu1 %vm3374_vm1, %v3373_v3  ;;  %v3867_v62 = vsel %vm3568_vm12, %v1334_v44, %v1338_v23  ;;  %v3871_v0 = vsel %vm3645_vm2, %v3010_v19, %v1446_v60  ;;  %v3012_v56 = vld [vmem:[%s4325_s3 + $0x16] sm:$0x3]  ;;  %v3887_v20 = vsel %vm3568_vm12, %v1348_v45, %v1352_v46  ;;  %v1391_v17 = vsel %vm564_vm0, %v3006_v4, 0  ;;  %v3976_v19 = vld [vmem:[%s3960_s12] sm:$0x7] }
  0x48   : > { %3148 = vmatmul.mubr.msk.bf16.vlgmr.msra.gmra.mrb[12].mxu0 %vm560_vm13, %v1006_v53  ;;  %3175 = vmatprep.subr.bf16.mxu1 %v3373_v3  ;;  %v3891_v57 = vsel %vm3645_vm2, %v3011_v63, %v1450_v38  ;;  %v3898_v47 = vsel %vm3568_vm12, %v1362_v59, %v1366_v52  ;;  %v1454_v33 = vcombine.low %v1439_v55, %v3856_v61  ;;  %v1475_v5 = vsel %vm564_vm0, %v3012_v56, 0  ;;  %v3019_v59 = vld [vmem:[%s4325_s3 + $0x1c] sm:$0x3] }
  0x49   : > { %3158 = vmatpush3.bf16.msra.mxu0 %v3755_v13  ;;  %3159 = vmatprep.mubr.msk.bf16.mxu0 %vm3374_vm1, %v3373_v3  ;;  %v1455_v53 = vcombine.low %v3871_v0, %v3891_v57  ;;  %v1230_v13 = vcombine.low %v3794_v1, %v3811_v28  ;;  %v1370_v21 = vcombine.low %v1325_v26, %v3867_v62  ;;  %v1207_v1 = vld [vmem:[%s3706_s22 + $0x14] sm:$0x7]  ;;  %v1544_v23 = vsel %vm564_vm0, %v3014_v35, 0  ;;  %v3021_v26 = vld [vmem:[%s4325_s3 + $0x1e] sm:$0x3] }
  0x4a   : > { %3169 = vmatprep.subr.bf16.mxu0 %v3373_v3  ;;  %v1595_v27 = vrot.slane %v3874_v2, %v3479_v11  ;;  %v1152_v22 = vcombine.low %v3723_v34, %v3840_v54  ;;  %v1371_v30 = vcombine.low %v3887_v20, %v3898_v47  ;;  %v1462_v18 = vrot.slane %v1454_v33, %v3479_v11 }
  0x4b   : > { %v3924_v6 = vrot.slane %v1455_v53, %v3479_v11  ;;  %v1378_v34 = vrot.slane %v1370_v21, %v3479_v11  ;;  %v1523_v9 = vcombine.low %v3741_v43, %v3749_v48  ;;  %v1524_v10 = vcombine.low %v3772_v58, %v3874_v2  ;;  %v3016_v43 = vld [vmem:[%s4325_s3 + $0x1a] sm:$0x3]  ;;  %v4003_v53 = vld [vmem:[%s3960_s12 + $0x8] sm:$0x7] }
  0x4c   : > { %v1596_v14 = vcombine.high %v1595_v27, %v1595_v27  ;;  %v1598_v15 = vshrl.u32 %v1595_v27, 16  ;;  %v1601_v16 = vshll.u32 %v1595_v27, 16  ;;  %v3936_v29 = vrot.slane %v1207_v1, %v3479_v11 }
  0x4d   : > { %v3940_v32 = vrot.slane %v1371_v30, %v3479_v11  ;;  %v1613_v36 = vcombine.low %v3867_v62, %v3887_v20  ;;  %v1470_v37 = vcombine.low %v1462_v18, %v3924_v6  ;;  %v3018_v39 = vrot.slane %v1595_v27, 9 }
  0x4e   : > { %3166 = vmatmul.mubr.msk.bf16.vlgmr.msra.gmra.mrb[16].mxu1 %vm560_vm13, %v1230_v13  ;;  %v1600_v12 = vrot.slane %v1598_v15, 6  ;;  %v1603_v7 = vrot.slane %v1601_v16, 7  ;;  %v1607_v8 = vshll.u32 %v1596_v14, 16  ;;  %v1819_v54 = vcombine.high %v3936_v29, %v3936_v29 }
  0x4f   : > { %3176 = vmatpush3.bf16.msra.mxu1 %v1475_v5  ;;  %3177 = vmatprep.mubr.msk.bf16.mxu1 %vm3374_vm1, %v3373_v3  ;;  %v1821_v40 = vshrl.u32 %v3936_v29, 16  ;;  %v1681_v41 = vrot.slane %v1596_v14, 7  ;;  %v1754_v42 = vcombine.low %v3874_v2, %v1207_v1  ;;  %v1824_v44 = vshll.u32 %v3936_v29, 16  ;;  %v3991_v2 = vld [vmem:[%s3960_s12 + $0x4] sm:$0x7] }
  0x50   : > { %3160 = vmatmul.mubr.msk.bf16.vlgmr.msra.gmra.mrb[16].mxu0 %vm560_vm13, %v1152_v22  ;;  %3187 = vmatprep.subr.bf16.mxu1 %v3373_v3  ;;  %v1604_v48 = vor.u32 %v1603_v7, %v1600_v12  ;;  %v1609_v58 = vrot.slane %v1607_v8, 7  ;;  %v1634_v31 = vsel %vm564_vm0, %v3016_v43, 0  ;;  %v1830_v46 = vshll.u32 %v1819_v54, 16  ;;  %v4017_v5 = vld [vmem:[%s3960_s12 + $0xc] sm:$0x7] }
  0x51   : > { %3170 = vmatpush3.bf16.msra.mxu0 %v1391_v17  ;;  %3171 = vmatprep.mubr.msk.bf16.mxu0 %vm3374_vm1, %v3373_v3  ;;  %v1823_v45 = vrot.slane %v1821_v40, 6  ;;  %v1386_v49 = vcombine.low %v1378_v34, %v3940_v32  ;;  %v3969_v50 = vrot.slane %v1523_v9, %v3479_v11  ;;  %v1826_v55 = vrot.slane %v1824_v44, 7 }
  0x52   : > { %3181 = vmatprep.subr.bf16.mxu0 %v3373_v3  ;;  %v1605_v24 = vrot.slane %v1604_v48, 2  ;;  %v1538_v60 = vrot.slane %v1524_v10, %v3479_v11  ;;  %v1621_v38 = vrot.slane %v1613_v36, %v3479_v11  ;;  %v1685_v62 = vcombine.low %v3856_v61, %v3871_v0 }
  0x53   : > { %v3996_v56 = vsel %vm3645_vm2, %v3018_v39, %v1681_v41  ;;  %v3999_v20 = vrot.slane %v1754_v42, %v3479_v11  ;;  %v3025_v33 = vrot.slane %v3936_v29, 9  ;;  %v1832_v0 = vrot.slane %v1830_v46, 7 }
  0x54   : > { %v3973_v52 = vsel %vm3568_vm12, %v1605_v24, %v1609_v58  ;;  %v1896_v4 = vrot.slane %v1819_v54, 7  ;;  %v4010_v13 = vrot.slane %v3976_v19, %v3479_v11  ;;  %v1706_v21 = vsel %vm564_vm0, %v3019_v59, 0 }
  0x55   : > { %v1614_v63 = vcombine.low %v3898_v47, %v3973_v52  ;;  %v1827_v47 = vor.u32 %v1826_v55, %v1823_v45  ;;  %v1767_v27 = vsel %vm564_vm0, %v3021_v26, 0  ;;  %v4021_v30 = vrot.slane %v3991_v2, %v3479_v11 }
  0x56   : > { %3178 = vmatmul.mubr.msk.bf16.vlgmr.msra.gmra.mrb[20].mxu1 %vm560_vm13, %v1470_v37  ;;  %v1539_v14 = vcombine.low %v3969_v50, %v1538_v60  ;;  %v4027_v15 = vrot.slane %v1685_v62, %v3479_v11  ;;  %v4031_v16 = vrot.slane %v4003_v53, %v3479_v11  ;;  %v2069_v1 = vshrl.u32 %v4010_v13, 16 }
  0x57   : > { %3188 = vmatpush3.bf16.msra.mxu1 %v1634_v31  ;;  %3189 = vmatprep.mubr.msk.bf16.mxu1 %vm3374_vm1, %v3373_v3  ;;  %v1628_v61 = vrot.slane %v1614_v63, %v3479_v11  ;;  %v1828_v22 = vrot.slane %v1827_v47, 2  ;;  %v1686_v18 = vcombine.low %v3891_v57, %v3996_v56  ;;  %v1762_v34 = vcombine.low %v3811_v28, %v3999_v20 }
  0x58   : > { %3172 = vmatmul.mubr.msk.bf16.vlgmr.msra.gmra.mrb[20].mxu0 %vm560_vm13, %v1386_v49  ;;  %3199 = vmatprep.subr.bf16.mxu1 %v3373_v3  ;;  %v4041_v12 = vcombine.high %v4010_v13, %v4010_v13  ;;  %v1897_v8 = vsel %vm3645_vm2, %v3025_v33, %v1896_v4  ;;  %v4049_v9 = vrot.slane %v4017_v5, %v3479_v11  ;;  %v2071_v10 = vrot.slane %v2069_v1, 6  ;;  %v3026_v49 = vld [vmem:[%s4325_s3 + $0x22] sm:$0x3] }
  0x59   : > { %3182 = vmatpush3.bf16.msra.mxu0 %v1544_v23  ;;  %3183 = vmatprep.mubr.msk.bf16.mxu0 %vm3374_vm1, %v3373_v3  ;;  %v1629_v17 = vcombine.low %v1621_v38, %v1628_v61  ;;  %v1833_v7 = vsel %vm3568_vm12, %v1828_v22, %v1832_v0  ;;  %v4053_v57 = vcombine.high %v4021_v30, %v4021_v30  ;;  %v2072_v29 = vshll.u32 %v4010_v13, 16 }
  0x5a   : > { %3193 = vmatprep.subr.bf16.mxu0 %v3373_v3  ;;  %v4057_v28 = vcombine.high %v4031_v16, %v4031_v16  ;;  %v2083_v35 = vshrl.u32 %v4021_v30, 16  ;;  %v4063_v43 = vcombine.high %v4049_v9, %v4049_v9  ;;  %v2078_v48 = vshll.u32 %v4041_v12, 16 }
  0x5b   : > { %v2086_v58 = vshll.u32 %v4021_v30, 16  ;;  %v2097_v36 = vshrl.u32 %v4031_v16, 16  ;;  %v2074_v37 = vrot.slane %v2072_v29, 7  ;;  %v2092_v54 = vshll.u32 %v4053_v57, 16 }
  0x5c   : > { %v2085_v39 = vrot.slane %v2083_v35, 6  ;;  %v2100_v40 = vshll.u32 %v4031_v16, 16  ;;  %v1700_v24 = vrot.slane %v1686_v18, %v3479_v11  ;;  %v1900_v41 = vcombine.low %v3996_v56, %v1897_v8  ;;  %v3023_v56 = vld [vmem:[%s4325_s3 + $0x20] sm:$0x3]  ;;  %v3030_v18 = vld [vmem:[%s4325_s3 + $0x26] sm:$0x3] }
  0x5d   : > { %v2088_v42 = vrot.slane %v2086_v58, 7  ;;  %v2099_v44 = vrot.slane %v2097_v36, 6  ;;  %v2075_v23 = vor.u32 %v2074_v37, %v2071_v10  ;;  %v2106_v45 = vshll.u32 %v4057_v28, 16  ;;  %v4119_v10 = vld [vmem:[%s3960_s12 + $0x10] sm:$0x7] }
  0x5e   : > { %3190 = vmatmul.mubr.msk.bf16.vlgmr.msra.gmra.mrb[24].mxu1 %vm560_vm13, %v1629_v17  ;;  %v2102_v31 = vrot.slane %v2100_v40, 7  ;;  %v2111_v46 = vshrl.u32 %v4049_v9, 16  ;;  %v1836_v50 = vcombine.low %v3973_v52, %v1833_v7  ;;  %v2114_v60 = vshll.u32 %v4049_v9, 16  ;;  %v3028_v40 = vld [vmem:[%s4325_s3 + $0x24] sm:$0x3] }
  0x5f   : > { %3200 = vmatpush3.bf16.msra.mxu1 %v1767_v27  ;;  %3201 = vmatprep.mubr.msk.bf16.mxu1 %vm3374_vm1, %v3373_v3  ;;  %v2089_v55 = vor.u32 %v2088_v42, %v2085_v39  ;;  %v2120_v59 = vshll.u32 %v4063_v43, 16  ;;  %v2080_v63 = vrot.slane %v2078_v48, 7  ;;  %v2094_v38 = vrot.slane %v2092_v54, 7 }
  0x60   : > { %3184 = vmatmul.mubr.msk.bf16.vlgmr.msra.gmra.mrb[24].mxu0 %vm560_vm13, %v1539_v14  ;;  %3211 = vmatprep.subr.bf16.mxu1 %v3373_v3  ;;  %v2103_v26 = vor.u32 %v2102_v31, %v2099_v44  ;;  %v2113_v62 = vrot.slane %v2111_v46, 6  ;;  %v2076_v20 = vrot.slane %v2075_v23, 2  ;;  %v2108_v33 = vrot.slane %v2106_v45, 7 }
  0x61   : > { %3194 = vmatpush3.bf16.msra.mxu0 %v1706_v21  ;;  %3195 = vmatprep.mubr.msk.bf16.mxu0 %vm3374_vm1, %v3373_v3  ;;  %v2090_v47 = vrot.slane %v2089_v55, 2  ;;  %v2116_v61 = vrot.slane %v2114_v60, 7  ;;  %v1701_v52 = vcombine.low %v4027_v15, %v1700_v24  ;;  %v1913_v0 = vsel %vm564_vm0, %v3026_v49, 0 }
  0x62   : > { %3205 = vmatprep.subr.bf16.mxu0 %v3373_v3  ;;  %v2104_v4 = vrot.slane %v2103_v26, 2  ;;  %v1970_v21 = vcombine.low %v3976_v19, %v3991_v2  ;;  %v1971_v27 = vcombine.low %v4003_v53, %v4017_v5  ;;  %v2122_v14 = vrot.slane %v2120_v59, 7  ;;  %v3038_v59 = vld [vmem:[%s4325_s3 + $0x2a] sm:$0x3] }
  0x63   : > { %v2117_v22 = vor.u32 %v2116_v61, %v2113_v62  ;;  %v1849_v1 = vsel %vm564_vm0, %v3023_v56, 0  ;;  %v1843_v17 = vrot.slane %v1836_v50, %v3479_v11  ;;  %v1907_v15 = vrot.slane %v1900_v41, %v3479_v11  ;;  %v4154_v50 = vld [vmem:[%s3960_s12 + $0x14] sm:$0x7]  ;;  %v3036_v61 = vld [vmem:[%s4325_s3 + $0x28] sm:$0x3]  ;;  %s2978_s12 = sshll.u32 %s417_s9, 3 }
  0x64   : > { %v2081_v19 = vsel %vm3568_vm12, %v2076_v20, %v2080_v63  ;;  %v4110_v7 = vsel %vm3568_vm12, %v2090_v47, %v2094_v38  ;;  %v2147_v29 = vsel %vm564_vm0, %v3030_v18, 0  ;;  %v4125_v35 = vrot.slane %v1970_v21, %v3479_v11  ;;  %s419_s16 = scalar_lea.vmem %s4327_s5, %s2978_s12 }
  0x65   : > { %v2118_v8 = vrot.slane %v2117_v22, 2  ;;  %v4128_v48 = vrot.slane %v1971_v27, %v3479_v11  ;;  %v1844_v36 = vcombine.low %v3940_v32, %v1843_v17  ;;  %v1908_v37 = vcombine.low %v3924_v6, %v1907_v15 }
  0x66   : > { %3202 = vmatmul.mubr.msk.bf16.vlgmr.msra.gmra.mrb[28].mxu1 %vm560_vm13, %v1762_v34  ;;  %v4114_v34 = vsel %vm3568_vm12, %v2104_v4, %v2108_v33  ;;  %v2126_v39 = vcombine.low %v2081_v19, %v4110_v7  ;;  %v3032_v24 = vrot.slane %v4010_v13, 9  ;;  %v2194_v41 = vrot.slane %v4041_v12, 7 }
  0x67   : > { %3212 = vmatpush3.bf16.msra.mxu1 %v1913_v0  ;;  %3213 = vmatprep.mubr.msk.bf16.mxu1 %vm3374_vm1, %v3373_v3  ;;  %v4132_v58 = vsel %vm3568_vm12, %v2118_v8, %v2122_v14  ;;  %v3033_v42 = vrot.slane %v4021_v30, 9  ;;  %v2351_v32 = vrot.slane %v4119_v10, %v3479_v11  ;;  %v2198_v6 = vrot.slane %v4053_v57, 7 }
  0x68   : > { %3196 = vmatmul.mubr.msk.bf16.vlgmr.msra.gmra.mrb[28].mxu0 %vm560_vm13, %v1701_v52  ;;  %3223 = vmatprep.subr.bf16.mxu1 %v3373_v3  ;;  %v2127_v54 = vcombine.low %v4114_v34, %v4132_v58  ;;  %v3034_v44 = vrot.slane %v4031_v16, 9  ;;  %v2202_v23 = vrot.slane %v4057_v28, 7  ;;  %v3035_v31 = vrot.slane %v4049_v9, 9 }
  0x69   : > { %3206 = vmatpush3.bf16.msra.mxu0 %v1849_v1  ;;  %3207 = vmatprep.mubr.msk.bf16.mxu0 %vm3374_vm1, %v3373_v3  ;;  %v2206_v45 = vrot.slane %v4063_v43, 7  ;;  %v2352_v46 = vcombine.high %v2351_v32, %v2351_v32  ;;  %v2354_v49 = vshrl.u32 %v2351_v32, 16  ;;  %v2357_v13 = vshll.u32 %v2351_v32, 16 }
  0x6a   : > { %3217 = vmatprep.subr.bf16.mxu0 %v3373_v3  ;;  %v1991_v30 = vsel %vm564_vm0, %v3028_v40, 0  ;;  %v2134_v12 = vrot.slane %v2126_v39, %v3479_v11  ;;  %v4160_v57 = vrot.slane %v2127_v54, %v3479_v11  ;;  %v1986_v16 = vcombine.low %v4125_v35, %v4128_v48 }
  0x6b   : > { %v2356_v9 = vrot.slane %v2354_v49, 6  ;;  %v2359_v28 = vrot.slane %v2357_v13, 7  ;;  %v2195_v43 = vsel %vm3645_vm2, %v3032_v24, %v2194_v41  ;;  %v2199_v55 = vsel %vm3645_vm2, %v3033_v42, %v2198_v6  ;;  %v3040_v41 = vld [vmem:[%s4325_s3 + $0x2c] sm:$0x3] }
  0x6c   : > { %v4174_v60 = vrot.slane %v4154_v50, %v3479_v11  ;;  %v2203_v63 = vsel %vm3645_vm2, %v3034_v44, %v2202_v23  ;;  %v2207_v38 = vsel %vm3645_vm2, %v3035_v31, %v2206_v45  ;;  %v2363_v62 = vshll.u32 %v2352_v46, 16 }
  0x6d   : > { %v2360_v26 = vor.u32 %v2359_v28, %v2356_v9  ;;  %v2142_v56 = vcombine.low %v2134_v12, %v4160_v57  ;;  %v2279_v20 = vcombine.low %v3991_v2, %v4003_v53  ;;  %v2280_v47 = vcombine.low %v4017_v5, %v4119_v10  ;;  %v3045_v12 = vld [vmem:[%s4325_s3 + $0x30] sm:$0x3] }
  0x6e   : > { %3214 = vmatmul.mubr.msk.bf16.vlgmr.msra.gmra.mrb[32].mxu1 %vm560_vm13, %v1908_v37  ;;  %v2577_v33 = vshrl.u32 %v4174_v60, 16  ;;  %v3042_v52 = vrot.slane %v2351_v32, 9  ;;  %v2437_v0 = vrot.slane %v2352_v46, 7  ;;  %v4197_v4 = vcombine.high %v4174_v60, %v4174_v60  ;;  %v3043_v37 = vld [vmem:[%s4325_s3 + $0x2e] sm:$0x3] }
  0x6f   : > { %3224 = vmatpush3.bf16.msra.mxu1 %v2147_v29  ;;  %3225 = vmatprep.mubr.msk.bf16.mxu1 %vm3374_vm1, %v3373_v3  ;;  %v2580_v21 = vshll.u32 %v4174_v60, 16  ;;  %v2300_v27 = vsel %vm564_vm0, %v3038_v59, 0  ;;  %v2210_v2 = vcombine.low %v2195_v43, %v2199_v55  ;;  %v2211_v53 = vcombine.low %v2203_v63, %v2207_v38 }
  0x70   : > { %3208 = vmatmul.mubr.msk.bf16.vlgmr.msra.gmra.mrb[32].mxu0 %vm560_vm13, %v1844_v36  ;;  %3235 = vmatprep.subr.bf16.mxu1 %v3373_v3  ;;  %v2579_v22 = vrot.slane %v2577_v33, 6  ;;  %v2361_v5 = vrot.slane %v2360_v26, 2  ;;  %v2365_v14 = vrot.slane %v2363_v62, 7  ;;  %v2231_v17 = vsel %vm564_vm0, %v3036_v61, 0 }
  0x71   : > { %3218 = vmatpush3.bf16.msra.mxu0 %v1991_v30  ;;  %3219 = vmatprep.mubr.msk.bf16.mxu0 %vm3374_vm1, %v3373_v3  ;;  %v2582_v1 = vrot.slane %v2580_v21, 7  ;;  %v2287_v15 = vrot.slane %v2279_v20, %v3479_v11  ;;  %v2294_v18 = vrot.slane %v2280_v47, %v3479_v11  ;;  %v4209_v19 = vsel %vm3645_vm2, %v3042_v52, %v2437_v0 }
  0x72   : > { %3229 = vmatprep.subr.bf16.mxu0 %v3373_v3  ;;  %v2586_v29 = vshll.u32 %v4197_v4, 16  ;;  %v2218_v35 = vrot.slane %v2210_v2, %v3479_v11  ;;  %v4215_v36 = vrot.slane %v2211_v53, %v3479_v11  ;;  %v2366_v39 = vsel %vm3568_vm12, %v2361_v5, %v2365_v14 }
  0x73   : > { %v2583_v8 = vor.u32 %v2582_v1, %v2579_v22  ;;  %v2295_v54 = vcombine.low %v2287_v15, %v2294_v18  ;;  %v2441_v40 = vcombine.low %v2199_v55, %v2203_v63  ;;  %v2442_v24 = vcombine.low %v2207_v38, %v4209_v19 }
  0x74   : > { %v2588_v32 = vrot.slane %v2586_v29, 7  ;;  %v2226_v6 = vcombine.low %v2218_v35, %v4215_v36  ;;  %v2462_v44 = vsel %vm564_vm0, %v3043_v37, 0  ;;  %v2369_v23 = vcombine.low %v4110_v7, %v4114_v34 }
  0x75   : > { %v2584_v42 = vrot.slane %v2583_v8, 2  ;;  %v2370_v31 = vcombine.low %v4132_v58, %v2366_v39  ;;  %v2390_v45 = vsel %vm564_vm0, %v3040_v41, 0  ;;  %v2449_v46 = vrot.slane %v2441_v40, %v3479_v11  ;;  %v3047_v58 = vld [vmem:[%s4325_s3 + $0x32] sm:$0x3] }
  0x76   : > { %3226 = vmatmul.mubr.msk.bf16.vlgmr.msra.gmra.mrb[36].mxu1 %vm560_vm13, %v2142_v56  ;;  %v2456_v49 = vrot.slane %v2442_v24, %v3479_v11  ;;  %v2377_v7 = vrot.slane %v2369_v23, %v3479_v11  ;;  %v2605_v9 = vsel %vm564_vm0, %v3047_v58, 0  ;;  %v2510_v28 = vcombine.low %v4119_v10, %v4154_v50 }
  0x77   : > { %3236 = vmatpush3.bf16.msra.mxu1 %v2300_v27  ;;  %3237 = vmatprep.mubr.msk.bf16.mxu1 %vm3374_vm1, %v3373_v3  ;;  %v2589_v13 = vsel %vm3568_vm12, %v2584_v42, %v2588_v32  ;;  %v2384_v34 = vrot.slane %v2370_v31, %v3479_v11  ;;  %v3049_v43 = vrot.slane %v4174_v60, 9  ;;  %v2652_v55 = vrot.slane %v4197_v4, 7  ;;  %v3050_v60 = vld [vmem:[%s4325_s3 + $0x34] sm:$0x3] }
  0x78   : > { %3220 = vmatmul.mubr.msk.bf16.vlgmr.msra.gmra.mrb[36].mxu0 %vm560_vm13, %v1986_v16  ;;  %3247 = vmatprep.subr.bf16.mxu1 %v3373_v3  ;;  %v2457_v51 = vcombine.low %v2449_v46, %v2456_v49  ;;  %v2592_v30 = vcombine.low %v2366_v39, %v2589_v13  ;;  %v2523_v59 = vsel %vm564_vm0, %v3045_v12, 0  ;;  %v2517_v38 = vrot.slane %v2510_v28, %v3479_v11 }
  0x79   : > { %3230 = vmatpush3.bf16.msra.mxu0 %v2231_v17  ;;  %3231 = vmatprep.mubr.msk.bf16.mxu0 %vm3374_vm1, %v3373_v3  ;;  %v2385_v16 = vcombine.low %v2377_v7, %v2384_v34  ;;  %v2653_v10 = vsel %vm3645_vm2, %v3049_v43, %v2652_v55  ;;  %v2669_v56 = vsel %vm564_vm0, %v3050_v60, 0 }
  0x7a   : > { %3241 = vmatprep.subr.bf16.mxu0 %v3373_v3  ;;  %v2599_v63 = vrot.slane %v2592_v30, %v3479_v11  ;;  %v2518_v26 = vcombine.low %v4128_v48, %v2517_v38  ;;  %v2656_v62 = vcombine.low %v4209_v19, %v2653_v10 }
  0x7c   : > { %v2600_v50 = vcombine.low %v4160_v57, %v2599_v63  ;;  %v2663_v25 = vrot.slane %v2656_v62, %v3479_v11 }
  0x7e   : > { %3238 = vmatmul.mubr.msk.bf16.vlgmr.msra.gmra.mrb[40].mxu1 %vm560_vm13, %v2295_v54  ;;  %v2664_v57 = vcombine.low %v4215_v36, %v2663_v25 }
  0x7f   : > { %3248 = vmatpush3.bf16.msra.mxu1 %v2462_v44  ;;  %3249 = vmatprep.mubr.msk.bf16.mxu1 %vm3374_vm1, %v3373_v3 }
  0x80   : > { %3232 = vmatmul.mubr.msk.bf16.vlgmr.msra.gmra.mrb[40].mxu0 %vm560_vm13, %v2226_v6  ;;  %3259 = vmatprep.subr.bf16.mxu1 %v3373_v3 }
  0x81   : > { %3242 = vmatpush3.bf16.msra.mxu0 %v2390_v45  ;;  %3243 = vmatprep.mubr.msk.bf16.mxu0 %vm3374_vm1, %v3373_v3 }
  0x82   : > { %3253 = vmatprep.subr.bf16.mxu0 %v3373_v3 }
  0x86   : > { %3250 = vmatmul.mubr.msk.bf16.vlgmr.msra.gmra.mrb[44].mxu1 %vm560_vm13, %v2457_v51 }
  0x87   : > { %3260 = vmatpush3.bf16.msra.mxu1 %v2605_v9  ;;  %3261 = vmatprep.mubr.msk.bf16.mxu1 %vm3374_vm1, %v3373_v3 }
  0x88   : > { %3244 = vmatmul.mubr.msk.bf16.vlgmr.msra.gmra.mrb[44].mxu0 %vm560_vm13, %v2385_v16 }
  0x89   : > { %3254 = vmatpush3.bf16.msra.mxu0 %v2523_v59  ;;  %3255 = vmatprep.mubr.msk.bf16.mxu0 %vm3374_vm1, %v3373_v3 }
  0x8a   : > { %3265 = vmatprep.subr.bf16.mxu0 %v3373_v3 }
  0x8e   : > { %3262 = vmatmul.mubr.msk.bf16.vlgmr.msra.gmra.mrb[48].mxu1 %vm560_vm13, %v2600_v50 }
  0x90   : > { %3256 = vmatmul.mubr.msk.bf16.vlgmr.msra.gmra.mrb[48].mxu0 %vm560_vm13, %v2518_v26 }
  0x91   : > { %3266 = vmatpush3.bf16.msra.mxu0 %v2669_v56  ;;  %3267 = vmatprep.mubr.msk.bf16.mxu0 %vm3374_vm1, %v3373_v3 }
  0x98   : > { %3268 = vmatmul.mubr.msk.bf16.vlgmr.msra.gmra.mrb[52].mxu0 %vm560_vm13, %v2664_v57 }
  0xff   : > { %v666_v20 = vpop.f32.mrb[0].mxu1 }
 0x100   : > { %v3119_v48 = vpop.f32.mrb[1].mxu1 }
 0x101   : > { %v669_v47 = vpop.f32.mrb[2].mxu1 }
 0x102   : > { %v3120_v61 = vpop.f32.mrb[3].mxu1 }
 0x103   : > { %v602_v33 = vpop.f32.mrb[0].mxu0 }
 0x104   : > { %v667_v52 = vadd.f32 %v666_v20, %v602_v33  ;;  %v3113_v0 = vpop.f32.mrb[1].mxu0 }
 0x105   : > { %v605_v4 = vpop.f32.mrb[2].mxu0 }
 0x106   : > { %v670_v21 = vadd.f32 %v669_v47, %v605_v4  ;;  %v3114_v27 = vpop.f32.mrb[3].mxu0 }
 0x109   : > { %v824_v2 = vpop.f32.mrb[4].mxu1 }
 0x10a   : > { %v3131_v11 = vpop.f32.mrb[5].mxu1 }
 0x10b   : > { %v755_v53 = vpop.f32.mrb[4].mxu0  ;;  %v827_v22 = vpop.f32.mrb[6].mxu1 }
 0x10c   : > { %v762_v5 = vadd.f32 %v755_v53, %v667_v52  ;;  %v3125_v3 = vpop.f32.mrb[5].mxu0  ;;  %v3132_v14 = vpop.f32.mrb[7].mxu1 }
 0x10d   : > { %v758_v1 = vpop.f32.mrb[6].mxu0 }
 0x10e   : > { %v763_v17 = vadd.f32 %v758_v1, %v670_v21  ;;  %v831_v15 = vadd.f32 %v824_v2, %v762_v5  ;;  %v3126_v18 = vpop.f32.mrb[7].mxu0 }
 0x110   : > { %v832_v19 = vadd.f32 %v827_v22, %v763_v17 }
 0x111   : > { %v986_v8 = vpop.f32.mrb[8].mxu1 }
 0x112   : > { %v3143_v29 = vpop.f32.mrb[9].mxu1 }
 0x113   : > { %v914_v35 = vpop.f32.mrb[8].mxu0  ;;  %v989_v36 = vpop.f32.mrb[10].mxu1 }
 0x114   : > { %v921_v37 = vadd.f32 %v914_v35, %v831_v15  ;;  %v3137_v39 = vpop.f32.mrb[9].mxu0  ;;  %v3144_v54 = vpop.f32.mrb[11].mxu1 }
 0x115   : > { %v917_v40 = vpop.f32.mrb[10].mxu0 }
 0x116   : > { %v922_v24 = vadd.f32 %v917_v40, %v832_v19  ;;  %v993_v41 = vadd.f32 %v986_v8, %v921_v37  ;;  %v3138_v42 = vpop.f32.mrb[11].mxu0 }
 0x118   : > { %v994_v32 = vadd.f32 %v989_v36, %v922_v24 }
 0x119   : > { %v1129_v6 = vpop.f32.mrb[12].mxu1 }
 0x11a   : > { %v3155_v44 = vpop.f32.mrb[13].mxu1 }
 0x11b   : > { %v1047_v23 = vpop.f32.mrb[12].mxu0  ;;  %v1132_v31 = vpop.f32.mrb[14].mxu1 }
 0x11c   : > { %v1054_v45 = vadd.f32 %v1047_v23, %v993_v41  ;;  %v3149_v46 = vpop.f32.mrb[13].mxu0  ;;  %v3156_v49 = vpop.f32.mrb[15].mxu1 }
 0x11d   : > { %v1050_v13 = vpop.f32.mrb[14].mxu0 }
 0x11e   : > { %v1055_v7 = vadd.f32 %v1050_v13, %v994_v32  ;;  %v1136_v34 = vadd.f32 %v1129_v6, %v1054_v45  ;;  %v3150_v58 = vpop.f32.mrb[15].mxu0 }
 0x120   : > { %v1137_v51 = vadd.f32 %v1132_v31, %v1055_v7 }
 0x121   : > { %v1271_v30 = vpop.f32.mrb[16].mxu1 }
 0x122   : > { %v3167_v12 = vpop.f32.mrb[17].mxu1 }
 0x123   : > { %v1193_v16 = vpop.f32.mrb[16].mxu0  ;;  %v1274_v9 = vpop.f32.mrb[18].mxu1 }
 0x124   : > { %v1200_v28 = vadd.f32 %v1193_v16, %v1136_v34  ;;  %v3161_v43 = vpop.f32.mrb[17].mxu0  ;;  %v3168_v55 = vpop.f32.mrb[19].mxu1 }
 0x125   : > { %v1196_v59 = vpop.f32.mrb[18].mxu0 }
 0x126   : > { %v1201_v63 = vadd.f32 %v1196_v59, %v1137_v51  ;;  %v1278_v38 = vadd.f32 %v1271_v30, %v1200_v28  ;;  %v3162_v10 = vpop.f32.mrb[19].mxu0 }
 0x128   : > { %v1279_v50 = vadd.f32 %v1274_v9, %v1201_v63 }
 0x129   : > { %v1511_v60 = vpop.f32.mrb[20].mxu1 }
 0x12a   : > { %v3179_v26 = vpop.f32.mrb[21].mxu1 }
 0x12b   : > { %v1427_v62 = vpop.f32.mrb[20].mxu0  ;;  %v1514_v56 = vpop.f32.mrb[22].mxu1 }
 0x12c   : > { %v1434_v25 = vadd.f32 %v1427_v62, %v1278_v38  ;;  %v3173_v57 = vpop.f32.mrb[21].mxu0  ;;  %v3180_v20 = vpop.f32.mrb[23].mxu1 }
 0x12d   : > { %v1430_v48 = vpop.f32.mrb[22].mxu0 }
 0x12e   : > { %v1435_v47 = vadd.f32 %v1430_v48, %v1279_v50  ;;  %v1518_v33 = vadd.f32 %v1511_v60, %v1434_v25  ;;  %v3174_v61 = vpop.f32.mrb[23].mxu0 }
 0x130   : > { %v1519_v52 = vadd.f32 %v1514_v56, %v1435_v47 }
 0x131   : > { %v1670_v0 = vpop.f32.mrb[24].mxu1 }
 0x132   : > { %v3191_v4 = vpop.f32.mrb[25].mxu1 }
 0x133   : > { %v1580_v21 = vpop.f32.mrb[24].mxu0  ;;  %v1673_v27 = vpop.f32.mrb[26].mxu1 }
 0x134   : > { %v1587_v2 = vadd.f32 %v1580_v21, %v1518_v33  ;;  %v3185_v11 = vpop.f32.mrb[25].mxu0  ;;  %v3192_v53 = vpop.f32.mrb[27].mxu1 }
 0x135   : > { %v1583_v22 = vpop.f32.mrb[26].mxu0 }
 0x136   : > { %v1588_v5 = vadd.f32 %v1583_v22, %v1519_v52  ;;  %v1677_v3 = vadd.f32 %v1670_v0, %v1587_v2  ;;  %v3186_v14 = vpop.f32.mrb[27].mxu0 }
 0x138   : > { %v1678_v1 = vadd.f32 %v1673_v27, %v1588_v5 }
 0x139   : > { %v1803_v17 = vpop.f32.mrb[28].mxu1 }
 0x13a   : > { %v3203_v15 = vpop.f32.mrb[29].mxu1 }
 0x13b   : > { %v1742_v18 = vpop.f32.mrb[28].mxu0  ;;  %v1806_v19 = vpop.f32.mrb[30].mxu1 }
 0x13c   : > { %v1749_v8 = vadd.f32 %v1742_v18, %v1677_v3  ;;  %v3197_v29 = vpop.f32.mrb[29].mxu0  ;;  %v3204_v35 = vpop.f32.mrb[31].mxu1 }
 0x13d   : > { %v1745_v36 = vpop.f32.mrb[30].mxu0 }
 0x13e   : > { %v1750_v37 = vadd.f32 %v1745_v36, %v1678_v1  ;;  %v1810_v39 = vadd.f32 %v1803_v17, %v1749_v8  ;;  %v3198_v54 = vpop.f32.mrb[31].mxu0 }
 0x140   : > { %v1811_v40 = vadd.f32 %v1806_v19, %v1750_v37 }
 0x141   : > { %v1949_v24 = vpop.f32.mrb[32].mxu1 }
 0x142   : > { %v3215_v41 = vpop.f32.mrb[33].mxu1 }
 0x143   : > { %v1885_v42 = vpop.f32.mrb[32].mxu0  ;;  %v1952_v32 = vpop.f32.mrb[34].mxu1 }
 0x144   : > { %v1892_v6 = vadd.f32 %v1885_v42, %v1810_v39  ;;  %v3209_v44 = vpop.f32.mrb[33].mxu0  ;;  %v3216_v23 = vpop.f32.mrb[35].mxu1  ;;  %v3052_v39 = vld [vmem:[%s4326_s4] ss:$0 sm:$0xff] }
 0x145   : > { %v1888_v31 = vpop.f32.mrb[34].mxu0 }
 0x146   : > { %v1893_v45 = vadd.f32 %v1888_v31, %v1811_v40  ;;  %v1956_v46 = vadd.f32 %v1949_v24, %v1892_v6  ;;  %v3210_v49 = vpop.f32.mrb[35].mxu0 }
 0x148   : > { %v1957_v13 = vadd.f32 %v1952_v32, %v1893_v45 }
 0x149   : > { %v2183_v7 = vpop.f32.mrb[36].mxu1 }
 0x14a   : > { %v3227_v34 = vpop.f32.mrb[37].mxu1 }
 0x14b   : > { %v2027_v58 = vpop.f32.mrb[36].mxu0  ;;  %v2186_v51 = vpop.f32.mrb[38].mxu1 }
 0x14c   : > { %v2034_v30 = vadd.f32 %v2027_v58, %v1956_v46  ;;  %v3221_v12 = vpop.f32.mrb[37].mxu0  ;;  %v3228_v16 = vpop.f32.mrb[39].mxu1 }
 0x14d   : > { %v2030_v9 = vpop.f32.mrb[38].mxu0 }
 0x14e   : > { %v2035_v28 = vadd.f32 %v2030_v9, %v1957_v13  ;;  %v2190_v43 = vadd.f32 %v2183_v7, %v2034_v30  ;;  %v3222_v55 = vpop.f32.mrb[39].mxu0 }
 0x150   : > { %v2191_v59 = vadd.f32 %v2186_v51, %v2035_v28 }
 0x151   : > { %v2336_v63 = vpop.f32.mrb[40].mxu1 }
 0x152   : > { %v3239_v38 = vpop.f32.mrb[41].mxu1 }
 0x153   : > { %v2267_v10 = vpop.f32.mrb[40].mxu0  ;;  %v2339_v50 = vpop.f32.mrb[42].mxu1 }
 0x154   : > { %v2274_v60 = vadd.f32 %v2267_v10, %v2190_v43  ;;  %v3233_v26 = vpop.f32.mrb[41].mxu0  ;;  %v3240_v62 = vpop.f32.mrb[43].mxu1 }
 0x155   : > { %v2270_v56 = vpop.f32.mrb[42].mxu0 }
 0x156   : > { %v2275_v25 = vadd.f32 %v2270_v56, %v2191_v59  ;;  %v2343_v57 = vadd.f32 %v2336_v63, %v2274_v60  ;;  %v3234_v20 = vpop.f32.mrb[43].mxu0 }
 0x158   : > { %v2344_v48 = vadd.f32 %v2339_v50, %v2275_v25 }
 0x159   : > { %v2498_v47 = vpop.f32.mrb[44].mxu1 }
 0x15a   : > { %v3251_v33 = vpop.f32.mrb[45].mxu1 }
 0x15b   : > { %v2426_v61 = vpop.f32.mrb[44].mxu0  ;;  %v2501_v52 = vpop.f32.mrb[46].mxu1 }
 0x15c   : > { %v2433_v0 = vadd.f32 %v2426_v61, %v2343_v57  ;;  %v3245_v4 = vpop.f32.mrb[45].mxu0  ;;  %v3252_v21 = vpop.f32.mrb[47].mxu1 }
 0x15d   : > { %v2429_v27 = vpop.f32.mrb[46].mxu0 }
 0x15e   : > { %v2434_v2 = vadd.f32 %v2429_v27, %v2344_v48  ;;  %v2505_v11 = vadd.f32 %v2498_v47, %v2433_v0  ;;  %v3246_v53 = vpop.f32.mrb[47].mxu0 }
 0x160   : > { %v2506_v22 = vadd.f32 %v2501_v52, %v2434_v2 }
 0x161   : > { %v2641_v5 = vpop.f32.mrb[48].mxu1 }
 0x162   : > { %v3263_v3 = vpop.f32.mrb[49].mxu1 }
 0x163   : > { %v2559_v14 = vpop.f32.mrb[48].mxu0  ;;  %v2644_v1 = vpop.f32.mrb[50].mxu1 }
 0x164   : > { %v2566_v17 = vadd.f32 %v2559_v14, %v2505_v11  ;;  %v3257_v15 = vpop.f32.mrb[49].mxu0  ;;  %v3264_v18 = vpop.f32.mrb[51].mxu1 }
 0x165   : > { %v2562_v19 = vpop.f32.mrb[50].mxu0 }
 0x166   : > { %v2567_v8 = vadd.f32 %v2562_v19, %v2506_v22  ;;  %v2648_v29 = vadd.f32 %v2641_v5, %v2566_v17  ;;  %v3258_v35 = vpop.f32.mrb[51].mxu0 }
 0x168   : > { %v2649_v36 = vadd.f32 %v2644_v1, %v2567_v8 }
 0x16b   : > { %v2705_v37 = vpop.f32.mrb[52].mxu0 }
 0x16c   : > { %v2712_v54 = vadd.f32 %v2705_v37, %v2648_v29  ;;  %v3269_v40 = vpop.f32.mrb[53].mxu0 }
 0x16d   : > { %v2708_v24 = vpop.f32.mrb[54].mxu0 }
 0x16e   : > { %v2721_v41 = vadd.f32 %v3052_v39, %v2712_v54  ;;  %v2713_v42 = vadd.f32 %v2708_v24, %v2649_v36  ;;  %v3270_v32 = vpop.f32.mrb[55].mxu0 }
 0x170   : > { %vm2723_vm0 = vcmp.ge.f32.partialorder %v2721_v41, 0.0  ;;  %v2725_v6 = vmul.f32 0.2, %v2721_v41  ;;  %v2722_v44 = vadd.f32 %v3052_v39, %v2713_v42 }
 0x172   : > { %v2727_v23 = vsel %vm2723_vm0, %v2721_v41, %v2725_v6  ;;  %vm2724_vm1 = vcmp.ge.f32.partialorder %v2722_v44, 0.0  ;;  %v2726_v31 = vmul.f32 0.2, %v2722_v44 }
 0x173   : > { %2729 = vst [vmem:[%s419_s16] sm:$0xff] %v2727_v23  ;;  %v2739_v46 = vmul.f32 %v2727_v23, %v2727_v23 }
 0x174   : > { %v2728_v45 = vsel %vm2724_vm1, %v2722_v44, %v2726_v31 }
 0x175   : > { %2730 = vst [vmem:[%s419_s16 + $0x8] sm:$0xff] %v2728_v45  ;;  %v2731_v49 = vadd.f32 %v2728_v45, %v2727_v23  ;;  %v2740_v13 = vmul.f32 %v2728_v45, %v2728_v45 }
 0x177   : > { %v2732_v7 = vrot.slane %v2731_v49, 4  ;;  %v2741_v34 = vadd.f32 %v2740_v13, %v2739_v46 }
 0x179   : > { %v2733_v58 = vadd.f32 %v2732_v7, %v2731_v49  ;;  %v2742_v51 = vrot.slane %v2741_v34, 4 }
 0x17b   : > { %v2734_v30 = vrot.slane %v2733_v58, 2  ;;  %v2743_v12 = vadd.f32 %v2742_v51, %v2741_v34 }
 0x17d   : > { %v2735_v16 = vadd.f32 %v2734_v30, %v2733_v58  ;;  %v2744_v9 = vrot.slane %v2743_v12, 2 }
 0x17f   : > { %v2736_v28 = vrot.slane %v2735_v16, 1  ;;  %v2745_v43 = vadd.f32 %v2744_v9, %v2743_v12 }
 0x181   : > { %v2737_v55 = vadd.f32 %v2736_v28, %v2735_v16  ;;  %v2746_v59 = vrot.slane %v2745_v43, 1 }
 0x183   : > { %2738 = vst [vmem:[%s426_s21] sm:$0x1] %v2737_v55  ;;  %v2747_v63 = vadd.f32 %v2746_v59, %v2745_v43 }
 0x185   : > { %2748 = vst [vmem:[%s433_s23] sm:$0x1] %v2747_v63 }
 0x186 PF: > { %s18_s28 = sadd.s32 1, %s3371_s28   ;;  %s4340_s24 = smov %s3363_s26 }
 0x187   : > { %p15_p10 = scmp.ge.s32.totalorder %s18_s28, 10   ;;  %s4341_s25 = smov %s3367_s27 }
 0x188   : > { %s4342_s26 = smov %s4345_s29  ;;  %s4343_s27 = smov %s4349_s30 }
 0x189   :  { %17 = sbr.rel (!%p15_p10) target bundleno = 3 (0x3), region = 126 }

// kernel: tile.18
= control target key start
LH: loop header
LB: loop body
LE: loop exit
PB: predicated region body
PF: predicated region fallthrough
CT: control target
= control target key end

     0   :  { %s64_s0 = inlined_call_operand.vmem [shape: f32[8], index: 0, kind: input, shape index: {}]   ;;  %s65_s1 = inlined_call_operand.vmem [shape: f32[64,8], index: 1, kind: output, shape index: {}]  }
   0x1   :  { %v4_v0 = vld [vmem:[%s64_s0] ss:$0 sm:$0xff] }
   0x2   :  { %5 = vst [vmem:[%s65_s1] sm:$0xff] %v4_v0  ;;  %20 = vst [vmem:[%s65_s1 + $0x8] sm:$0xff] %v4_v0 }
   0x3   :  { %21 = vst [vmem:[%s65_s1 + $0x10] sm:$0xff] %v4_v0  ;;  %22 = vst [vmem:[%s65_s1 + $0x18] sm:$0xff] %v4_v0 }
   0x4   :  { %23 = vst [vmem:[%s65_s1 + $0x20] sm:$0xff] %v4_v0  ;;  %24 = vst [vmem:[%s65_s1 + $0x28] sm:$0xff] %v4_v0 }
   0x5   :  { %25 = vst [vmem:[%s65_s1 + $0x30] sm:$0xff] %v4_v0  ;;  %26 = vst [vmem:[%s65_s1 + $0x38] sm:$0xff] %v4_v0 }

// kernel: tile.19
= control target key start
LH: loop header
LB: loop body
LE: loop exit
PB: predicated region body
PF: predicated region fallthrough
CT: control target
= control target key end

     0   :  { %vm6_vm0 = vcmask 1043458   ;;  %s11_s6 = smov 3  ;;  %s14_s7 = smov 12  ;;  %vm8_vm1 = vcmask 64512   ;;  %vm20_vm2 = vcmask 1048512   ;;  %vm32_vm3 = vcmask 982912   ;;  %s412_s0 = inlined_call_operand.vmem [shape: f32[64,8], index: 0, kind: input, shape index: {}]   ;;  %s413_s1 = inlined_call_operand.vmem [shape: f32[1,512], index: 1, kind: output, shape index: {}]  }
   0x1   :  { %v215_v0 = vld [vmem:[%s412_s0 + $0xf] ss:$16 sm:%s11_s6]   ;;  %s35_s12 = smov 3  ;;  %s38_s15 = smov 12  ;;  %vm44_vm4 = vcmask 917312   ;;  %vm56_vm5 = vcmask 851712  }
   0x2   :  { %v216_v1 = vld [vmem:[%s412_s0 + $0xf] ss:$16 sm:%s14_s7]   ;;  %v219_v3 = vld [vmem:[%s412_s0 + $0xd] ss:$16 sm:%s35_s12]   ;;  %s263_s16 = smov 120   ;;  %s23_s19 = smov 3 }
   0x3   :  { %v17_v2 = vsel %vm6_vm0, %v216_v1, %v215_v0  ;;  %v220_v4 = vld [vmem:[%s412_s0 + $0xd] ss:$16 sm:%s38_s15]   ;;  %s26_s20 = smov 12  ;;  %v217_v6 = vld [vmem:[%s412_s0 + $0xe] ss:$16 sm:%s23_s19]   ;;  %s47_s25 = smov 3 }
   0x4   :  { %18 = vrot.lane.b32.xlu0 %v17_v2, %s263_s16  ;;  %v41_v5 = vsel %vm6_vm0, %v220_v4, %v219_v3  ;;  %v218_v7 = vld [vmem:[%s412_s0 + $0xe] ss:$16 sm:%s26_s20]   ;;  %s264_s26 = smov 104   ;;  %s50_s29 = smov 12  ;;  %vm68_vm6 = vcmask 786112   ;;  %vm80_vm7 = vcmask 720512  }
   0x5   :  { %42 = vrot.lane.b32.xlu1 %v41_v5, %s264_s26  ;;  %v29_v8 = vsel %vm6_vm0, %v218_v7, %v217_v6  ;;  %v221_v9 = vld [vmem:[%s412_s0 + $0xc] ss:$16 sm:%s47_s25]   ;;  %s59_s3 = smov 3  ;;  %s62_s4 = smov 12  ;;  %vm92_vm8 = vcmask 654912   ;;  %vm104_vm9 = vcmask 589312  }
   0x6   :  { %v222_v10 = vld [vmem:[%s412_s0 + $0xc] ss:$16 sm:%s50_s29]   ;;  %s265_s5 = smov 112   ;;  %v223_v12 = vld [vmem:[%s412_s0 + $0xb] ss:$16 sm:%s59_s3]   ;;  %s71_s8 = smov 3 }
   0x7   :  { %v53_v11 = vsel %vm6_vm0, %v222_v10, %v221_v9  ;;  %v224_v13 = vld [vmem:[%s412_s0 + $0xb] ss:$16 sm:%s62_s4]   ;;  %v225_v14 = vld [vmem:[%s412_s0 + $0xa] ss:$16 sm:%s71_s8]   ;;  %s74_s13 = smov 12  ;;  %s266_s14 = smov 96  }
   0x8   :  { %30 = vrot.lane.b32.xlu0 %v29_v8, %s265_s5  ;;  %v65_v15 = vsel %vm6_vm0, %v224_v13, %v223_v12  ;;  %v226_v16 = vld [vmem:[%s412_s0 + $0xa] ss:$16 sm:%s74_s13]   ;;  %s83_s17 = smov 3  ;;  %s86_s18 = smov 12  ;;  %vm116_vm10 = vcmask 523712   ;;  %vm128_vm11 = vcmask 458112  }
   0x9   :  { %54 = vrot.lane.b32.xlu1 %v53_v11, %s266_s14  ;;  %v77_v17 = vsel %vm6_vm0, %v226_v16, %v225_v14  ;;  %v227_v18 = vld [vmem:[%s412_s0 + $0x9] ss:$16 sm:%s83_s17]   ;;  %s95_s23 = smov 3  ;;  %s267_s24 = smov 88   ;;  %vm140_vm12 = vcmask 392512   ;;  %vm152_vm13 = vcmask 326912  }
   0xa   :  { %v228_v19 = vld [vmem:[%s412_s0 + $0x9] ss:$16 sm:%s86_s18]   ;;  %v229_v20 = vld [vmem:[%s412_s0 + $0x8] ss:$16 sm:%s95_s23]   ;;  %s98_s27 = smov 12  ;;  %s107_s30 = smov 3 }
   0xb   :  { %v89_v21 = vsel %vm6_vm0, %v228_v19, %v227_v18  ;;  %v230_v22 = vld [vmem:[%s412_s0 + $0x8] ss:$16 sm:%s98_s27]   ;;  %s110_s2 = smov 12  ;;  %s268_s3 = smov 80   ;;  %v231_v23 = vld [vmem:[%s412_s0 + $0x7] ss:$16 sm:%s107_s30]  }
   0xc   :  { %66 = vrot.lane.b32.xlu0 %v65_v15, %s267_s24  ;;  %s119_s6 = smov 3  ;;  %v101_v24 = vsel %vm6_vm0, %v230_v22, %v229_v20  ;;  %v232_v25 = vld [vmem:[%s412_s0 + $0x7] ss:$16 sm:%s110_s2]   ;;  %s122_s11 = smov 12  ;;  %vm164_vm14 = vcmask 261312   ;;  %vm176_vm15 = vcmask 195712  }
   0xd   :  { %78 = vrot.lane.b32.xlu1 %v77_v17, %s268_s3  ;;  %v233_v26 = vld [vmem:[%s412_s0 + $0x6] ss:$16 sm:%s119_s6]   ;;  %s269_s12 = smov 72   ;;  %s131_s15 = smov 3  ;;  %v113_v28 = vsel %vm6_vm0, %v232_v25, %v231_v23 }
   0xe   :  { %v234_v27 = vld [vmem:[%s412_s0 + $0x6] ss:$16 sm:%s122_s11]   ;;  %s134_s16 = smov 12  ;;  %v235_v29 = vld [vmem:[%s412_s0 + $0x5] ss:$16 sm:%s131_s15]   ;;  %s143_s19 = smov 3 }
   0xf   :  { %s270_s20 = smov 64   ;;  %v236_v30 = vld [vmem:[%s412_s0 + $0x5] ss:$16 sm:%s134_s16]   ;;  %s146_s23 = smov 12  ;;  %v125_v31 = vsel %vm6_vm0, %v234_v27, %v233_v26  ;;  %v237_v32 = vld [vmem:[%s412_s0 + $0x4] ss:$16 sm:%s143_s19]  }
  0x10   :  { %90 = vrot.lane.b32.xlu0 %v89_v21, %s269_s12  ;;  %s155_s26 = smov 3  ;;  %s158_s27 = smov 12  ;;  %v238_v33 = vld [vmem:[%s412_s0 + $0x4] ss:$16 sm:%s146_s23]   ;;  %v137_v34 = vsel %vm6_vm0, %v236_v30, %v235_v29 }
  0x11   :  { %102 = vrot.lane.b32.xlu1 %v101_v24, %s270_s20  ;;  %s271_s28 = smov 56   ;;  %s167_s2 = smov 3  ;;  %v239_v35 = vld [vmem:[%s412_s0 + $0x3] ss:$16 sm:%s155_s26]   ;;  %v149_v37 = vsel %vm6_vm0, %v238_v33, %v237_v32 }
  0x12   :  { %s170_s5 = smov 12  ;;  %s272_s6 = smov 48   ;;  %v240_v36 = vld [vmem:[%s412_s0 + $0x3] ss:$16 sm:%s158_s27]   ;;  %v241_v38 = vld [vmem:[%s412_s0 + $0x2] ss:$16 sm:%s167_s2]  }
  0x13   :  { %s179_s9 = smov 3  ;;  %v242_v39 = vld [vmem:[%s412_s0 + $0x2] ss:$16 sm:%s170_s5]   ;;  %s182_s14 = smov 12  ;;  %v161_v41 = vsel %vm6_vm0, %v240_v36, %v239_v35 }
  0x14   :  { %114 = vrot.lane.b32.xlu0 %v113_v28, %s271_s28  ;;  %s2_s15 = smov 3  ;;  %s273_s16 = smov 40   ;;  %v243_v42 = vld [vmem:[%s412_s0 + $0x1] ss:$16 sm:%s179_s9]   ;;  %v173_v46 = vsel %vm6_vm0, %v242_v39, %v241_v38 }
  0x15   :  { %126 = vrot.lane.b32.xlu1 %v125_v31, %s272_s6  ;;  %v3_v40 = vld [vmem:[%s412_s0] ss:$16 sm:%s2_s15]   ;;  %s4_s19 = smov 12  ;;  %s274_s24 = smov 32  }
  0x16   :  { %v5_v43 = vld [vmem:[%s412_s0] ss:$16 sm:%s4_s19]   ;;  %v244_v44 = vld [vmem:[%s412_s0 + $0x1] ss:$16 sm:%s182_s14]   ;;  %s275_s0 = smov 24   ;;  %s276_s27 = smov 16  }
  0x17   :  { %v7_v45 = vsel %vm6_vm0, %v5_v43, %v3_v40  ;;  %v185_v47 = vsel %vm6_vm0, %v244_v44, %v243_v42  ;;  %s277_s28 = smov 8   ;;  %vm188_vm0 = vcmask 130112  }
  0x18   :  { %138 = vrot.lane.b32.xlu0 %v137_v34, %s273_s16  ;;  %9 = vst.msk [vmem:[#allocation0] ss:$8 sm:$0xf] %vm8_vm1, %v7_v45  }
  0x19   :  { %150 = vrot.lane.b32.xlu1 %v149_v37, %s274_s24 }
  0x1c   :  { %162 = vrot.lane.b32.xlu0 %v161_v41, %s275_s0 }
  0x1d   :  { %174 = vrot.lane.b32.xlu1 %v173_v46, %s276_s27 }
  0x20   :  { %186 = vrot.lane.b32.xlu0 %v185_v47, %s277_s28 }
  0x76   :  { %v19_v48 = vpop.permute.xlu0 %18  }
  0x77   :  { %21 = vst.msk [vmem:[#allocation0] ss:$8 sm:$0xf] %vm20_vm2, %v19_v48   ;;  %v43_v49 = vpop.permute.xlu1 %42  }
  0x7a   :  { %v31_v50 = vpop.permute.xlu0 %30  }
  0x7b   :  { %33 = vst.msk [vmem:[#allocation0] ss:$8 sm:$0xf] %vm32_vm3, %v31_v50   ;;  %v55_v51 = vpop.permute.xlu1 %54  }
  0x7c   :  { %45 = vst.msk [vmem:[#allocation0] ss:$8 sm:$0xf] %vm44_vm4, %v43_v49  }
  0x7d   :  { %57 = vst.msk [vmem:[#allocation0] ss:$8 sm:$0xf] %vm56_vm5, %v55_v51  }
  0x7e   :  { %v67_v52 = vpop.permute.xlu0 %66  }
  0x7f   :  { %69 = vst.msk [vmem:[#allocation0] ss:$8 sm:$0xf] %vm68_vm6, %v67_v52   ;;  %v79_v53 = vpop.permute.xlu1 %78  }
  0x80   :  { %81 = vst.msk [vmem:[#allocation0] ss:$8 sm:$0xf] %vm80_vm7, %v79_v53  }
  0x82   :  { %v91_v54 = vpop.permute.xlu0 %90  }
  0x83   :  { %93 = vst.msk [vmem:[#allocation0] ss:$8 sm:$0xf] %vm92_vm8, %v91_v54   ;;  %v103_v55 = vpop.permute.xlu1 %102  }
  0x84   :  { %105 = vst.msk [vmem:[#allocation0] ss:$8 sm:$0xf] %vm104_vm9, %v103_v55  }
  0x86   :  { %v115_v56 = vpop.permute.xlu0 %114  }
  0x87   :  { %117 = vst.msk [vmem:[#allocation0] ss:$8 sm:$0xf] %vm116_vm10, %v115_v56   ;;  %v127_v57 = vpop.permute.xlu1 %126  }
  0x88   :  { %129 = vst.msk [vmem:[#allocation0] ss:$8 sm:$0xf] %vm128_vm11, %v127_v57  }
  0x8a   :  { %v139_v58 = vpop.permute.xlu0 %138  }
  0x8b   :  { %141 = vst.msk [vmem:[#allocation0] ss:$8 sm:$0xf] %vm140_vm12, %v139_v58   ;;  %v151_v59 = vpop.permute.xlu1 %150  }
  0x8c   :  { %153 = vst.msk [vmem:[#allocation0] ss:$8 sm:$0xf] %vm152_vm13, %v151_v59  }
  0x8e   :  { %v163_v60 = vpop.permute.xlu0 %162  }
  0x8f   :  { %165 = vst.msk [vmem:[#allocation0] ss:$8 sm:$0xf] %vm164_vm14, %v163_v60   ;;  %v175_v61 = vpop.permute.xlu1 %174  }
  0x90   :  { %177 = vst.msk [vmem:[#allocation0] ss:$8 sm:$0xf] %vm176_vm15, %v175_v61  }
  0x92   :  { %v187_v62 = vpop.permute.xlu0 %186  }
  0x93   :  { %189 = vst.msk [vmem:[#allocation0] ss:$8 sm:$0xf] %vm188_vm0, %v187_v62  }
  0x9a   :  { %v193_v63 = vld [vmem:[#allocation0] sm:$0x1]  ;;  %v197_v0 = vld [vmem:[#allocation0 + $0x8] sm:$0x1]  ;;  %v202_v1 = vld [vmem:[#allocation0 + $0x10] sm:$0x1] }
  0x9b   :  { %195 = vst [vmem:[%s413_s1] sm:$0x1] %v193_v63  ;;  %245 = vst [vmem:[%s413_s1 + $0x1] sm:$0x1] %v197_v0  ;;  %v208_v2 = vld [vmem:[#allocation0 + $0x18] sm:$0x1] }
  0x9c   :  { %246 = vst [vmem:[%s413_s1 + $0x2] sm:$0x1] %v202_v1  ;;  %247 = vst [vmem:[%s413_s1 + $0x3] sm:$0x1] %v208_v2 }

// kernel: resblock_up.6
= control target key start
LH: loop header
LB: loop body
LE: loop exit
PB: predicated region body
PF: predicated region fallthrough
CT: control target
= control target key end

     0   :  { %s4991_s24 = smov 0   ;;  %s4993_s25 = smov 0   ;;  %s6209_s0 = inlined_call_operand.vmem [shape: bf16[2,10,10,10,8], index: 0, kind: input, shape index: {}, may-alias: {0,1,2}]   ;;  %s6210_s1 = inlined_call_operand.vmem [shape: bf16[2,10,10,10,8], index: 1, kind: input, shape index: {}, may-alias: {0,1,2}]   ;;  %s6211_s2 = inlined_call_operand.vmem [shape: bf16[2,10,10,10,8], index: 2, kind: input, shape index: {}, may-alias: {0,1,2}]   ;;  %s6212_s3 = inlined_call_operand.vmem [shape: bf16[27,8,8], index: 3, kind: input, shape index: {}]   ;;  %s6213_s4 = inlined_call_operand.vmem [shape: f32[1,8], index: 4, kind: input, shape index: {}]   ;;  %s6214_s5 = inlined_call_operand.vmem [shape: f32[2,8,64,8], index: 5, kind: output, shape index: {0}]   ;;  %s6215_s6 = inlined_call_operand.vmem [shape: f32[2,8,1,8], index: 6, kind: output, shape index: {1}]   ;;  %s6216_s7 = inlined_call_operand.vmem [shape: f32[2,8,1,8], index: 7, kind: output, shape index: {2}]  }
   0x1   :  { %s4995_s26 = smov 0   ;;  %s4997_s27 = smov 0  }
   0x2   :  { %s4999_s28 = smov 0  }
   0x3 LB: > { %s27_s29 = sadd.s32 1, %s4941_s26  ;;  %s30_s30 = sadd.s32 1, %s4945_s27  ;;  %s4949_s28 = sphi %s4999_s28, %s18_s28   ;;  %s4945_s27 = sphi %s4997_s27, %s6291_s27   ;;  %s4941_s26 = sphi %s4995_s26, %s6290_s26   ;;  %s4937_s25 = sphi %s4993_s25, %s6289_s25   ;;  %s4933_s24 = sphi %s4991_s24, %s6288_s24  }
   0x4   : > { %p28_p0 = scmp.ge.s32.totalorder %s27_s29, 8  ;;  %p3929_p1 = scmp.ge.s32.totalorder %s4949_s28, 1 }
   0x5   : > { %p306_p2 = scmp.lt.s32.totalorder %s4949_s28, 17 }
   0x6   : > { %s6293_s29 = smov (%p28_p0, %s27_s29), 0  ;;  %s6295_s30 = smov (!%p28_p0, %s30_s30), %s4945_s27 }
   0x7   : > { %p307_p3 = pnand %p3929_p1, %p306_p2  ;;  %p32_p4 = scmp.ge.s32.totalorder %s6295_s30, 2 }
   0x9   : > { %s6297_s30 = smov (%p32_p4, %s6295_s30), 0  ;;  %310 = sbr.rel (%p307_p3) target bundleno = 516 (0x204), region = 40 }
  0x10   : > { %v3938_v0 = vld [vmem:[%s6212_s3 + $0x4] sm:$0xf]  ;;  %vm598_vm0 = vcmask 1043456   ;;  %v4063_v1 = vld [vmem:[%s6212_s3 + $0x34] sm:$0xf]  ;;  %p380_p5 = scmp.lt.s32.totalorder %s4937_s25, 1 }
  0x11   : > { %4801 = vmatprep.subr.msk.bf16.mxu1 %vm598_vm0, %v3938_v0  ;;  %4814 = vmatprep.subr.msk.bf16.mxu0 %vm598_vm0, %v4063_v1  ;;  %v600_v2 = vsel %vm598_vm0, %v3938_v0, 0  ;;  %v5033_v3 = vsel %vm598_vm0, %v4063_v1, 0  ;;  %p382_p6 = scmp.lt.s32.totalorder %s4933_s24, 9  ;;  %v5043_v4 = vld [vmem:[%s6212_s3] sm:$0xf]  ;;  %s389_s19 = sadd.s32 1, %s4933_s24 }
  0x12   : > { %6237 = vst [vmem:[#allocation2_spill] sm:$0xff] %v5033_v3  ;;  %4322 = vmatpush3.bf16.msra.mxu1 %v600_v2  ;;  %4452 = vmatpush3.bf16.msra.mxu0 %v5033_v3  ;;  %s6299_s25 = smov (!%p380_p5, %s4937_s25), 1  ;;  %v5048_v5 = vld [vmem:[%s6212_s3 + $0x38] sm:$0xf]  ;;  %p5064_p7 = scmp.lt.s32.totalorder %s389_s19, 9  ;;  %vm585_vm4 = vcmask 64512  }
  0x13   : > { %s383_s12 = scalar_select %p382_p6, %s4933_s24, 9  ;;  %4802 = vmatprep.subr.msk.bf16.mxu1 %vm598_vm0, %v5043_v4  ;;  %4816 = vmatprep.subr.msk.bf16.mxu0 %vm598_vm0, %v5048_v5  ;;  %vm456_vm1 = vsmask.f32 3328  ;;  %vm457_vm2 = vsmask.f32 7440  ;;  %v700_v56 = vsel %vm598_vm0, %v5043_v4, 0 }
  0x14   : > { %s5051_s17 = smul.u32 200, %s6299_s25  ;;  %s6301_s19 = smov (!%p5064_p7, %s389_s19), 9  ;;  %vm5112_vm3 = vmor %vm456_vm1, %vm457_vm2  ;;  %vm775_vm5 = vcmask 1042432   ;;  %vm776_vm6 = vcmask 1046532  }
  0x15   : > { %s4829_s18 = smul.u32 20, %s383_s12  ;;  %vm5261_vm7 = vmor %vm775_vm5, %vm776_vm6  ;;  %p413_p9 = scmp.lt.s32.totalorder %s4933_s24, 7 }
  0x16   : > { %s4831_s10 = smul.u32 20, %s6301_s19 }
  0x17   : > { %s386_s20 = sadd.s32 %s5051_s17, %s4829_s18 }
  0x18   : > { %s3930_s21 = sshll.u32 %s386_s20, 2  ;;  %s396_s11 = sadd.s32 %s4831_s10, %s5051_s17 }
  0x19   : > { %s5062_s8 = scalar_lea.vmem %s6209_s0, %s3930_s21  ;;  %s3931_s12 = sshll.u32 %s396_s11, 2 }
  0x1a   : > { %v5069_v6 = vld [vmem:[%s5062_s8] sm:$0xf]  ;;  %v5072_v7 = vld [vmem:[%s5062_s8 + $0x4] sm:$0x1]  ;;  %v5075_v8 = vld [vmem:[%s5062_s8 + $0x8] sm:$0xf]  ;;  %s5129_s15 = scalar_lea.vmem %s6210_s1, %s3931_s12 }
  0x1b   : > { %v5078_v9 = vld [vmem:[%s5062_s8 + $0xc] sm:$0x1]  ;;  %v5081_v10 = vld [vmem:[%s5062_s8 + $0x10] sm:$0xf]  ;;  %v5084_v11 = vld [vmem:[%s5062_s8 + $0x14] sm:$0x1] }
  0x1c   : > { %v5089_v13 = vld [vmem:[%s5062_s8 + $0x18] sm:$0xf]  ;;  %v460_v14 = vshrl.u32 %v5069_v6, 16  ;;  %v463_v15 = vshll.u32 %v5069_v6, 16  ;;  %v469_v16 = vshll.u32 %v5072_v7, 16  ;;  %v474_v17 = vshrl.u32 %v5075_v8, 16 }
  0x1d   : > { %v477_v18 = vshll.u32 %v5075_v8, 16  ;;  %v483_v19 = vshll.u32 %v5078_v9, 16  ;;  %v488_v20 = vshrl.u32 %v5081_v10, 16  ;;  %v491_v21 = vshll.u32 %v5081_v10, 16  ;;  %v5102_v22 = vld [vmem:[%s5062_s8 + $0x1c] sm:$0x1] }
  0x1e   : > { %v462_v23 = vrot.slane %v460_v14, 4  ;;  %v465_v24 = vrot.slane %v463_v15, 5  ;;  %v476_v25 = vrot.slane %v474_v17, 4  ;;  %v471_v26 = vrot.slane %v469_v16, 5  ;;  %v5108_v34 = vld [vmem:[%s5062_s8 + $0x20] sm:$0xf] }
  0x1f   : > { %v479_v27 = vrot.slane %v477_v18, 5  ;;  %v490_v28 = vrot.slane %v488_v20, 4  ;;  %v493_v29 = vrot.slane %v491_v21, 5  ;;  %v497_v31 = vshll.u32 %v5084_v11, 16  ;;  %v5137_v55 = vld [vmem:[%s5062_s8 + $0x24] sm:$0x1] }
  0x20   : > { %v466_v30 = vor.u32 %v465_v24, %v462_v23  ;;  %v502_v32 = vshrl.u32 %v5089_v13, 16  ;;  %v505_v33 = vshll.u32 %v5089_v13, 16  ;;  %v485_v37 = vrot.slane %v483_v19, 5  ;;  %v1487_v59 = vld [vmem:[%s5129_s15 + $0x4] sm:$0x1]  ;;  %s400_s12 = sadd.s32 2, %s4933_s24 }
  0x21   : > { %v480_v36 = vor.u32 %v479_v27, %v476_v25  ;;  %v494_v38 = vor.u32 %v493_v29, %v490_v28  ;;  %v511_v39 = vshll.u32 %v5102_v22, 16  ;;  %v499_v41 = vrot.slane %v497_v31, 5  ;;  %v5150_v60 = vld [vmem:[%s5129_s15 + $0x8] sm:$0xf]  ;;  %v5153_v61 = vld [vmem:[%s5129_s15 + $0xc] sm:$0x1] }
  0x22   : > { %v467_v40 = vrot.slane %v466_v30, 4  ;;  %v504_v42 = vrot.slane %v502_v32, 4  ;;  %v507_v43 = vrot.slane %v505_v33, 5  ;;  %v516_v50 = vshrl.u32 %v5108_v34, 16  ;;  %v1486_v1 = vld [vmem:[%s5129_s15] sm:$0xf] }
  0x23   : > { %v481_v44 = vrot.slane %v480_v36, 4  ;;  %v495_v45 = vrot.slane %v494_v38, 4  ;;  %v513_v48 = vrot.slane %v511_v39, 5  ;;  %v519_v51 = vshll.u32 %v5108_v34, 16  ;;  %v5161_v2 = vld [vmem:[%s5129_s15 + $0x10] sm:$0xf] }
  0x24   : > { %v472_v46 = vsel %vm5112_vm3, %v467_v40, %v471_v26  ;;  %v508_v47 = vor.u32 %v507_v43, %v504_v42  ;;  %v518_v62 = vrot.slane %v516_v50, 4  ;;  %v5164_v4 = vld [vmem:[%s5129_s15 + $0x14] sm:$0x1]  ;;  %v1617_v14 = vshrl.u32 %v1486_v1, 16  ;;  %v5169_v16 = vld [vmem:[%s6212_s3 + $0x8] sm:$0xf] }
  0x25   : > { %v5122_v49 = vsel %vm5112_vm3, %v481_v44, %v485_v37  ;;  %v5133_v52 = vsel %vm5112_vm3, %v495_v45, %v499_v41  ;;  %v521_v63 = vrot.slane %v519_v51, 5  ;;  %v1620_v15 = vshll.u32 %v1486_v1, 16  ;;  %v5174_v17 = vld [vmem:[%s5129_s15 + $0x18] sm:$0xf]  ;;  %v5181_v24 = vld [vmem:[%s5129_s15 + $0x1c] sm:$0x1] }
  0x26   : > { %v509_v53 = vrot.slane %v508_v47, 4  ;;  %v3939_v54 = vcombine.low %v472_v46, %v5122_v49  ;;  %v1626_v18 = vshll.u32 %v1487_v59, 16  ;;  %v1631_v19 = vshrl.u32 %v5150_v60, 16  ;;  %v5185_v29 = vld [vmem:[%s5129_s15 + $0x20] sm:$0xf]  ;;  %p403_p8 = scmp.lt.s32.totalorder %s400_s12, 9 }
  0x27   : > { %v1634_v20 = vshll.u32 %v5150_v60, 16  ;;  %v1640_v21 = vshll.u32 %v5153_v61, 16  ;;  %v525_v23 = vshll.u32 %v5137_v55, 16  ;;  %v1619_v25 = vrot.slane %v1617_v14, 4  ;;  %v5194_v43 = vld [vmem:[%s5129_s15 + $0x24] sm:$0x1] }
  0x28   : > { %v5143_v57 = vsel %vm5112_vm3, %v509_v53, %v513_v48  ;;  %4323 = vmatprep.mubr.msk.bf16.mxu1 %vm585_vm4, %v3939_v54  ;;  %v1622_v26 = vrot.slane %v1620_v15, 5  ;;  %v1645_v27 = vshrl.u32 %v5161_v2, 16  ;;  %v522_v28 = vor.u32 %v521_v63, %v518_v62  ;;  %s6303_s12 = smov (!%p403_p8, %s400_s12), 9  ;;  %v4909_v35 = vld [vmem:[%s5129_s15 + $0x38] sm:$0xf]  ;;  %s6305_s24 = smov (!%p413_p9, %s4933_s24), 7 }
  0x29   : > { %v5157_v0 = vcombine.low %v5133_v52, %v5143_v57  ;;  %v1628_v30 = vrot.slane %v1626_v18, 5  ;;  %v1633_v31 = vrot.slane %v1631_v19, 4  ;;  %v1636_v32 = vrot.slane %v1634_v20, 5  ;;  %s4832_s19 = smul.u32 20, %s6303_s12 }
  0x2a   : > { %v1623_v33 = vor.u32 %v1622_v26, %v1619_v25  ;;  %v1642_v36 = vrot.slane %v1640_v21, 5  ;;  %v1647_v37 = vrot.slane %v1645_v27, 4  ;;  %v1648_v38 = vshll.u32 %v5161_v2, 16  ;;  %v5211_v27 = vld [vmem:[%s5062_s8 + $0x28] sm:$0xf] }
  0x2b   : > { %6241 = vst [vmem:[#allocation3_spill] sm:$0xff] %v5157_v0  ;;  %4324 = vmatmul.mubr.msk.bf16.vlgmr.msra.gmra.mrb[0].mxu1 %vm585_vm4, %v5157_v0  ;;  %v1637_v39 = vor.u32 %v1636_v32, %v1633_v31  ;;  %v1654_v40 = vshll.u32 %v5164_v4, 16  ;;  %v1659_v41 = vshrl.u32 %v5174_v17, 16  ;;  %v1662_v42 = vshll.u32 %v5174_v17, 16  ;;  %v5214_v31 = vld [vmem:[%s5062_s8 + $0x2c] sm:$0x1]  ;;  %s407_s20 = sadd.s32 %s4832_s19, %s5051_s17 }
  0x2c   : > { %4332 = vmatpush3.bf16.msra.mxu1 %v700_v56  ;;  %v1624_v44 = vrot.slane %v1623_v33, 4  ;;  %v1650_v45 = vrot.slane %v1648_v38, 5  ;;  %v1668_v46 = vshll.u32 %v5181_v24, 16  ;;  %v1673_v47 = vshrl.u32 %v5185_v29, 16  ;;  %v5217_v32 = vld [vmem:[%s5062_s8 + $0x30] sm:$0xf] }
  0x2d   : > { %4803 = vmatprep.subr.msk.bf16.mxu1 %vm598_vm0, %v5169_v16  ;;  %v1638_v48 = vrot.slane %v1637_v39, 4  ;;  %v1661_v50 = vrot.slane %v1659_v41, 4  ;;  %v1664_v51 = vrot.slane %v1662_v42, 5  ;;  %v527_v53 = vrot.slane %v525_v23, 5  ;;  %v5230_v38 = vld [vmem:[%s5062_s8 + $0x34] sm:$0x1] }
  0x2e   : > { %v1629_v54 = vsel %vm5112_vm3, %v1624_v44, %v1628_v30  ;;  %v1651_v56 = vor.u32 %v1650_v45, %v1647_v37  ;;  %v1656_v59 = vrot.slane %v1654_v40, 5  ;;  %v1675_v63 = vrot.slane %v1673_v47, 4  ;;  %v5239_v47 = vld [vmem:[%s5062_s8 + $0x38] sm:$0xf]  ;;  %s3932_s23 = sshll.u32 %s407_s20, 2  ;;  %s3936_s17 = sshll.u32 %s6299_s25, 3 }
  0x2f   : > { %v1665_v62 = vor.u32 %v1664_v51, %v1661_v50  ;;  %v1676_v1 = vshll.u32 %v5185_v29, 16  ;;  %v1682_v14 = vshll.u32 %v5194_v43, 16  ;;  %v523_v15 = vrot.slane %v522_v28, 4  ;;  %v5248_v50 = vld [vmem:[%s5062_s8 + $0x3c] sm:$0x1]  ;;  %s5615_s10 = scalar_lea.vmem %s6211_s2, %s3932_s23  ;;  %s425_s9 = sadd.s32 %s3936_s17, %s6305_s24 }
  0x30   : > { %v1643_v18 = vsel %vm5112_vm3, %v1638_v48, %v1642_v36  ;;  %v1652_v19 = vrot.slane %v1651_v56, 4  ;;  %v1670_v20 = vrot.slane %v1668_v46, 5  ;;  %v2202_v37 = vsel %vm598_vm0, %v5048_v5, 0  ;;  %s426_s12 = scalar_lea.vmem %s6215_s6, %s425_s9 }
  0x31   : > { %v1666_v21 = vrot.slane %v1665_v62, 4  ;;  %v1678_v23 = vrot.slane %v1676_v1, 5  ;;  %v5204_v25 = vcombine.low %v1629_v54, %v1643_v18  ;;  %v1684_v28 = vrot.slane %v1682_v14, 5 }
  0x32   : > { %v5208_v26 = vsel %vm5112_vm3, %v1652_v19, %v1656_v59  ;;  %v5221_v33 = vsel %vm5112_vm3, %v523_v15, %v527_v53  ;;  %v1844_v40 = vrot.slane %v5153_v61, 5  ;;  %v530_v42 = vshrl.u32 %v5211_v27, 16  ;;  %v4082_v15 = vld [vmem:[%s6212_s3 + $0x3c] sm:$0xf] }
  0x33   : > { %6242 = vst [vmem:[#allocation4_spill] sm:$0xff] %v5204_v25  ;;  %v1679_v30 = vor.u32 %v1678_v23, %v1675_v63  ;;  %v5225_v36 = vsel %vm5112_vm3, %v1666_v21, %v1670_v20  ;;  %v4064_v41 = vcombine.low %v1643_v18, %v5208_v26  ;;  %v1848_v44 = vrot.slane %v5164_v4, 5  ;;  %v5270_v21 = vld [vmem:[%s5129_s15 + $0x28] sm:$0xf] }
  0x34   : > { %v533_v45 = vshll.u32 %v5211_v27, 16  ;;  %v539_v46 = vshll.u32 %v5214_v31, 16  ;;  %v544_v48 = vshrl.u32 %v5217_v32, 16  ;;  %v532_v61 = vrot.slane %v530_v42, 4 }
  0x35   : > { %v1680_v39 = vrot.slane %v1679_v30, 4  ;;  %4453 = vmatprep.mubr.msk.bf16.mxu0 %vm585_vm4, %v4064_v41  ;;  %v547_v51 = vshll.u32 %v5217_v32, 16  ;;  %v553_v4 = vshll.u32 %v5230_v38, 16  ;;  %v1852_v53 = vrot.slane %v5181_v24, 5  ;;  %v5276_v41 = vld [vmem:[%s5129_s15 + $0x2c] sm:$0x1] }
  0x36   : > { %v1856_v54 = vrot.slane %v5194_v43, 5  ;;  %v535_v59 = vrot.slane %v533_v45, 5  ;;  %v541_v62 = vrot.slane %v539_v46, 5  ;;  %v546_v63 = vrot.slane %v544_v48, 4 }
  0x37   : > { %v5244_v5 = vsel %vm5112_vm3, %v1680_v39, %v1684_v28  ;;  %v549_v1 = vrot.slane %v547_v51, 5  ;;  %v555_v14 = vrot.slane %v553_v4, 5  ;;  %v558_v43 = vshrl.u32 %v5239_v47, 16  ;;  %v5292_v4 = vld [vmem:[%s5129_s15 + $0x30] sm:$0xf] }
  0x38   : > { %v4065_v56 = vcombine.low %v5225_v36, %v5244_v5  ;;  %v536_v24 = vor.u32 %v535_v59, %v532_v61  ;;  %v561_v19 = vshll.u32 %v5239_v47, 16  ;;  %v567_v20 = vshll.u32 %v5248_v50, 16 }
  0x39   : > { %v550_v23 = vor.u32 %v549_v1, %v546_v63  ;;  %v4038_v30 = vrot.slane %v5150_v60, 9  ;;  %v4039_v28 = vrot.slane %v5161_v2, 9  ;;  %v4040_v39 = vrot.slane %v5174_v17, 9  ;;  %v5305_v1 = vld [vmem:[%s5129_s15 + $0x38] sm:$0xf] }
  0x3a   : > { %4454 = vmatmul.mubr.msk.bf16.vlgmr.msra.gmra.mrb[0].mxu0 %vm585_vm4, %v4065_v56  ;;  %v537_v42 = vrot.slane %v536_v24, 4  ;;  %v560_v45 = vrot.slane %v558_v43, 4  ;;  %v563_v46 = vrot.slane %v561_v19, 5  ;;  %v569_v48 = vrot.slane %v567_v20, 5  ;;  %v5295_v56 = vld [vmem:[%s5129_s15 + $0x34] sm:$0x1] }
  0x3b   : > { %4462 = vmatpush3.bf16.msra.mxu0 %v2202_v37  ;;  %v551_v61 = vrot.slane %v550_v23, 4  ;;  %v5281_v37 = vsel %vm5261_vm7, %v4038_v30, %v1844_v40  ;;  %v5285_v60 = vsel %vm5261_vm7, %v4039_v28, %v1848_v44  ;;  %v5289_v51 = vsel %vm5261_vm7, %v4040_v39, %v1852_v53  ;;  %v5318_v19 = vld [vmem:[%s5129_s15 + $0x3c] sm:$0x1]  ;;  %v5321_v20 = vld [vmem:[%s5129_s15 + $0x40] sm:$0xf] }
  0x3c   : > { %4817 = vmatprep.subr.msk.bf16.mxu0 %vm598_vm0, %v4082_v15  ;;  %6245 = vst [vmem:[#allocation5_spill] sm:$0xff] %v5281_v37  ;;  %v5299_v59 = vsel %vm5112_vm3, %v537_v42, %v541_v62  ;;  %v564_v63 = vor.u32 %v563_v46, %v560_v45  ;;  %v4074_v40 = vcombine.low %v5281_v37, %v5285_v60  ;;  %v4041_v44 = vrot.slane %v5185_v29, 9  ;;  %v5331_v39 = vld [vmem:[%s5129_s15 + $0x44] sm:$0x1] }
  0x3d   : > { %v5309_v53 = vcombine.low %v5221_v33, %v5299_v59  ;;  %v5313_v24 = vsel %vm5112_vm3, %v551_v61, %v555_v14  ;;  %v4042_v62 = vrot.slane %v5270_v21, 9  ;;  %v1860_v43 = vrot.slane %v5276_v41, 5 }
  0x3e   : > { %v565_v23 = vrot.slane %v564_v63, 4  ;;  %4463 = vmatprep.mubr.msk.bf16.mxu0 %vm585_vm4, %v4074_v40  ;;  %v5326_v30 = vsel %vm5261_vm7, %v4041_v44, %v1856_v54  ;;  %v4043_v28 = vrot.slane %v5292_v4, 9  ;;  %v1864_v14 = vrot.slane %v5295_v56, 5 }
  0x3f   : > { %6246 = vst [vmem:[#allocation6_spill] sm:$0xff] %v5309_v53  ;;  %4327 = vmatprep.mubr.msk.bf16.mxu1 %vm585_vm4, %v5309_v53  ;;  %v4075_v42 = vcombine.low %v5289_v51, %v5326_v30  ;;  %v3947_v45 = vcombine.low %v5069_v6, %v5075_v8  ;;  %v5341_v46 = vsel %vm5261_vm7, %v4042_v62, %v1860_v43  ;;  %v4044_v63 = vrot.slane %v5305_v1, 9 }
  0x40   : > { %v5345_v54 = vsel %vm5112_vm3, %v565_v23, %v569_v48  ;;  %v5349_v61 = vsel %vm5261_vm7, %v4043_v28, %v1864_v14  ;;  %v1868_v40 = vrot.slane %v5318_v19, 5  ;;  %v4072_v43 = vrot.slane %v5321_v20, 9  ;;  %v4088_v28 = vld [vmem:[%s6212_s3 + $0x40] sm:$0xf] }
  0x41   : > { %v5355_v44 = vcombine.low %v5313_v24, %v5345_v54  ;;  %v4076_v62 = vcombine.low %v5341_v46, %v5349_v61  ;;  %v2180_v48 = vrot.slane %v5331_v39, 5  ;;  %v2286_v23 = vsel %vm598_vm0, %v4082_v15, 0 }
  0x42   : > { %v3957_v14 = vrot.slane %v5081_v10, 9  ;;  %v788_v58 = vrot.slane %v5084_v11, 5  ;;  %v5374_v15 = vsel %vm5261_vm7, %v4044_v63, %v1868_v40  ;;  %v3958_v3 = vrot.slane %v5089_v13, 9 }
  0x43   : > { %6247 = vst [vmem:[#allocation7_spill] sm:$0xff] %v5355_v44  ;;  %4328 = vmatmul.mubr.msk.bf16.gmra.mrb[4].mxu1 %vm585_vm4, %v5355_v44  ;;  %v5378_v12 = vsel %vm5261_vm7, %v4072_v43, %v2180_v48  ;;  %v792_v11 = vrot.slane %v5102_v22, 5  ;;  %v5390_v63 = vcombine.low %v5081_v10, %v5089_v13  ;;  %v3955_v40 = vrot.slane %v5069_v6, 9 }
  0x44   : > { %4333 = vmatprep.mubr.msk.bf16.mxu1 %vm585_vm4, %v3947_v45  ;;  %v780_v45 = vrot.slane %v5072_v7, 5  ;;  %v3956_v43 = vrot.slane %v5075_v8, 9  ;;  %v837_v48 = vsel %vm598_vm0, %v5169_v16, 0  ;;  %v4077_v7 = vcombine.low %v5374_v15, %v5378_v12 }
  0x45   : > { %6248 = vst [vmem:[#allocation8_spill] sm:$0xff] %v5390_v63  ;;  %v2383_v22 = vsel %vm598_vm0, %v4088_v28, 0  ;;  %v1687_v37 = vshrl.u32 %v5270_v21, 16  ;;  %v5409_v6 = vcombine.low %v5108_v34, %v5211_v27  ;;  %v5413_v16 = vcombine.low %v5161_v2, %v5174_v17 }
  0x46   : > { %4464 = vmatmul.mubr.msk.bf16.vlgmr.msra.gmra.mrb[0].mxu0 %vm585_vm4, %v4075_v42  ;;  %v3972_v42 = vld [vmem:[%s6212_s3 + $0xc] sm:$0xf]  ;;  %v1690_v25 = vshll.u32 %v5270_v21, 16  ;;  %v1715_v44 = vshrl.u32 %v5305_v1, 16  ;;  %v1724_v17 = vshll.u32 %v5318_v19, 16  ;;  %v2072_v0 = vshll.u32 %v5321_v20, 16 }
  0x47   : > { %4472 = vmatpush3.bf16.msra.mxu0 %v2286_v23  ;;  %4467 = vmatprep.mubr.msk.bf16.mxu0 %vm585_vm4, %v4076_v62  ;;  %v784_v62 = vrot.slane %v5078_v9, 5  ;;  %v5400_v23 = vsel %vm598_vm0, %v3972_v42, 0  ;;  %v5404_v9 = vsel %vm5261_vm7, %v3957_v14, %v788_v58  ;;  %6249 = vst [vmem:[#allocation9_spill] sm:$0xff] %v5409_v6  ;;  %6250 = vst [vmem:[#allocation10_spill] sm:$0xff] %v5413_v16  ;;  %v1718_v58 = vshll.u32 %v5305_v1, 16 }
  0x48   : > { %4818 = vmatprep.subr.msk.bf16.mxu0 %vm598_vm0, %v4088_v28  ;;  %v5417_v28 = vsel %vm5261_vm7, %v3958_v3, %v792_v11  ;;  %v781_v14 = vsel %vm5261_vm7, %v3955_v40, %v780_v45  ;;  %v2069_v3 = vshrl.u32 %v5321_v20, 16  ;;  %v1717_v11 = vrot.slane %v1715_v44, 4 }
  0x49   : > { %6251 = vst [vmem:[#allocation11_spill] sm:$0xff] %v5417_v28  ;;  %v5428_v2 = vsel %vm5261_vm7, %v3956_v43, %v784_v62  ;;  %v1720_v53 = vrot.slane %v1718_v58, 5  ;;  %v5437_v45 = vcombine.low %v5404_v9, %v5417_v28  ;;  %v1689_v62 = vrot.slane %v1687_v37, 4 }
  0x4a   : > { %6252 = vst [vmem:[#allocation12_spill] sm:$0xff] %v5428_v2  ;;  %v1696_v40 = vshll.u32 %v5276_v41, 16  ;;  %v2071_v19 = vrot.slane %v2069_v3, 4  ;;  %v1701_v44 = vshrl.u32 %v5292_v4, 16  ;;  %v5449_v41 = vcombine.low %v5217_v32, %v5239_v47 }
  0x4b   : > { %4334 = vmatmul.mubr.msk.bf16.vlgmr.msra.gmra.mrb[0].mxu1 %vm585_vm4, %v5390_v63  ;;  %v2078_v63 = vshll.u32 %v5331_v39, 16  ;;  %v1704_v39 = vshll.u32 %v5292_v4, 16  ;;  %v1721_v43 = vor.u32 %v1720_v53, %v1717_v11  ;;  %v5453_v37 = vcombine.low %v5185_v29, %v5270_v21  ;;  %v5467_v21 = vld [vmem:[%s5062_s8 + $0x44] sm:$0x1] }
  0x4c   : > { %4342 = vmatpush3.bf16.msra.mxu1 %v837_v48  ;;  %4337 = vmatprep.mubr.msk.bf16.mxu1 %vm585_vm4, %v5409_v6  ;;  %v2074_v48 = vrot.slane %v2072_v0, 5  ;;  %v3964_v58 = vcombine.low %v781_v14, %v5428_v2  ;;  %v5461_v0 = vcombine.low %v5292_v4, %v5305_v1  ;;  %v796_v53 = vrot.slane %v5137_v55, 5  ;;  %v4095_v55 = vld [vmem:[%s6212_s3 + $0x44] sm:$0xf] }
  0x4d   : > { %4804 = vmatprep.subr.msk.bf16.mxu1 %vm598_vm0, %v3972_v42  ;;  %v5457_v42 = vld [vmem:[%s5129_s15 + $0x48] sm:$0xf]  ;;  %v1722_v3 = vrot.slane %v1721_v43, 4  ;;  %v2080_v28 = vrot.slane %v2078_v63, 5  ;;  %v3960_v29 = vrot.slane %v5211_v27, 9  ;;  %v800_v14 = vrot.slane %v5214_v31, 5 }
  0x4e   : > { %4468 = vmatmul.mubr.msk.bf16.gmra.mrb[4].mxu0 %vm585_vm4, %v4077_v7  ;;  %v1692_v7 = vrot.slane %v1690_v25, 5  ;;  %v2075_v6 = vor.u32 %v2074_v48, %v2071_v19  ;;  %6253 = vst [vmem:[#allocation13_spill] sm:$0xff] %v5461_v0  ;;  %v3959_v25 = vrot.slane %v5108_v34, 9  ;;  %v1703_v11 = vrot.slane %v1701_v44, 4 }
  0x4f   : > { %4473 = vmatprep.mubr.msk.bf16.mxu0 %vm585_vm4, %v5413_v16  ;;  %v1726_v16 = vrot.slane %v1724_v17, 5  ;;  %v1706_v2 = vrot.slane %v1704_v39, 5  ;;  %v5471_v17 = vld [vmem:[%s5062_s8 + $0x40] sm:$0xf]  ;;  %v1698_v19 = vrot.slane %v1696_v40, 5  ;;  %v2362_v4 = vshrl.u32 %v5457_v42, 16 }
  0x50   : > { %v2076_v43 = vrot.slane %v2075_v6, 4  ;;  %v1693_v63 = vor.u32 %v1692_v7, %v1689_v62  ;;  %v1009_v1 = vshrl.u32 %v5471_v17, 16  ;;  %v1012_v62 = vshll.u32 %v5471_v17, 16 }
  0x51   : > { %v5485_v31 = vsel %vm5112_vm3, %v1722_v3, %v1726_v16  ;;  %v1018_v40 = vshll.u32 %v5467_v21, 16  ;;  %v2365_v44 = vshll.u32 %v5457_v42, 16  ;;  %v5498_v39 = vsel %vm5261_vm7, %v3959_v25, %v796_v53 }
  0x52   : > { %6254 = vst [vmem:[#allocation14_spill] sm:$0xff] %v5485_v31  ;;  %v5489_v6 = vsel %vm5112_vm3, %v2076_v43, %v2080_v28  ;;  %v1011_v48 = vrot.slane %v1009_v1, 4  ;;  %v5504_v28 = vsel %vm5261_vm7, %v3960_v29, %v800_v14  ;;  %v1710_v7 = vshll.u32 %v5295_v56, 16 }
  0x53   : > { %4338 = vmatmul.mubr.msk.bf16.gmra.mrb[4].mxu1 %vm585_vm4, %v5449_v41  ;;  %6255 = vst [vmem:[#allocation15_spill] sm:$0xff] %v5489_v6  ;;  %v5510_v3 = vcombine.low %v5208_v26, %v5225_v36  ;;  %v4083_v25 = vcombine.low %v5321_v20, %v5457_v42  ;;  %v3961_v53 = vrot.slane %v5217_v32, 9  ;;  %v804_v29 = vrot.slane %v5230_v38, 5  ;;  %v5523_v20 = vld [vmem:[%s5129_s15 + $0x4c] sm:$0x1] }
  0x54   : > { %4343 = vmatprep.mubr.msk.bf16.mxu1 %vm585_vm4, %v3964_v58  ;;  %v1014_v58 = vrot.slane %v1012_v62, 5  ;;  %v3962_v14 = vrot.slane %v5239_v47, 9  ;;  %v1020_v56 = vrot.slane %v1018_v40, 5  ;;  %v1694_v43 = vrot.slane %v1693_v63, 4  ;;  %v3981_v38 = vld [vmem:[%s6212_s3 + $0x10] sm:$0xf] }
  0x55   : > { %v5520_v1 = vcombine.low %v5498_v39, %v5504_v28  ;;  %v2364_v26 = vrot.slane %v2362_v4, 4  ;;  %v2367_v36 = vrot.slane %v2365_v44, 5  ;;  %v1712_v16 = vrot.slane %v1710_v7, 5 }
  0x56   : > { %4474 = vmatmul.mubr.msk.bf16.vlgmr.msra.gmra.mrb[0].mxu0 %vm585_vm4, %v5453_v37  ;;  %v5547_v40 = vsel %vm5112_vm3, %v1694_v43, %v1698_v19  ;;  %v2371_v44 = vshll.u32 %v5523_v20, 16 }
  0x57   : > { %4482 = vmatpush3.bf16.msra.mxu0 %v2383_v22  ;;  %4477 = vmatprep.mubr.msk.bf16.mxu0 %vm585_vm4, %v5461_v0  ;;  %v1707_v22 = vor.u32 %v1706_v2, %v1703_v11  ;;  %v808_v2 = vrot.slane %v5248_v50, 5  ;;  %v1015_v11 = vor.u32 %v1014_v58, %v1011_v48  ;;  %v5535_v50 = vsel %vm5261_vm7, %v3961_v53, %v804_v29 }
  0x58   : > { %4819 = vmatprep.subr.msk.bf16.mxu0 %vm598_vm0, %v4095_v55  ;;  %6256 = vst [vmem:[#allocation16_spill] sm:$0xff] %v5547_v40  ;;  %v2471_v53 = vsel %vm598_vm0, %v4095_v55, 0  ;;  %v3974_v29 = vcombine.low %v5089_v13, %v5108_v34  ;;  %v3976_v13 = vcombine.low %v5239_v47, %v5471_v17  ;;  %v5619_v34 = vcombine.low %v5326_v30, %v5341_v46 }
  0x59   : > { %v1708_v62 = vrot.slane %v1707_v22, 4  ;;  %v1016_v0 = vrot.slane %v1015_v11, 4  ;;  %v5539_v63 = vsel %vm5261_vm7, %v3962_v14, %v808_v2  ;;  %v5567_v22 = vcombine.low %v5244_v5, %v5547_v40  ;;  %v3991_v11 = vld [vmem:[%s6212_s3 + $0x14] sm:$0xf] }
  0x5a   : > { %v5563_v19 = vcombine.low %v5535_v50, %v5539_v63  ;;  %v6259_v5 = vcombine.low %v5075_v8, %v5081_v10  ;;  %v1042_v2 = vsel %vm598_vm0, %v3981_v38, 0  ;;  %v3975_v8 = vcombine.low %v5211_v27, %v5217_v32  ;;  %6261 = vst [vmem:[#allocation20_spill] sm:$0xff] %v5619_v34 }
  0x5b   : > { %4344 = vmatmul.mubr.msk.bf16.vlgmr.msra.gmra.mrb[0].mxu1 %vm585_vm4, %v5437_v45  ;;  %v5543_v4 = vsel %vm5112_vm3, %v1016_v0, %v1020_v56  ;;  %v5559_v0 = vsel %vm5112_vm3, %v1708_v62, %v1712_v16  ;;  %v4101_v16 = vld [vmem:[%s6212_s3 + $0x48] sm:$0xf]  ;;  %v5598_v10 = vcombine.low %v5285_v60, %v5289_v51  ;;  %v5623_v27 = vcombine.low %v5349_v61, %v5374_v15  ;;  %v5629_v51 = vld [vmem:[%s5615_s10] sm:$0xf]  ;;  %v4110_v61 = vld [vmem:[%s6212_s3 + $0x4c] sm:$0xf] }
  0x5c   : > { %4352 = vmatpush3.bf16.msra.mxu1 %v5400_v23  ;;  %4347 = vmatprep.mubr.msk.bf16.mxu1 %vm585_vm4, %v5520_v1  ;;  %v2368_v23 = vor.u32 %v2367_v36, %v2364_v26  ;;  %6257 = vst [vmem:[#allocation17_spill] sm:$0xff] %v5559_v0  ;;  %v5571_v7 = vcombine.low %v5559_v0, %v5485_v31  ;;  %v4094_v32 = vrot.slane %v5457_v42, 9  ;;  %v2461_v60 = vrot.slane %v5523_v20, 5  ;;  %v5633_v56 = vld [vmem:[%s5615_s10 + $0x8] sm:$0xf] }
  0x5d   : > { %4805 = vmatprep.subr.msk.bf16.mxu1 %vm598_vm0, %v3981_v38  ;;  %6260 = vst [vmem:[#allocation19_spill] sm:$0xff] %v5598_v10  ;;  %6262 = vst [vmem:[#allocation21_spill] sm:$0xff] %v5623_v27  ;;  %v2601_v47 = vsel %vm598_vm0, %v4101_v16, 0  ;;  %v2677_v30 = vshrl.u32 %v5629_v51, 16  ;;  %v2680_v46 = vshll.u32 %v5629_v51, 16  ;;  %v6263_v15 = vcombine.low %v5122_v49, %v5133_v52 }
  0x5e   : > { %4478 = vmatmul.mubr.msk.bf16.gmra.mrb[4].mxu0 %vm585_vm4, %v4083_v25  ;;  %6258 = vst [vmem:[#allocation18_spill] sm:$0xff] %v5571_v7  ;;  %v2369_v58 = vrot.slane %v2368_v23, 4  ;;  %v2373_v25 = vrot.slane %v2371_v44, 5  ;;  %v2691_v42 = vshrl.u32 %v5633_v56, 16  ;;  %v2694_v43 = vshll.u32 %v5633_v56, 16 }
  0x5f   : > { %4483 = vmatprep.mubr.msk.bf16.mxu0 %vm585_vm4, %v5510_v3  ;;  %v2462_v26 = vsel %vm5261_vm7, %v4094_v32, %v2461_v60  ;;  %v3983_v49 = vcombine.low %v5143_v57, %v5221_v33  ;;  %v2679_v52 = vrot.slane %v2677_v30, 4  ;;  %v2682_v36 = vrot.slane %v2680_v46, 5  ;;  %v5657_v20 = vld [vmem:[%s5615_s10 + $0x4] sm:$0x1]  ;;  %v5660_v38 = vld [vmem:[%s5615_s10 + $0xc] sm:$0x1] }
  0x60   : > { %v2374_v55 = vsel %vm5112_vm3, %v2369_v58, %v2373_v25  ;;  %v4096_v62 = vcombine.low %v5378_v12, %v2462_v26  ;;  %v2693_v23 = vrot.slane %v2691_v42, 4  ;;  %v2696_v44 = vrot.slane %v2694_v43, 5  ;;  %v5671_v57 = vld [vmem:[%s5615_s10 + $0x18] sm:$0xf]  ;;  %v5693_v32 = vld [vmem:[%s5615_s10 + $0x20] sm:$0xf] }
  0x61   : > { %v4089_v14 = vcombine.low %v5489_v6, %v2374_v55  ;;  %v1142_v58 = vsel %vm598_vm0, %v3991_v11, 0  ;;  %v3984_v25 = vcombine.low %v5299_v59, %v5313_v24  ;;  %v4000_v12 = vld [vmem:[%s6212_s3 + $0x18] sm:$0xf]  ;;  %v2683_v33 = vor.u32 %v2682_v36, %v2679_v52  ;;  %v5696_v60 = vld [vmem:[%s5615_s10 + $0x28] sm:$0xf] }
  0x62   : > { %v2700_v59 = vshll.u32 %v5660_v38, 16  ;;  %v2697_v55 = vor.u32 %v2696_v44, %v2693_v23  ;;  %v2733_v30 = vshrl.u32 %v5693_v32, 16  ;;  %v2736_v46 = vshll.u32 %v5693_v32, 16  ;;  %v5707_v43 = vld [vmem:[%s5615_s10 + $0x38] sm:$0xf] }
  0x63   : > { %4348 = vmatmul.mubr.msk.bf16.gmra.mrb[4].mxu1 %vm585_vm4, %v5563_v19  ;;  %v2750_v42 = vshll.u32 %v5696_v60, 16  ;;  %v5717_v48 = vcombine.low %v5693_v32, %v5696_v60 }
  0x64   : > { %4353 = vmatprep.mubr.msk.bf16.mxu1 %vm585_vm4, %v6259_v5  ;;  %v2686_v5 = vshll.u32 %v5657_v20, 16  ;;  %v2698_v36 = vrot.slane %v2697_v55, 4 }
  0x66   : > { %4484 = vmatmul.mubr.msk.bf16.vlgmr.msra.gmra.mrb[0].mxu0 %vm585_vm4, %v5567_v22  ;;  %v2688_v26 = vrot.slane %v2686_v5, 5  ;;  %v5725_v5 = vld [vmem:[%s6212_s3 + $0x50] sm:$0xf] }
  0x67   : > { %4492 = vmatpush3.bf16.msra.mxu0 %v2471_v53  ;;  %4487 = vmatprep.mubr.msk.bf16.mxu0 %vm585_vm4, %v5571_v7  ;;  %v4102_v53 = vcombine.low %v5629_v51, %v5633_v56  ;;  %v5772_v7 = vld [vmem:[%s5615_s10 + $0x3c] sm:$0x1] }
  0x68   : > { %4820 = vmatprep.subr.msk.bf16.mxu0 %vm598_vm0, %v4101_v16  ;;  %v5668_v16 = vld [vmem:[%s5615_s10 + $0x10] sm:$0xf] }
  0x69   : > { %v2705_v24 = vshrl.u32 %v5668_v16, 16 }
  0x6b   : > { %4354 = vmatmul.mubr.msk.bf16.vlgmr.msra.gmra.mrb[0].mxu1 %vm585_vm4, %v3974_v29  ;;  %v2708_v29 = vshll.u32 %v5668_v16, 16  ;;  %v2707_v52 = vrot.slane %v2705_v24, 4  ;;  %v2738_v24 = vrot.slane %v2736_v46, 5  ;;  %v5743_v46 = vld [vmem:[%s5615_s10 + $0x2c] sm:$0x1] }
  0x6c   : > { %4362 = vmatpush3.bf16.msra.mxu1 %v1042_v2  ;;  %4357 = vmatprep.mubr.msk.bf16.mxu1 %vm585_vm4, %v3975_v8  ;;  %v2722_v2 = vshll.u32 %v5671_v57, 16  ;;  %v5688_v8 = vcombine.low %v5668_v16, %v5671_v57 }
  0x6d   : > { %4806 = vmatprep.subr.msk.bf16.mxu1 %vm598_vm0, %v3991_v11  ;;  %v6264_v11 = vld [vmem:[#allocation12_spill] sm:$0xff]  ;;  %v2710_v23 = vrot.slane %v2708_v29, 5  ;;  %v2752_v29 = vrot.slane %v2750_v42, 5 }
  0x6e   : > { %4488 = vmatmul.mubr.msk.bf16.gmra.mrb[4].mxu0 %vm585_vm4, %v4089_v14  ;;  %v2719_v14 = vshrl.u32 %v5671_v57, 16  ;;  %6266 = vst [vmem:[#allocation12_spill] sm:$0xff] %v5717_v48 }
  0x6f   : > { %4493 = vmatprep.mubr.msk.bf16.mxu0 %vm585_vm4, %v5598_v10 }
  0x70   : > { %v2721_v44 = vrot.slane %v2719_v14, 4 }
  0x73   : > { %4358 = vmatmul.mubr.msk.bf16.gmra.mrb[4].mxu1 %vm585_vm4, %v3976_v13  ;;  %v3992_v13 = vcombine.low %v6264_v11, %v5404_v9  ;;  %v2684_v9 = vrot.slane %v2683_v33, 4  ;;  %v2815_v11 = vsel %vm598_vm0, %v4110_v61, 0  ;;  %v5720_v33 = vld [vmem:[%s5615_s10 + $0x1c] sm:$0x1] }
  0x74   : > { %4363 = vmatprep.mubr.msk.bf16.mxu1 %vm585_vm4, %v6263_v15  ;;  %v2747_v15 = vshrl.u32 %v5696_v60, 16  ;;  %v2728_v42 = vshll.u32 %v5720_v33, 16 }
  0x76   : > { %4494 = vmatmul.mubr.msk.bf16.vlgmr.msra.gmra.mrb[0].mxu0 %vm585_vm4, %v5619_v34  ;;  %v2749_v55 = vrot.slane %v2747_v15, 4 }
  0x77   : > { %4502 = vmatpush3.bf16.msra.mxu0 %v2601_v47  ;;  %4497 = vmatprep.mubr.msk.bf16.mxu0 %vm585_vm4, %v5623_v27  ;;  %v5700_v47 = vld [vmem:[%s5615_s10 + $0x30] sm:$0xf]  ;;  %v2730_v27 = vrot.slane %v2728_v42, 5  ;;  %v2784_v42 = vshll.u32 %v5772_v7, 16 }
  0x78   : > { %4821 = vmatprep.subr.msk.bf16.mxu0 %vm598_vm0, %v4110_v61  ;;  %v1226_v61 = vsel %vm598_vm0, %v4000_v12, 0  ;;  %v5734_v14 = vcombine.low %v5700_v47, %v5707_v43 }
  0x7b   : > { %4364 = vmatmul.mubr.msk.bf16.vlgmr.msra.gmra.mrb[0].mxu1 %vm585_vm4, %v3983_v49  ;;  %v2702_v49 = vrot.slane %v2700_v59, 5  ;;  %v2735_v59 = vrot.slane %v2733_v30, 4  ;;  %v5740_v30 = vld [vmem:[%s5615_s10 + $0x24] sm:$0x1] }
  0x7c   : > { %4372 = vmatpush3.bf16.msra.mxu1 %v1142_v58  ;;  %4367 = vmatprep.mubr.msk.bf16.mxu1 %vm585_vm4, %v3984_v25  ;;  %v2724_v58 = vrot.slane %v2722_v2, 5  ;;  %v6265_v25 = vld [vmem:[#allocation11_spill] sm:$0xff]  ;;  %v2689_v2 = vsel %vm5112_vm3, %v2684_v9, %v2688_v26  ;;  %v2761_v9 = vshrl.u32 %v5700_v47, 16  ;;  %v2764_v26 = vshll.u32 %v5700_v47, 16 }
  0x7d   : > { %4807 = vmatprep.subr.msk.bf16.mxu1 %vm598_vm0, %v4000_v12  ;;  %v2711_v12 = vor.u32 %v2710_v23, %v2707_v52  ;;  %v2742_v52 = vshll.u32 %v5740_v30, 16  ;;  %v2756_v23 = vshll.u32 %v5743_v46, 16 }
  0x7e   : > { %4498 = vmatmul.mubr.msk.bf16.gmra.mrb[4].mxu0 %vm585_vm4, %v4096_v62  ;;  %v5710_v62 = vld [vmem:[%s5615_s10 + $0x14] sm:$0x1]  ;;  %v2725_v15 = vor.u32 %v2724_v58, %v2721_v44  ;;  %v3994_v44 = vcombine.low %v5504_v28, %v5535_v50  ;;  %v3990_v58 = vrot.slane %v5471_v17, 9 }
  0x7f   : > { %4503 = vmatprep.mubr.msk.bf16.mxu0 %vm585_vm4, %v4102_v53  ;;  %v3993_v53 = vcombine.low %v6265_v25, %v5498_v39  ;;  %v6267_v39 = vcombine.low %v5345_v54, %v5543_v4  ;;  %v2714_v25 = vshll.u32 %v5710_v62, 16  ;;  %v5750_v54 = vsel %vm5112_vm3, %v2698_v36, %v2702_v49 }
  0x80   : > { %v2739_v49 = vor.u32 %v2738_v24, %v2735_v59  ;;  %v2753_v36 = vor.u32 %v2752_v29, %v2749_v55  ;;  %v4111_v31 = vcombine.low %v2689_v2, %v5750_v54  ;;  %v2712_v40 = vrot.slane %v2711_v12, 4  ;;  %v5769_v59 = vld [vmem:[%s5615_s10 + $0x34] sm:$0x1] }
  0x81   : > { %v2716_v6 = vrot.slane %v2714_v25, 5  ;;  %v2726_v0 = vrot.slane %v2725_v15, 4  ;;  %v2763_v24 = vrot.slane %v2761_v9, 4  ;;  %v2766_v55 = vrot.slane %v2764_v26, 5 }
  0x82   : > { %v2740_v10 = vrot.slane %v2739_v49, 4  ;;  %v2754_v28 = vrot.slane %v2753_v36, 4  ;;  %v2758_v50 = vrot.slane %v2756_v23, 5  ;;  %v2770_v12 = vshll.u32 %v5769_v59, 16 }
  0x83   : > { %4368 = vmatmul.mubr.msk.bf16.gmra.mrb[4].mxu1 %vm585_vm4, %v6267_v39  ;;  %v2775_v39 = vshrl.u32 %v5707_v43, 16  ;;  %v5786_v25 = vsel %vm5112_vm3, %v2712_v40, %v2716_v6  ;;  %v2786_v26 = vrot.slane %v2784_v42, 5  ;;  %v2904_v49 = vrot.slane %v5660_v38, 5 }
  0x84   : > { %4373 = vmatprep.mubr.msk.bf16.mxu1 %vm585_vm4, %v3992_v13  ;;  %v2778_v13 = vshll.u32 %v5707_v43, 16  ;;  %v5803_v40 = vsel %vm5112_vm3, %v2754_v28, %v2758_v50  ;;  %v4123_v28 = vrot.slane %v5693_v32, 9  ;;  %v2916_v50 = vrot.slane %v5740_v30, 5 }
  0x85   : > { %v2777_v29 = vrot.slane %v2775_v39, 4  ;;  %v4119_v39 = vrot.slane %v5629_v51, 9 }
  0x86   : > { %4504 = vmatmul.mubr.msk.bf16.vlgmr.msra.gmra.mrb[0].mxu0 %vm585_vm4, %v5688_v8  ;;  %v2780_v34 = vrot.slane %v2778_v13, 5  ;;  %v2900_v13 = vrot.slane %v5657_v20, 5 }
  0x87   : > { %4512 = vmatpush3.bf16.msra.mxu0 %v2815_v11  ;;  %4507 = vmatprep.mubr.msk.bf16.mxu0 %vm585_vm4, %v5717_v48  ;;  %v1120_v11 = vrot.slane %v5467_v21, 5  ;;  %v2744_v48 = vrot.slane %v2742_v52, 5  ;;  %v4006_v21 = vld [vmem:[%s6212_s3 + $0x1c] sm:$0xf]  ;;  %v6268_v52 = vld [vmem:[#allocation8_spill] sm:$0xff] }
  0x88   : > { %4822 = vmatprep.subr.msk.bf16.mxu0 %vm598_vm0, %v5725_v5  ;;  %v2781_v15 = vor.u32 %v2780_v34, %v2777_v29  ;;  %v2957_v34 = vsel %vm598_vm0, %v5725_v5, 0  ;;  %v4136_v5 = vld [vmem:[%s6212_s3 + $0x54] sm:$0xf]  ;;  %v2901_v38 = vsel %vm5261_vm7, %v4119_v39, %v2900_v13  ;;  %v1323_v23 = vsel %vm598_vm0, %v4006_v21, 0 }
  0x89   : > { %v5782_v2 = vsel %vm5261_vm7, %v3990_v58, %v1120_v11  ;;  %v5799_v6 = vsel %vm5112_vm3, %v2740_v10, %v2744_v48  ;;  %v4121_v58 = vrot.slane %v5668_v16, 9  ;;  %v2912_v29 = vrot.slane %v5720_v33, 5 }
  0x8a   : > { %v5815_v9 = vcombine.low %v5799_v6, %v5803_v40  ;;  %v2782_v10 = vrot.slane %v2781_v15, 4  ;;  %v5863_v15 = vld [vmem:[%s5062_s8 + $0x48] sm:$0xf]  ;;  %v2924_v13 = vrot.slane %v5769_v59, 5 }
  0x8b   : > { %4374 = vmatmul.mubr.msk.bf16.vlgmr.msra.gmra.mrb[0].mxu1 %vm585_vm4, %v3993_v53  ;;  %v5793_v53 = vsel %vm5112_vm3, %v2726_v0, %v2730_v27  ;;  %v2772_v27 = vrot.slane %v2770_v12, 5  ;;  %v2920_v12 = vrot.slane %v5743_v46, 5  ;;  %v1302_v33 = vshrl.u32 %v5863_v15, 16 }
  0x8c   : > { %4382 = vmatpush3.bf16.msra.mxu1 %v1226_v61  ;;  %4377 = vmatprep.mubr.msk.bf16.mxu1 %vm585_vm4, %v3994_v44  ;;  %v2767_v61 = vor.u32 %v2766_v55, %v2763_v24  ;;  %v5809_v0 = vcombine.low %v5786_v25, %v5793_v53  ;;  %v5837_v20 = vsel %vm5112_vm3, %v2782_v10, %v2786_v26  ;;  %v2908_v24 = vrot.slane %v5710_v62, 5  ;;  %v4013_v62 = vld [vmem:[%s6212_s3 + $0x20] sm:$0xf] }
  0x8d   : > { %4808 = vmatprep.subr.msk.bf16.mxu1 %vm598_vm0, %v4006_v21  ;;  %v4122_v55 = vrot.slane %v5671_v57, 9  ;;  %v4124_v21 = vrot.slane %v5696_v60, 9  ;;  %v1305_v30 = vshll.u32 %v5863_v15, 16  ;;  %v1304_v10 = vrot.slane %v1302_v33, 4 }
  0x8e   : > { %4508 = vmatmul.mubr.msk.bf16.gmra.mrb[4].mxu0 %vm585_vm4, %v5734_v14  ;;  %v2768_v48 = vrot.slane %v2767_v61, 4  ;;  %v6269_v61 = vld [vmem:[#allocation9_spill] sm:$0xff]  ;;  %v5877_v46 = vsel %vm5261_vm7, %v4121_v58, %v2908_v24 }
  0x8f   : > { %4513 = vmatprep.mubr.msk.bf16.mxu0 %vm585_vm4, %v4111_v31  ;;  %v3995_v31 = vcombine.low %v5539_v63, %v5782_v2  ;;  %v4120_v63 = vrot.slane %v5633_v56, 9  ;;  %v5881_v42 = vsel %vm5261_vm7, %v4122_v55, %v2912_v29  ;;  %v1307_v26 = vrot.slane %v1305_v30, 5  ;;  %v4155_v30 = vld [vmem:[%s6212_s3 + $0x5c] sm:$0xf] }
  0x90   : > { %v5833_v51 = vsel %vm5112_vm3, %v2768_v48, %v2772_v27  ;;  %v5896_v27 = vcombine.low %v5877_v46, %v5881_v42  ;;  %v4125_v48 = vrot.slane %v5700_v47, 9  ;;  %v1411_v29 = vsel %vm598_vm0, %v4013_v62, 0 }
  0x91   : > { %v5843_v36 = vsel %vm5261_vm7, %v4120_v63, %v2904_v49  ;;  %v5849_v44 = vcombine.low %v5833_v51, %v5837_v20  ;;  %v4126_v63 = vrot.slane %v5707_v43, 9  ;;  %v2928_v49 = vrot.slane %v5772_v7, 5 }
  0x92   : > { %v4128_v11 = vcombine.low %v2901_v38, %v5843_v36  ;;  %v4145_v38 = vld [vmem:[%s6212_s3 + $0x58] sm:$0xf]  ;;  %v1308_v59 = vor.u32 %v1307_v26, %v1304_v10  ;;  %v5920_v7 = vsel %vm5261_vm7, %v4125_v48, %v2924_v13  ;;  %v2563_v13 = vld [vmem:[%s5615_s10 + $0x44] sm:$0x1] }
  0x93   : > { %4378 = vmatmul.mubr.msk.bf16.gmra.mrb[4].mxu1 %vm585_vm4, %v3995_v31  ;;  %v5886_v31 = vsel %vm5261_vm7, %v4123_v28, %v2916_v50  ;;  %v4137_v28 = vcombine.low %v5633_v56, %v5668_v16  ;;  %v6271_v50 = vld [vmem:[#allocation6_spill] sm:$0xff]  ;;  %v4138_v16 = vcombine.low %v5671_v57, %v5693_v32  ;;  %v3162_v33 = vsel %vm598_vm0, %v4145_v38, 0 }
  0x94   : > { %4383 = vmatprep.mubr.msk.bf16.mxu1 %vm585_vm4, %v6268_v52  ;;  %v454_v52 = vld [vmem:[%s5062_s8 + $0x4c] sm:$0x1]  ;;  %v1309_v24 = vrot.slane %v1308_v59, 4  ;;  %v3262_v59 = vsel %vm598_vm0, %v4155_v30, 0 }
  0x95   : > { %v1311_v58 = vshll.u32 %v454_v52, 16 }
  0x96   : > { %4514 = vmatmul.mubr.msk.bf16.vlgmr.msra.gmra.mrb[0].mxu0 %vm585_vm4, %v5809_v0 }
  0x97   : > { %4522 = vmatpush3.bf16.msra.mxu0 %v2957_v34  ;;  %4517 = vmatprep.mubr.msk.bf16.mxu0 %vm585_vm4, %v5815_v9  ;;  %v4001_v34 = vcombine.low %v5471_v17, %v5863_v15  ;;  %v3053_v17 = vsel %vm598_vm0, %v4136_v5, 0  ;;  %v1313_v55 = vrot.slane %v1311_v58, 5  ;;  %v6273_v58 = vld [vmem:[#allocation10_spill] sm:$0xff] }
  0x98   : > { %4823 = vmatprep.subr.msk.bf16.mxu0 %vm598_vm0, %v4136_v5  ;;  %v5924_v5 = vsel %vm5261_vm7, %v4126_v63, %v2928_v49  ;;  %v4147_v63 = vcombine.low %v5793_v53, %v5799_v6  ;;  %v5990_v49 = vld [vmem:[%s5129_s15 + $0x8] sm:$0xf] }
  0x9b   : > { %4384 = vmatmul.mubr.msk.bf16.vlgmr.msra.gmra.mrb[0].mxu1 %vm585_vm4, %v6269_v61  ;;  %v6272_v61 = vld [vmem:[#allocation7_spill] sm:$0xff] }
  0x9c   : > { %4392 = vmatpush3.bf16.msra.mxu1 %v1323_v23  ;;  %4387 = vmatprep.mubr.msk.bf16.mxu1 %vm585_vm4, %v5449_v41  ;;  %v5890_v41 = vsel %vm5261_vm7, %v4124_v21, %v2920_v12  ;;  %v6270_v23 = vld [vmem:[#allocation3_spill] sm:$0xff]  ;;  %v4019_v21 = vld [vmem:[%s6212_s3 + $0x24] sm:$0xf]  ;;  %v1314_v12 = vsel %vm5112_vm3, %v1309_v24, %v1313_v55  ;;  %v3240_v55 = vrot.slane %v2563_v13, 5 }
  0x9d   : > { %4809 = vmatprep.subr.msk.bf16.mxu1 %vm598_vm0, %v4013_v62  ;;  %v5901_v39 = vcombine.low %v5886_v31, %v5890_v41  ;;  %v4007_v56 = vcombine.low %v5543_v4, %v1314_v12  ;;  %v4139_v62 = vcombine.low %v5696_v60, %v5700_v47  ;;  %v5961_v4 = vld [vmem:[%s5615_s10 + $0x40] sm:$0xf]  ;;  %v4012_v47 = vrot.slane %v5863_v15, 9  ;;  %v4045_v24 = vld [vmem:[%s6212_s3 + $0x2c] sm:$0xf] }
  0x9e   : > { %4518 = vmatmul.mubr.msk.bf16.gmra.mrb[4].mxu0 %vm585_vm4, %v5849_v44  ;;  %v3129_v57 = vshrl.u32 %v5961_v4, 16  ;;  %v3132_v32 = vshll.u32 %v5961_v4, 16  ;;  %v4140_v60 = vcombine.low %v5707_v43, %v5961_v4  ;;  %v1541_v48 = vsel %vm598_vm0, %v4019_v21, 0  ;;  %v4028_v43 = vld [vmem:[%s6212_s3 + $0x28] sm:$0xf] }
  0x9f   : > { %4523 = vmatprep.mubr.msk.bf16.mxu0 %vm585_vm4, %v4128_v11  ;;  %v5929_v11 = vcombine.low %v5920_v7, %v5924_v5 }
  0xa0   : > { %v3131_v10 = vrot.slane %v3129_v57, 4  ;;  %v3134_v26 = vrot.slane %v3132_v32, 5 }
  0xa3   : > { %4388 = vmatmul.mubr.msk.bf16.gmra.mrb[4].mxu1 %vm585_vm4, %v4001_v34  ;;  %v1401_v34 = vrot.slane %v454_v52, 5  ;;  %v4901_v52 = vld [vmem:[%s5129_s15] sm:$0xf] }
  0xa4   : > { %4393 = vmatprep.mubr.msk.bf16.mxu1 %vm585_vm4, %v6270_v23  ;;  %v4037_v12 = vrot.slane %v4901_v52, 9 }
  0xa5   : > { %v1402_v15 = vsel %vm5261_vm7, %v4012_v47, %v1401_v34 }
  0xa6   : > { %4524 = vmatmul.mubr.msk.bf16.vlgmr.msra.gmra.mrb[0].mxu0 %vm585_vm4, %v5896_v27 }
  0xa7   : > { %4532 = vmatpush3.bf16.msra.mxu0 %v3053_v17  ;;  %4527 = vmatprep.mubr.msk.bf16.mxu0 %vm585_vm4, %v5901_v39  ;;  %v4020_v17 = vcombine.low %v4901_v52, %v5990_v49 }
  0xa8   : > { %4824 = vmatprep.subr.msk.bf16.mxu0 %vm598_vm0, %v4145_v38  ;;  %v4148_v38 = vcombine.low %v5803_v40, %v5833_v51  ;;  %v1755_v40 = vsel %vm598_vm0, %v4028_v43, 0  ;;  %v4156_v51 = vcombine.low %v5843_v36, %v5877_v46  ;;  %v4158_v36 = vcombine.low %v5890_v41, %v5920_v7  ;;  %v4902_v41 = vld [vmem:[%s5129_s15 + $0x4] sm:$0x1] }
  0xa9   : > { %v4154_v46 = vrot.slane %v5961_v4, 9  ;;  %v1840_v7 = vrot.slane %v4902_v41, 5 }
  0xab   : > { %4394 = vmatmul.mubr.msk.bf16.vlgmr.msra.gmra.mrb[0].mxu1 %vm585_vm4, %v6271_v50  ;;  %v6275_v50 = vld [vmem:[#allocation4_spill] sm:$0xff] }
  0xac   : > { %4402 = vmatpush3.bf16.msra.mxu1 %v1411_v29  ;;  %4397 = vmatprep.mubr.msk.bf16.mxu1 %vm585_vm4, %v6272_v61  ;;  %v4054_v61 = vld [vmem:[%s6212_s3 + $0x30] sm:$0xf] }
  0xad   : > { %4810 = vmatprep.subr.msk.bf16.mxu1 %vm598_vm0, %v4019_v21  ;;  %v1897_v21 = vsel %vm598_vm0, %v4045_v24, 0 }
  0xae   : > { %4528 = vmatmul.mubr.msk.bf16.gmra.mrb[4].mxu0 %vm585_vm4, %v5929_v11 }
  0xaf   : > { %4533 = vmatprep.mubr.msk.bf16.mxu0 %vm585_vm4, %v4137_v28  ;;  %v6274_v28 = vld [vmem:[#allocation13_spill] sm:$0xff] }
  0xb3   : > { %4398 = vmatmul.mubr.msk.bf16.gmra.mrb[4].mxu1 %vm585_vm4, %v4007_v56  ;;  %v6276_v56 = vld [vmem:[#allocation5_spill] sm:$0xff] }
  0xb4   : > { %4403 = vmatprep.mubr.msk.bf16.mxu1 %vm585_vm4, %v5437_v45  ;;  %v4146_v45 = vcombine.low %v5750_v54, %v5786_v25  ;;  %v3135_v54 = vor.u32 %v3134_v26, %v3131_v10  ;;  %v3138_v25 = vshll.u32 %v2563_v13, 16  ;;  %v6280_v10 = vld [vmem:[#allocation20_spill] sm:$0xff] }
  0xb5   : > { %v4903_v26 = vld [vmem:[%s6212_s3 + $0x34] sm:$0xf]  ;;  %v4904_v13 = vld [vmem:[%s5129_s15 + $0x10] sm:$0xf] }
  0xb6   : > { %4534 = vmatmul.mubr.msk.bf16.vlgmr.msra.gmra.mrb[0].mxu0 %vm585_vm4, %v4138_v16  ;;  %v3140_v23 = vrot.slane %v3138_v25, 5 }
  0xb7   : > { %4542 = vmatpush3.bf16.msra.mxu0 %v3162_v33  ;;  %4537 = vmatprep.mubr.msk.bf16.mxu0 %vm585_vm4, %v4139_v62  ;;  %v6277_v62 = vld [vmem:[#allocation18_spill] sm:$0xff]  ;;  %v6278_v33 = vld [vmem:[#allocation12_spill] sm:$0xff] }
  0xb8   : > { %4825 = vmatprep.subr.msk.bf16.mxu0 %vm598_vm0, %v4155_v30 }
  0xbb   : > { %4404 = vmatmul.mubr.msk.bf16.vlgmr.msra.gmra.mrb[0].mxu1 %vm585_vm4, %v5520_v1  ;;  %v4014_v1 = vcombine.low %v5782_v2, %v1402_v15  ;;  %v4164_v2 = vld [vmem:[%s6212_s3 + $0x60] sm:$0xf] }
  0xbc   : > { %4412 = vmatpush3.bf16.msra.mxu1 %v1541_v48  ;;  %4407 = vmatprep.mubr.msk.bf16.mxu1 %vm585_vm4, %v5563_v19  ;;  %v3136_v19 = vrot.slane %v3135_v54, 4  ;;  %v3346_v29 = vsel %vm598_vm0, %v4164_v2, 0  ;;  %v2565_v48 = vld [vmem:[%s5615_s10 + $0x4c] sm:$0x1] }
  0xbd   : > { %4811 = vmatprep.subr.msk.bf16.mxu1 %vm598_vm0, %v4028_v43  ;;  %v4055_v43 = vcombine.low %v5990_v49, %v4904_v13  ;;  %v4906_v49 = vld [vmem:[%s5129_s15 + $0x20] sm:$0xf] }
  0xbe   : > { %4538 = vmatmul.mubr.msk.bf16.gmra.mrb[4].mxu0 %vm585_vm4, %v4140_v60  ;;  %v6006_v53 = vsel %vm5112_vm3, %v3136_v19, %v3140_v23  ;;  %v1993_v60 = vsel %vm598_vm0, %v4054_v61, 0  ;;  %v4908_v19 = vld [vmem:[%s5129_s15 + $0x30] sm:$0xf] }
  0xbf   : > { %4543 = vmatprep.mubr.msk.bf16.mxu0 %vm585_vm4, %v4146_v45  ;;  %v4149_v6 = vcombine.low %v5837_v20, %v6006_v53  ;;  %v4157_v20 = vcombine.low %v5881_v42, %v5886_v31  ;;  %v6041_v42 = vsel %vm5261_vm7, %v4154_v46, %v3240_v55  ;;  %v6279_v45 = vld [vmem:[#allocation19_spill] sm:$0xff] }
  0xc0   : > { %v4159_v31 = vcombine.low %v5924_v5, %v6041_v42  ;;  %v1841_v5 = vsel %vm5261_vm7, %v4037_v12, %v1840_v7 }
  0xc3   : > { %4408 = vmatmul.mubr.msk.bf16.gmra.mrb[4].mxu1 %vm585_vm4, %v4014_v1 }
  0xc4   : > { %4413 = vmatprep.mubr.msk.bf16.mxu1 %vm585_vm4, %v4020_v17 }
  0xc6   : > { %4544 = vmatmul.mubr.msk.bf16.vlgmr.msra.gmra.mrb[0].mxu0 %vm585_vm4, %v4147_v63  ;;  %v4905_v63 = vld [vmem:[%s5129_s15 + $0x18] sm:$0xf] }
  0xc7   : > { %4552 = vmatpush3.bf16.msra.mxu0 %v3262_v59  ;;  %4547 = vmatprep.mubr.msk.bf16.mxu0 %vm585_vm4, %v4148_v38  ;;  %v4056_v52 = vcombine.low %v4905_v63, %v4906_v49  ;;  %v4907_v38 = vld [vmem:[%s5129_s15 + $0x28] sm:$0xf] }
  0xc8   : > { %4826 = vmatprep.subr.msk.bf16.mxu0 %vm598_vm0, %v4164_v2  ;;  %v4057_v23 = vcombine.low %v4907_v38, %v4908_v19  ;;  %v6283_v2 = vld [vmem:[#allocation17_spill] sm:$0xff] }
  0xcb   : > { %4414 = vmatmul.mubr.msk.bf16.vlgmr.msra.gmra.mrb[0].mxu1 %vm585_vm4, %v6273_v58 }
  0xcc   : > { %4422 = vmatpush3.bf16.msra.mxu1 %v1755_v40  ;;  %4417 = vmatprep.mubr.msk.bf16.mxu1 %vm585_vm4, %v5453_v37  ;;  %v4170_v37 = vld [vmem:[%s6212_s3 + $0x64] sm:$0xf] }
  0xcd   : > { %4812 = vmatprep.subr.msk.bf16.mxu1 %vm598_vm0, %v4045_v24  ;;  %v3443_v16 = vsel %vm598_vm0, %v4170_v37, 0  ;;  %v6285_v24 = vld [vmem:[#allocation14_spill] sm:$0xff] }
  0xce   : > { %4548 = vmatmul.mubr.msk.bf16.gmra.mrb[4].mxu0 %vm585_vm4, %v4149_v6 }
  0xcf   : > { %4553 = vmatprep.mubr.msk.bf16.mxu0 %vm585_vm4, %v4156_v51  ;;  %v3521_v51 = vrot.slane %v2565_v48, 5 }
  0xd3   : > { %4418 = vmatmul.mubr.msk.bf16.gmra.mrb[4].mxu1 %vm585_vm4, %v6274_v28 }
  0xd4   : > { %4423 = vmatprep.mubr.msk.bf16.mxu1 %vm585_vm4, %v6275_v50 }
  0xd6   : > { %4554 = vmatmul.mubr.msk.bf16.vlgmr.msra.gmra.mrb[0].mxu0 %vm585_vm4, %v4157_v20  ;;  %v6286_v20 = vld [vmem:[#allocation15_spill] sm:$0xff] }
  0xd7   : > { %4562 = vmatpush3.bf16.msra.mxu0 %v3346_v29  ;;  %4557 = vmatprep.mubr.msk.bf16.mxu0 %vm585_vm4, %v4158_v36  ;;  %v6287_v36 = vcombine.low %v6285_v24, %v6286_v20  ;;  %v6139_v29 = vld [vmem:[%s6213_s4] ss:$0 sm:$0xff] }
  0xd8   : > { %4827 = vmatprep.subr.msk.bf16.mxu0 %vm598_vm0, %v4170_v37 }
  0xdb   : > { %4424 = vmatmul.mubr.msk.bf16.vlgmr.msra.gmra.mrb[0].mxu1 %vm585_vm4, %v5510_v3  ;;  %v4046_v3 = vcombine.low %v1841_v5, %v6276_v56 }
  0xdc   : > { %4432 = vmatpush3.bf16.msra.mxu1 %v1897_v21  ;;  %4427 = vmatprep.mubr.msk.bf16.mxu1 %vm585_vm4, %v5567_v22  ;;  %v4177_v22 = vld [vmem:[%s6212_s3 + $0x68] sm:$0xf] }
  0xdd   : > { %4813 = vmatprep.subr.msk.bf16.mxu1 %vm598_vm0, %v4054_v61  ;;  %v3531_v25 = vsel %vm598_vm0, %v4177_v22, 0 }
  0xde   : > { %4558 = vmatmul.mubr.msk.bf16.gmra.mrb[4].mxu0 %vm585_vm4, %v4159_v31 }
  0xdf   : > { %4563 = vmatprep.mubr.msk.bf16.mxu0 %vm585_vm4, %v5688_v8  ;;  %v2564_v8 = vld [vmem:[%s5615_s10 + $0x48] sm:$0xf]  ;;  %s3934_s10 = sshll.u32 %s6299_s25, 6 }
  0xe0   : > { %v3422_v30 = vshrl.u32 %v2564_v8, 16  ;;  %v3425_v57 = vshll.u32 %v2564_v8, 16  ;;  %v4165_v32 = vcombine.low %v5961_v4, %v2564_v8  ;;  %v3431_v4 = vshll.u32 %v2565_v48, 16 }
  0xe1   : > { %v4176_v40 = vrot.slane %v2564_v8, 9 }
  0xe2   : > { %v3424_v47 = vrot.slane %v3422_v30, 4  ;;  %v3427_v34 = vrot.slane %v3425_v57, 5  ;;  %v3433_v54 = vrot.slane %v3431_v4, 5 }
  0xe3   : > { %4428 = vmatmul.mubr.msk.bf16.gmra.mrb[4].mxu1 %vm585_vm4, %v6277_v62 }
  0xe4   : > { %4433 = vmatprep.mubr.msk.bf16.mxu1 %vm585_vm4, %v4046_v3 }
  0xe6   : > { %4564 = vmatmul.mubr.msk.bf16.vlgmr.msra.gmra.mrb[0].mxu0 %vm585_vm4, %v6278_v33 }
  0xe7   : > { %4572 = vmatpush3.bf16.msra.mxu0 %v3443_v16  ;;  %4567 = vmatprep.mubr.msk.bf16.mxu0 %vm585_vm4, %v5734_v14  ;;  %v3428_v14 = vor.u32 %v3427_v34, %v3424_v47 }
  0xe8   : > { %4828 = vmatprep.subr.msk.bf16.mxu0 %vm598_vm0, %v4177_v22 }
  0xe9   : > { %v3429_v15 = vrot.slane %v3428_v14, 4 }
  0xeb   : > { %4434 = vmatmul.mubr.msk.bf16.vlgmr.msra.gmra.mrb[0].mxu1 %vm585_vm4, %v6279_v45  ;;  %v3434_v1 = vsel %vm5112_vm3, %v3429_v15, %v3433_v54 }
  0xec   : > { %4442 = vmatpush3.bf16.msra.mxu1 %v1993_v60  ;;  %4437 = vmatprep.mubr.msk.bf16.mxu1 %vm585_vm4, %v6280_v10  ;;  %v4171_v17 = vcombine.low %v6006_v53, %v3434_v1  ;;  %v6284_v53 = vld [vmem:[#allocation16_spill] sm:$0xff] }
  0xed   : > { %4815 = vmatprep.subr.msk.bf16.mxu1 %vm598_vm0, %v4903_v26  ;;  %v4066_v6 = vcombine.low %v6284_v53, %v6283_v2  ;;  %vm3674_vm0 = vcmask 57344  }
  0xee   : > { %4568 = vmatmul.mubr.msk.bf16.gmra.mrb[4].mxu0 %vm585_vm4, %v4165_v32 }
  0xef   : > { %4573 = vmatprep.mubr.msk.bf16.mxu0 %vm585_vm4, %v5809_v0  ;;  %v6281_v0 = vld [vmem:[#allocation21_spill] sm:$0xff] }
  0xf3   : > { %4438 = vmatmul.mubr.msk.bf16.gmra.mrb[4].mxu1 %vm585_vm4, %v6281_v0 }
  0xf4   : > { %4443 = vmatprep.mubr.msk.bf16.mxu1 %vm585_vm4, %v4055_v43 }
  0xf6   : > { %4574 = vmatmul.mubr.msk.bf16.vlgmr.msra.gmra.mrb[0].mxu0 %vm585_vm4, %v5815_v9  ;;  %v6282_v9 = vld [vmem:[#allocation2_spill] sm:$0xff] }
  0xf7   : > { %4582 = vmatpush3.bf16.msra.mxu0 %v3531_v25  ;;  %4577 = vmatprep.mubr.msk.bf16.mxu0 %vm585_vm4, %v5849_v44  ;;  %v4910_v44 = vld [vmem:[%s5129_s15 + $0x40] sm:$0xf]  ;;  %s3933_s15 = sshll.u32 %s6305_s24, 3 }
  0xf8   : > { %v4058_v59 = vcombine.low %v4909_v35, %v4910_v44  ;;  %s417_s16 = sadd.s32 %s3934_s10, %s3933_s15  ;;  %s433_s15 = scalar_lea.vmem %s6216_s7, %s425_s9 }
  0xf9   : > { %s3935_s20 = sshll.u32 %s417_s16, 3 }
  0xfa   : > { %s6146_s23 = scalar_lea.vmem %s6214_s5, %s3935_s20 }
  0xfb   : > { %4444 = vmatmul.mubr.msk.bf16.vlgmr.msra.gmra.mrb[0].mxu1 %vm585_vm4, %v4056_v52 }
  0xfc   : > { %4592 = vmatpush3.bf16.msra.mxu1 %v6282_v9  ;;  %4447 = vmatprep.mubr.msk.bf16.mxu1 %vm585_vm4, %v4057_v23 }
  0xfe   : > { %4578 = vmatmul.mubr.msk.bf16.gmra.mrb[4].mxu0 %vm585_vm4, %v4171_v17 }
  0xff   : > { %4583 = vmatprep.mubr.msk.bf16.mxu0 %vm585_vm4, %v5896_v27  ;;  %v3522_v27 = vsel %vm5261_vm7, %v4176_v40, %v3521_v51 }
 0x100   : > { %v4178_v58 = vcombine.low %v6041_v42, %v3522_v27 }
 0x103   : > { %4448 = vmatmul.mubr.msk.bf16.gmra.mrb[4].mxu1 %vm585_vm4, %v4058_v59 }
 0x104   : > { %4457 = vmatprep.mubr.msk.bf16.mxu1 %vm585_vm4, %v4066_v6 }
 0x106   : > { %4584 = vmatmul.mubr.msk.bf16.vlgmr.msra.gmra.mrb[0].mxu0 %vm585_vm4, %v5901_v39 }
 0x107   : > { %4587 = vmatprep.mubr.msk.bf16.mxu0 %vm585_vm4, %v5929_v11 }
 0x10e   : > { %4588 = vmatmul.mubr.msk.bf16.gmra.mrb[4].mxu0 %vm585_vm4, %v4178_v58 }
 0x10f   : > { %4458 = vmatmul.mubr.msk.bf16.vlgmr.msra.gmra.mrb[4].mxu1 %vm585_vm4, %v6287_v36 }
 0x1ce   : > { %v4445_v46 = vpop.f32.mrb[0].mxu1 }
 0x1cf   : > { %v2029_v39 = vpop.f32.mrb[1].mxu1 }
 0x1d0   : > { %v4446_v55 = vpop.f32.mrb[2].mxu1 }
 0x1d1   : > { %v2032_v11 = vpop.f32.mrb[3].mxu1 }
 0x1d9   : > { %v4585_v18 = vpop.f32.mrb[0].mxu0 }
 0x1da   : > { %v4593_v28 = vadd.f32 %v4585_v18, %v4445_v46  ;;  %v3567_v37 = vpop.f32.mrb[1].mxu0 }
 0x1db   : > { %v4594_v50 = vadd.f32 %v3567_v37, %v2029_v39  ;;  %v4586_v42 = vpop.f32.mrb[2].mxu0 }
 0x1dc   : > { %v3615_v31 = vadd.f32 %v4593_v28, %v6139_v29  ;;  %v4595_v41 = vadd.f32 %v4586_v42, %v4446_v55  ;;  %v3570_v7 = vpop.f32.mrb[3].mxu0 }
 0x1dd   : > { %v3613_v21 = vadd.f32 %v4594_v50, %v6139_v29  ;;  %v4596_v12 = vadd.f32 %v3570_v7, %v2032_v11 }
 0x1de   : > { %vm3623_vm8 = vcmp.ge.f32.partialorder %v3615_v31, 0.0  ;;  %v3631_v61 = vmul.f32 0.2, %v3615_v31  ;;  %v3616_v5 = vadd.f32 %v4595_v41, %v6139_v29 }
 0x1df   : > { %vm3621_vm9 = vcmp.ge.f32.partialorder %v3613_v21, 0.0  ;;  %v3629_v56 = vmul.f32 0.2, %v3613_v21  ;;  %v3614_v3 = vadd.f32 %v4596_v12, %v6139_v29 }
 0x1e0   : > { %v3639_v16 = vsel %vm3623_vm8, %v3615_v31, %v3631_v61  ;;  %vm3624_vm10 = vcmp.ge.f32.partialorder %v3616_v5, 0.0  ;;  %v3632_v62 = vmul.f32 0.2, %v3616_v5 }
 0x1e1   : > { %3647 = vst.msk [vmem:[%s6146_s23 + $0x10] sm:$0xff] %vm585_vm4, %v3639_v16  ;;  %v3637_v22 = vsel %vm3621_vm9, %v3613_v21, %v3629_v56  ;;  %vm3622_vm11 = vcmp.ge.f32.partialorder %v3614_v3, 0.0  ;;  %v4589_v33 = vpop.f32.mrb[4].mxu0  ;;  %v3678_v8 = vmul.f32 %v3639_v16, %v3639_v16  ;;  %v3630_v57 = vmul.f32 0.2, %v3614_v3 }
 0x1e2   : > { %3645 = vst.msk [vmem:[%s6146_s23] sm:$0xff] %vm585_vm4, %v3637_v22  ;;  %v3640_v30 = vsel %vm3624_vm10, %v3616_v5, %v3632_v62  ;;  %v3583_v32 = vpop.f32.mrb[5].mxu0  ;;  %v3676_v60 = vmul.f32 %v3637_v22, %v3637_v22  ;;  %v3656_v34 = vsel %vm585_vm4, %v3639_v16, 0.0  ;;  %v3653_v48 = vsel %vm585_vm4, %v3637_v22, 0.0  ;;  %v4459_v10 = vpop.f32.mrb[4].mxu1 }
 0x1e3   : > { %3648 = vst.msk [vmem:[%s6146_s23 + $0x18] sm:$0xff] %vm585_vm4, %v3640_v30  ;;  %v4590_v47 = vpop.f32.mrb[6].mxu0  ;;  %v3638_v45 = vsel %vm3622_vm11, %v3614_v3, %v3630_v57  ;;  %v3679_v4 = vmul.f32 %v3640_v30, %v3640_v30  ;;  %v2154_v43 = vpop.f32.mrb[5].mxu1  ;;  %v4597_v15 = vadd.f32 %v4589_v33, %v4459_v10  ;;  %v3687_v54 = vsel %vm585_vm4, %v3678_v8, 0.0 }
 0x1e4   : > { %v3586_v14 = vpop.f32.mrb[7].mxu0  ;;  %3646 = vst.msk [vmem:[%s6146_s23 + $0x8] sm:$0xff] %vm585_vm4, %v3638_v45  ;;  %v3654_v26 = vsel %vm585_vm4, %v3638_v45, 0.0  ;;  %v3677_v13 = vmul.f32 %v3638_v45, %v3638_v45  ;;  %v3658_v25 = vsel %vm585_vm4, %v3640_v30, 0.0  ;;  %v4460_v1 = vpop.f32.mrb[6].mxu1  ;;  %v4598_v63 = vadd.f32 %v3583_v32, %v2154_v43 }
 0x1e5   : > { %v3655_v0 = vadd.f32 %v3654_v26, %v3653_v48  ;;  %v3684_v49 = vsel %vm585_vm4, %v3676_v60, 0.0  ;;  %v3619_v17 = vadd.f32 %v4597_v15, %v6139_v29  ;;  %v2157_v38 = vpop.f32.mrb[7].mxu1  ;;  %v4599_v19 = vadd.f32 %v4590_v47, %v4460_v1 }
 0x1e6   : > { %v3685_v52 = vsel %vm585_vm4, %v3677_v13, 0.0  ;;  %v3617_v35 = vadd.f32 %v4598_v63, %v6139_v29  ;;  %v4600_v44 = vadd.f32 %v3586_v14, %v2157_v38  ;;  %v3689_v59 = vsel %vm585_vm4, %v3679_v4, 0.0 }
 0x1e7   : > { %v3657_v23 = vadd.f32 %v3656_v34, %v3655_v0  ;;  %v3686_v9 = vadd.f32 %v3685_v52, %v3684_v49  ;;  %vm3627_vm12 = vcmp.ge.f32.partialorder %v3619_v17, 0.0  ;;  %v3635_v2 = vmul.f32 0.2, %v3619_v17 }
 0x1e8   : > { %v3620_v53 = vadd.f32 %v4599_v19, %v6139_v29  ;;  %vm3625_vm13 = vcmp.ge.f32.partialorder %v3617_v35, 0.0  ;;  %v3633_v40 = vmul.f32 0.2, %v3617_v35  ;;  %v3618_v24 = vadd.f32 %v4600_v44, %v6139_v29 }
 0x1e9   : > { %v3688_v6 = vadd.f32 %v3687_v54, %v3686_v9  ;;  %v3659_v51 = vadd.f32 %v3658_v25, %v3657_v23  ;;  %v3643_v27 = vsel %vm3627_vm12, %v3619_v17, %v3635_v2 }
 0x1ea   : > { %vm3628_vm14 = vcmp.ge.f32.partialorder %v3620_v53, 0.0  ;;  %v3636_v58 = vmul.f32 0.2, %v3620_v53  ;;  %3651 = vst.msk [vmem:[%s6146_s23 + $0x30] sm:$0xff] %vm585_vm4, %v3643_v27  ;;  %v3641_v20 = vsel %vm3625_vm13, %v3617_v35, %v3633_v40  ;;  %vm3626_vm15 = vcmp.ge.f32.partialorder %v3618_v24, 0.0 }
 0x1eb   : > { %v3690_v36 = vadd.f32 %v3689_v59, %v3688_v6  ;;  %3649 = vst.msk [vmem:[%s6146_s23 + $0x20] sm:$0xff] %vm585_vm4, %v3641_v20  ;;  %v3660_v46 = vsel %vm585_vm4, %v3641_v20, 0.0  ;;  %v3680_v39 = vmul.f32 %v3641_v20, %v3641_v20  ;;  %v3634_v28 = vmul.f32 0.2, %v3618_v24 }
 0x1ec   : > { %v3644_v55 = vsel %vm3628_vm14, %v3620_v53, %v3636_v58  ;;  %v3661_v11 = vadd.f32 %v3660_v46, %v3659_v51  ;;  %v3682_v50 = vmul.f32 %v3643_v27, %v3643_v27  ;;  %v3664_v7 = vsel %vm585_vm4, %v3643_v27, 0.0 }
 0x1ed   : > { %3652 = vst.msk [vmem:[%s6146_s23 + $0x38] sm:$0xff] %vm585_vm4, %v3644_v55  ;;  %v3691_v18 = vsel %vm585_vm4, %v3680_v39, 0.0  ;;  %v3642_v29 = vsel %vm3626_vm15, %v3618_v24, %v3634_v28  ;;  %v3683_v21 = vmul.f32 %v3644_v55, %v3644_v55  ;;  %v3666_v3 = vsel %vm585_vm4, %v3644_v55, 0.0 }
 0x1ee   : > { %v3692_v37 = vadd.f32 %v3691_v18, %v3690_v36  ;;  %3650 = vst.msk [vmem:[%s6146_s23 + $0x28] sm:$0xff] %vm585_vm4, %v3642_v29  ;;  %v3662_v42 = vsel %vm585_vm4, %v3642_v29, 0.0  ;;  %v3681_v31 = vmul.f32 %v3642_v29, %v3642_v29  ;;  %v3695_v56 = vsel %vm585_vm4, %v3682_v50, 0.0 }
 0x1ef   : > { %v3663_v41 = vadd.f32 %v3662_v42, %v3661_v11  ;;  %v3697_v22 = vsel %vm585_vm4, %v3683_v21, 0.0 }
 0x1f0   : > { %v3693_v12 = vsel %vm585_vm4, %v3681_v31, 0.0 }
 0x1f1   : > { %v3665_v61 = vadd.f32 %v3664_v7, %v3663_v41  ;;  %v3694_v5 = vadd.f32 %v3693_v12, %v3692_v37 }
 0x1f3   : > { %v3667_v16 = vadd.f32 %v3666_v3, %v3665_v61  ;;  %v3696_v62 = vadd.f32 %v3695_v56, %v3694_v5 }
 0x1f5   : > { %v3668_v33 = vrot.slane %v3667_v16, 4  ;;  %v3698_v8 = vadd.f32 %v3697_v22, %v3696_v62 }
 0x1f7   : > { %v3669_v30 = vadd.f32 %v3668_v33, %v3667_v16  ;;  %v3699_v57 = vrot.slane %v3698_v8, 4 }
 0x1f9   : > { %v3670_v32 = vrot.slane %v3669_v30, 2  ;;  %v3700_v60 = vadd.f32 %v3699_v57, %v3698_v8 }
 0x1fb   : > { %v3671_v47 = vadd.f32 %v3670_v32, %v3669_v30  ;;  %v3701_v34 = vrot.slane %v3700_v60, 2 }
 0x1fd   : > { %v3672_v48 = vrot.slane %v3671_v47, 1  ;;  %v3702_v45 = vadd.f32 %v3701_v34, %v3700_v60 }
 0x1ff   : > { %v3673_v10 = vadd.f32 %v3672_v48, %v3671_v47  ;;  %v3703_v14 = vrot.slane %v3702_v45, 1 }
 0x201   : > { %3675 = vst.msk [vmem:[%s426_s12] sm:$0x1] %vm3674_vm0, %v3673_v10  ;;  %v3704_v4 = vadd.f32 %v3703_v14, %v3702_v45 }
 0x203   : > { %3705 = vst.msk [vmem:[%s433_s15] sm:$0x1] %vm3674_vm0, %v3704_v4 }
 0x204 PF: > { %s18_s28 = sadd.s32 1, %s4949_s28   ;;  %s6288_s24 = smov %s4941_s26 }
 0x205   : > { %p15_p10 = scmp.ge.s32.totalorder %s18_s28, 18   ;;  %s6289_s25 = smov %s4945_s27 }
 0x206   : > { %s6290_s26 = smov %s6293_s29  ;;  %s6291_s27 = smov %s6297_s30 }
 0x207   :  { %17 = sbr.rel (!%p15_p10) target bundleno = 3 (0x3), region = 126 }

// kernel: resblock_up.7
= control target key start
LH: loop header
LB: loop body
LE: loop exit
PB: predicated region body
PF: predicated region fallthrough
CT: control target
= control target key end

     0   :  { %v27_v0 = vlaneseq  ;;  %s216_s1 = inlined_call_operand.vmem [shape: f32[1,512], index: 1, kind: input, shape index: {}]   ;;  %s217_s2 = inlined_call_operand.vmem [shape: f32[1,512], index: 2, kind: input, shape index: {}]   ;;  %s218_s0 = inlined_call_operand.vmem [shape: f32[16,512], index: 0, kind: input, shape index: {}]   ;;  %s219_s3 = inlined_call_operand.vmem [shape: f32[16,512], index: 3, kind: input, shape index: {}]   ;;  %s220_s4 = inlined_call_operand.vmem [shape: f32[16,512], index: 4, kind: output, shape index: {}]  }
   0x1   :  { %v25_v2 = vld [vmem:[%s216_s1] sm:$0xf]  ;;  %v18_v6 = vld [vmem:[%s218_s0 + $0x8] sm:$0xff]  ;;  %v19_v10 = vld [vmem:[%s218_s0 + $0x10] sm:$0xff] }
   0x2   :  { %v28_v1 = vshrl.u32 %v27_v0, 7  ;;  %v55_v3 = vld [vmem:[%s217_s2] sm:$0xf]  ;;  %v22_v12 = vld [vmem:[%s218_s0 + $0x28] sm:$0xff]  ;;  %v20_v17 = vld [vmem:[%s218_s0 + $0x18] sm:$0xff] }
   0x3   :  { %v17_v4 = vld [vmem:[%s218_s0] sm:$0xff]  ;;  %v23_v18 = vld [vmem:[%s218_s0 + $0x30] sm:$0xff]  ;;  %v24_v19 = vld [vmem:[%s218_s0 + $0x38] sm:$0xff] }
   0x4   :  { %v29_v5 = vsub.s32 0, %v28_v1  ;;  %v33_v7 = vsub.s32 1, %v28_v1  ;;  %v37_v8 = vsub.s32 2, %v28_v1  ;;  %v41_v9 = vsub.s32 3, %v28_v1  ;;  %v21_v11 = vld [vmem:[%s218_s0 + $0x20] sm:$0xff]  ;;  %v86_v27 = vld [vmem:[%s219_s3 + $0x8] sm:$0xff] }
   0x5   :  { %v85_v25 = vld [vmem:[%s219_s3] sm:$0xff]  ;;  %v87_v31 = vld [vmem:[%s219_s3 + $0x10] sm:$0xff]  ;;  %v90_v34 = vld [vmem:[%s219_s3 + $0x28] sm:$0xff] }
   0x6   :  { %v30_v13 = vrot.slane %v25_v2, %v29_v5  ;;  %v60_v14 = vrot.slane %v55_v3, %v29_v5  ;;  %v34_v15 = vrot.slane %v25_v2, %v33_v7  ;;  %v64_v16 = vrot.slane %v55_v3, %v33_v7  ;;  %v89_v33 = vld [vmem:[%s219_s3 + $0x20] sm:$0xff]  ;;  %v88_v39 = vld [vmem:[%s219_s3 + $0x18] sm:$0xff]  ;;  %v91_v42 = vld [vmem:[%s219_s3 + $0x30] sm:$0xff] }
   0x7   :  { %v38_v20 = vrot.slane %v25_v2, %v37_v8  ;;  %v68_v21 = vrot.slane %v55_v3, %v37_v8  ;;  %v42_v22 = vrot.slane %v25_v2, %v41_v9  ;;  %v72_v23 = vrot.slane %v55_v3, %v41_v9  ;;  %v92_v43 = vld [vmem:[%s219_s3 + $0x38] sm:$0xff] }
   0x8   :  { %v47_v24 = vmul.f32 %v30_v13, %v17_v4  ;;  %v48_v26 = vmul.f32 %v34_v15, %v18_v6  ;;  %v51_v28 = vmul.f32 %v30_v13, %v21_v11  ;;  %v52_v29 = vmul.f32 %v34_v15, %v22_v12 }
   0x9   :  { %v49_v30 = vmul.f32 %v38_v20, %v19_v10  ;;  %v50_v32 = vmul.f32 %v42_v22, %v20_v17  ;;  %v53_v35 = vmul.f32 %v38_v20, %v23_v18  ;;  %v54_v36 = vmul.f32 %v42_v22, %v24_v19 }
   0xa   :  { %v77_v37 = vadd.f32 %v60_v14, %v47_v24  ;;  %v78_v38 = vadd.f32 %v64_v16, %v48_v26  ;;  %v81_v40 = vadd.f32 %v60_v14, %v51_v28  ;;  %v82_v41 = vadd.f32 %v64_v16, %v52_v29 }
   0xb   :  { %v79_v44 = vadd.f32 %v68_v21, %v49_v30  ;;  %v80_v45 = vadd.f32 %v72_v23, %v50_v32  ;;  %v83_v46 = vadd.f32 %v68_v21, %v53_v35  ;;  %v84_v47 = vadd.f32 %v72_v23, %v54_v36 }
   0xc   :  { %v93_v48 = vadd.f32 %v85_v25, %v77_v37  ;;  %v94_v49 = vadd.f32 %v86_v27, %v78_v38  ;;  %v97_v50 = vadd.f32 %v89_v33, %v81_v40  ;;  %v98_v51 = vadd.f32 %v90_v34, %v82_v41 }
   0xd   :  { %v95_v52 = vadd.f32 %v87_v31, %v79_v44  ;;  %v96_v53 = vadd.f32 %v88_v39, %v80_v45  ;;  %v99_v54 = vadd.f32 %v91_v42, %v83_v46  ;;  %v100_v55 = vadd.f32 %v92_v43, %v84_v47 }
   0xe   :  { %101 = vst [vmem:[%s220_s4] sm:$0xff] %v93_v48  ;;  %102 = vst [vmem:[%s220_s4 + $0x8] sm:$0xff] %v94_v49 }
   0xf   :  { %105 = vst [vmem:[%s220_s4 + $0x20] sm:$0xff] %v97_v50  ;;  %106 = vst [vmem:[%s220_s4 + $0x28] sm:$0xff] %v98_v51 }
  0x10   :  { %103 = vst [vmem:[%s220_s4 + $0x10] sm:$0xff] %v95_v52  ;;  %104 = vst [vmem:[%s220_s4 + $0x18] sm:$0xff] %v96_v53 }
  0x11   :  { %107 = vst [vmem:[%s220_s4 + $0x30] sm:$0xff] %v99_v54  ;;  %108 = vst [vmem:[%s220_s4 + $0x38] sm:$0xff] %v100_v55 }

</bundles_post_ra>
